<compile_context>
chip_gen: v7x
topology: tpu7x:2x2x1
jax: 0.10.0
libtpu: 0.0.40
codegen_flags: <defaults>
</compile_context>

<pallas_src>
import jax
import jax.numpy as jnp
import numpy as np
from jax import lax
from jax.experimental import pallas as pl
from jax.experimental.pallas import tpu as pltpu

BN_EPS = 1e-5
_UPCONV_KERNELS = [(3, 3), (2, 3), (3, 2), (2, 2)]
_BRANCH_PADS = (((1, 1), (1, 1)), ((0, 1), (1, 1)),
                ((1, 1), (0, 1)), ((0, 1), (0, 1)))   # ((top,bot),(left,right))


# --------------------------------------------------------------------------
# Fused Pallas kernel: one FasterUpProjModule for one batch element
# --------------------------------------------------------------------------
def _upproj_module_kernel(x_ref, wa_ref, ba_ref, wb_ref, bb_ref, o_ref):
    f32, bf16 = jnp.float32, jnp.bfloat16
    H = x_ref.shape[1]
    K = wb_ref.shape[-1]            # K == W*cin == 2W*co (lane width, 128 here)

    # 0/1 row-shift matrices: (S_dn @ X)[h] = X[h-1] (row 0 -> 0),
    #                         (S_up @ X)[h] = X[h+1] (row H-1 -> 0).
    rows = lax.broadcasted_iota(jnp.int32, (H, H), 0)
    cols = lax.broadcasted_iota(jnp.int32, (H, H), 1)
    s_dn = jnp.where(rows == cols + 1, 1.0, 0.0).astype(bf16)
    s_up = jnp.where(rows == cols - 1, 1.0, 0.0).astype(bf16)

    # ---- conv A: merged upper+bottom branch convs (bias/BN folded) --------
    xv = x_ref[0].astype(bf16)                                   # (H, K)
    x_dn = jnp.dot(s_dn, xv, preferred_element_type=f32).astype(bf16)
    x_up = jnp.dot(s_up, xv, preferred_element_type=f32).astype(bf16)
    ya = jnp.dot(x_dn, wa_ref[0], preferred_element_type=f32)
    ya = ya + jnp.dot(xv, wa_ref[1], preferred_element_type=f32)
    ya = ya + jnp.dot(x_up, wa_ref[2], preferred_element_type=f32)
    ya = ya + ba_ref[...]                                        # (H, 4K) f32
    # column sections (PixelShuffle-permuted): [u_even | u_odd | b_even | b_odd]

    # ---- upper branch: ReLU -> 3x3 conv (per output-row parity) -----------
    u = jnp.maximum(ya[:, :2 * K], 0.0).astype(bf16)             # (H, 2K)
    ue = u[:, :K]                                                # u_even[h]
    uo = u[:, K:]                                                # u_odd[h]
    uo_prev = jnp.dot(s_dn, uo, preferred_element_type=f32).astype(bf16)
    ue_next = jnp.dot(s_up, ue, preferred_element_type=f32).astype(bf16)
    # out[2h]   = u_odd[h-1]@Wb0 + u_even[h]@Wb1 + u_odd[h]   @Wb2
    # out[2h+1] = u_even[h] @Wb0 + u_odd[h] @Wb1 + u_even[h+1]@Wb2
    acc_e = jnp.dot(uo_prev, wb_ref[0], preferred_element_type=f32)
    acc_e = acc_e + jnp.dot(ue, wb_ref[1], preferred_element_type=f32)
    acc_e = acc_e + jnp.dot(uo, wb_ref[2], preferred_element_type=f32)
    acc_o = jnp.dot(ue, wb_ref[0], preferred_element_type=f32)
    acc_o = acc_o + jnp.dot(uo, wb_ref[1], preferred_element_type=f32)
    acc_o = acc_o + jnp.dot(ue_next, wb_ref[2], preferred_element_type=f32)

    # ---- epilogue: bias, add bottom branch (shuffled), final ReLU ---------
    bb = bb_ref[...]
    out_e = jnp.maximum(acc_e + bb + ya[:, 2 * K:3 * K], 0.0)
    out_o = jnp.maximum(acc_o + bb + ya[:, 3 * K:], 0.0)
    # row h of o_ref = [output row 2h | output row 2h+1]  (lane-aligned stores)
    o_ref[0, :, :K] = out_e.astype(o_ref.dtype)
    o_ref[0, :, K:] = out_o.astype(o_ref.dtype)


def upproj_module_pallas(x, p, *, out_dtype):
    """x: (N, H, W*cin) flattened NHWC (bf16) -> (N, 2H, 2W*(cin//2))."""
    N, H, WCin = x.shape
    cin, W = p["cin"], p["W"]
    K = WCin
    assert WCin == W * cin and WCin % 128 == 0 and H % 8 == 0
    assert p["wA"].shape == (3, K, 4 * K) and p["wB"].shape == (3, K, K)

    flops = 2 * N * H * (3 * K * 4 * K + 6 * K * K + 4 * H * K)
    bytes_accessed = int(N * H * K * jnp.dtype(x.dtype).itemsize
                         + (3 * K * 4 * K + 3 * K * K) * 2 + (4 * K + K) * 4
                         + N * H * 2 * K * jnp.dtype(out_dtype).itemsize)

    out3 = pl.pallas_call(
        _upproj_module_kernel,
        out_shape=jax.ShapeDtypeStruct((N, H, 2 * K), out_dtype),
        grid=(N,),
        in_specs=[
            pl.BlockSpec((1, H, K), lambda n: (n, 0, 0)),        # activation
            pl.BlockSpec((3, K, 4 * K), lambda n: (0, 0, 0)),    # wA (resident)
            pl.BlockSpec((1, 4 * K), lambda n: (0, 0)),          # bA
            pl.BlockSpec((3, K, K), lambda n: (0, 0, 0)),        # wB (resident)
            pl.BlockSpec((1, K), lambda n: (0, 0)),              # bB
        ],
        out_specs=pl.BlockSpec((1, H, 2 * K), lambda n: (n, 0, 0)),
        compiler_params=pltpu.CompilerParams(
            dimension_semantics=("parallel",)),                  # 2 TCs split batch on v7x
        cost_estimate=pl.CostEstimate(flops=flops, transcendentals=0,
                                      bytes_accessed=bytes_accessed),
    )(x, p["wA"], p["bA"], p["wB"], p["bB"])
    # row h holds [out row 2h | out row 2h+1]: free reshape to (N, 2H, 2W*co).
    return out3.reshape(N, 2 * H, K)


# --------------------------------------------------------------------------
# Parameter construction (deterministic; BN folded; branch-merged; banded)
# --------------------------------------------------------------------------
def _make_conv_bn_3x3(key, kh, kw, cin, cout, *, conv_bias=True):
    """Random Conv2d(kh,kw)+BN (eval) folded; returns (3x3-embedded, raw, bias)."""
    ks = jax.random.split(key, 6)
    w = 0.1 * jax.random.normal(ks[0], (kh, kw, cin, cout), jnp.float32)
    if conv_bias:
        b = 0.1 * jax.random.normal(ks[1], (cout,), jnp.float32)
    else:
        b = jnp.zeros((cout,), jnp.float32)
    gamma = 1.0 + 0.1 * jax.random.normal(ks[2], (cout,), jnp.float32)
    beta = 0.1 * jax.random.normal(ks[3], (cout,), jnp.float32)
    mean = 0.1 * jax.random.normal(ks[4], (cout,), jnp.float32)
    var = jnp.abs(jax.random.normal(ks[5], (cout,), jnp.float32)) + 0.5
    scale = gamma / jnp.sqrt(var + BN_EPS)
    # bf16-rounded so kernel-side (bf16 band) and reference share exact values
    w_fold = (w * scale).astype(jnp.bfloat16).astype(jnp.float32)
    b_fold = (b - mean) * scale + beta
    # (2,3)/(3,2)/(2,2) kernels with their asymmetric pads == 3x3 kernels with
    # zeroed top row / left column under pad (1,1,1,1).
    k3 = jnp.zeros((3, 3, cin, cout), jnp.float32).at[3 - kh:, 3 - kw:].set(w_fold)
    return k3, w_fold, b_fold


def _banded_weight(k3, width):
    """(3,3,Cin,Cout) kernel -> (3, W*Cin, W*Cout) banded matrices (f32)."""
    mats = []
    for di in range(3):
        acc = None
        for dj in range(3):
            shift = jnp.eye(width, width, 1 - dj, dtype=jnp.float32)  # wp == w + dj - 1
            term = jnp.kron(shift, k3[di, dj])
            acc = term if acc is None else acc + term
        mats.append(acc)
    return jnp.stack(mats)


def _shuffle_perm(cin, width):
    """Column permutation taking the standard banded conv-A output layout
    (w-major; channels in [upper x1..x4 | bottom x1..x4] concat order) to the
    PixelShuffle(2)-ready layout [u_even | u_odd | b_even | b_odd], each
    section laid out as (2w+j)*co + c."""
    co = cin // 2
    s = np.arange(4).reshape(4, 1, 1, 1)      # (branch half, output-row parity i)
    w = np.arange(width).reshape(1, width, 1, 1)
    j = np.arange(2).reshape(1, 1, 2, 1)      # output-column parity
    c = np.arange(co).reshape(1, 1, 1, co)    # shuffled channel
    i = s % 2
    half = (s // 2) * (2 * cin)               # 0: upper, 2*cin: bottom
    ch = half + 4 * c + 2 * i + j             # source channel in concat order
    old_col = w * (4 * cin) + ch
    return old_col.reshape(-1)


def _make_module_params(key, cin, width):
    co = cin // 2
    kup, kbot, kconv = jax.random.split(key, 3)
    keys = list(jax.random.split(kup, 4)) + list(jax.random.split(kbot, 4))
    k3s, ws, bs = [], [], []
    for k, (kh, kw) in zip(keys, _UPCONV_KERNELS * 2):
        k3, w_raw, b = _make_conv_bn_3x3(k, kh, kw, cin, co)
        k3s.append(k3)
        ws.append(w_raw)
        bs.append(b)
    k3a = jnp.concatenate(k3s, axis=-1)       # (3,3,cin,4cin): [upper x1..x4 | bottom x1..x4]
    ba = jnp.concatenate(bs, axis=-1)         # (4cin,)
    k3b, _, bb = _make_conv_bn_3x3(kconv, 3, 3, co, co, conv_bias=False)
    perm = _shuffle_perm(cin, width)          # PixelShuffle-order output columns
    return {
        "cin": cin, "W": width,
        "wA": _banded_weight(k3a, width)[:, :, perm].astype(jnp.bfloat16),
        "bA": jnp.tile(ba, width)[perm][None, :],
        "wB": _banded_weight(k3b, 2 * width).astype(jnp.bfloat16),
        "bB": jnp.tile(bb, 2 * width)[None, :],
        # pure-JAX reference copies (f32 values, already bf16-rounded):
        "ref_w": ws, "ref_b": bs, "ref_k3b": k3b, "ref_bb": bb,
    }


def make_params(key, in_channel, in_width):
    assert in_channel % 16 == 0
    params, c, w = [], in_channel, in_width
    for _ in range(4):
        key, sub = jax.random.split(key)
        params.append(_make_module_params(sub, c, w))
        c //= 2
        w *= 2
    return params


# --------------------------------------------------------------------------
# Model forward (Pallas path)
# --------------------------------------------------------------------------
def faster_upproj_apply(x_nchw, params):
    N, C, H, W = x_nchw.shape
    x = jnp.transpose(x_nchw, (0, 2, 3, 1)).reshape(N, H, W * C).astype(jnp.bfloat16)
    for i, p in enumerate(params):
        out_dtype = jnp.float32 if i == len(params) - 1 else jnp.bfloat16
        x = upproj_module_pallas(x, p, out_dtype=out_dtype)
    s = 2 ** len(params)
    return jnp.transpose(x.reshape(N, H * s, W * s, C // s), (0, 3, 1, 2))


# --------------------------------------------------------------------------
# Pure-JAX reference of the original module (for numerical validation)
# --------------------------------------------------------------------------
def _pixel_shuffle_nhwc(z):
    N, H, W, c4 = z.shape
    co = c4 // 4
    z = z.reshape(N, H, W, co, 2, 2).transpose(0, 1, 4, 2, 5, 3)
    return z.reshape(N, 2 * H, 2 * W, co)


def _conv_nhwc(x, w, pad):
    return lax.conv_general_dilated(
        x, w, (1, 1), pad, dimension_numbers=("NHWC", "HWIO", "NHWC"),
        precision=lax.Precision.HIGHEST)


def _ref_module(x, p):
    """One FasterUpProjModule: 4 asymmetric branch convs x2, PixelShuffle,
    upper ReLU->3x3 conv->BN, relu(upper+bottom).  Uses the same bf16-rounded
    weights and activation-quantization points as the Pallas path."""
    xq = x.astype(jnp.bfloat16).astype(jnp.float32)

    def upconv(ws, bs):
        outs = [_conv_nhwc(xq, wk, pad) + bk
                for wk, bk, pad in zip(ws, bs, _BRANCH_PADS)]
        return _pixel_shuffle_nhwc(jnp.concatenate(outs, axis=-1))

    u0 = upconv(p["ref_w"][:4], p["ref_b"][:4])
    b0 = upconv(p["ref_w"][4:], p["ref_b"][4:])
    uq = jnp.maximum(u0, 0.0).astype(jnp.bfloat16).astype(jnp.float32)
    x1 = _conv_nhwc(uq, p["ref_k3b"], ((1, 1), (1, 1))) + p["ref_bb"]
    return jnp.maximum(x1 + b0, 0.0)


def faster_upproj_ref(x_nchw, params):
    x = jnp.transpose(x_nchw, (0, 2, 3, 1))
    for i, p in enumerate(params):
        x = _ref_module(x, p)
        if i < len(params) - 1:           # Pallas path carries bf16 between modules
            x = x.astype(jnp.bfloat16).astype(jnp.float32)
    return jnp.transpose(x, (0, 3, 1, 2))


# --------------------------------------------------------------------------
if __name__ == "__main__":
    key = jax.random.PRNGKey(0)
    kx, kp = jax.random.split(key)

    in_channel = 16           # divisible by 16 (4 channel halvings)
    N, H, W = 2, 8, 8
    x = jax.random.normal(kx, (N, in_channel, H, W), jnp.float32)   # NCHW
    params = make_params(kp, in_channel, W)

    fwd = jax.jit(lambda inp: faster_upproj_apply(inp, params))
    out = fwd(x)
    jax.block_until_ready(out)

    expected_shape = (N, in_channel // 16, H * 16, W * 16)
    assert out.shape == expected_shape, (out.shape, expected_shape)
    assert out.dtype == jnp.float32
    assert bool(jnp.all(jnp.isfinite(out)))

    # Numerical check against a pure-JAX reference of the original PyTorch
    # module (asymmetric branch convs + PixelShuffle + upper conv + merge).
    ref = jax.jit(lambda inp: faster_upproj_ref(inp, params))(x)
    jax.block_until_ready(ref)
    max_err = float(jnp.max(jnp.abs(out - ref)))
    assert max_err < 5e-2, ("mismatch vs reference", max_err)

    print("KERNEL_OK")
</pallas_src>

<mosaic_0001>
module attributes {stable_mosaic.version = 11 : i64} {
  func.func @_upproj_module_kernel(%arg0: i32, %arg1: memref<1x8x128xbf16, #tpu.memory_space<vmem>>, %arg2: memref<3x128x512xbf16, #tpu.memory_space<vmem>>, %arg3: memref<1x512xf32, #tpu.memory_space<vmem>>, %arg4: memref<3x128x128xbf16, #tpu.memory_space<vmem>>, %arg5: memref<1x128xf32, #tpu.memory_space<vmem>>, %arg6: memref<1x8x256xbf16, #tpu.memory_space<vmem>>) attributes {dimension_semantics = [#tpu.dimension_semantics<parallel>], iteration_bounds = array<i64: 2>, scalar_prefetch = 0 : i64, scratch_operands = 0 : i64, tpu.core_type = #tpu.core_type<tc>, window_params = [{transform_indices = @transform_0, window_bounds = array<i64: 1, 8, 128>}, {pipeline_mode = #tpu.pipeline_mode<synchronous>, transform_indices = @transform_1, window_bounds = array<i64: 3, 128, 512>}, {pipeline_mode = #tpu.pipeline_mode<synchronous>, transform_indices = @transform_2, window_bounds = array<i64: 1, 512>}, {pipeline_mode = #tpu.pipeline_mode<synchronous>, transform_indices = @transform_3, window_bounds = array<i64: 3, 128, 128>}, {pipeline_mode = #tpu.pipeline_mode<synchronous>, transform_indices = @transform_4, window_bounds = array<i64: 1, 128>}, {transform_indices = @transform_5, window_bounds = array<i64: 1, 8, 256>}]} {
    %0 = tpu.iota {dimensions = array<i32: 0>} : vector<8x8xi32>
    %1 = tpu.iota {dimensions = array<i32: 1>} : vector<8x8xi32>
    %c1_i32 = arith.constant 1 : i32
    %2 = vector.broadcast %c1_i32 : i32 to vector<8x8xi32>
    %3 = arith.addi %1, %2 : vector<8x8xi32>
    %4 = arith.cmpi eq, %0, %3 : vector<8x8xi32>
    %cst = arith.constant 1.000000e+00 : f32
    %cst_0 = arith.constant 0.000000e+00 : f32
    %5 = vector.broadcast %cst : f32 to vector<8x8xf32>
    %6 = vector.broadcast %cst_0 : f32 to vector<8x8xf32>
    %7 = arith.select %4, %5, %6 : vector<8x8xi1>, vector<8x8xf32>
    %8 = arith.truncf %7 : vector<8x8xf32> to vector<8x8xbf16>
    %c1_i32_1 = arith.constant 1 : i32
    %9 = vector.broadcast %c1_i32_1 : i32 to vector<8x8xi32>
    %10 = arith.subi %1, %9 : vector<8x8xi32>
    %11 = arith.cmpi eq, %0, %10 : vector<8x8xi32>
    %cst_2 = arith.constant 1.000000e+00 : f32
    %cst_3 = arith.constant 0.000000e+00 : f32
    %12 = vector.broadcast %cst_2 : f32 to vector<8x8xf32>
    %13 = vector.broadcast %cst_3 : f32 to vector<8x8xf32>
    %14 = arith.select %11, %12, %13 : vector<8x8xi1>, vector<8x8xf32>
    %15 = arith.truncf %14 : vector<8x8xf32> to vector<8x8xbf16>
    %c0 = arith.constant 0 : index
    %c0_4 = arith.constant 0 : index
    %c0_5 = arith.constant 0 : index
    %16 = vector.load %arg1[%c0, %c0_4, %c0_5] : memref<1x8x128xbf16, #tpu.memory_space<vmem>>, vector<1x8x128xbf16>
    %17 = vector.shape_cast %16 : vector<1x8x128xbf16> to vector<8x128xbf16>
    %cst_6 = arith.constant dense<0.000000e+00> : vector<8x128xf32>
    %18 = tpu.matmul %8, %17, %cst_6 {dimension_numbers = #tpu.dot_dimension_numbers<[1], [0], [0], [1], [0, 0, 1, 1], [], []>} : vector<8x8xbf16>, vector<8x128xbf16>, vector<8x128xf32> -> vector<8x128xf32>
    %19 = arith.truncf %18 : vector<8x128xf32> to vector<8x128xbf16>
    %cst_7 = arith.constant dense<0.000000e+00> : vector<8x128xf32>
    %20 = tpu.matmul %15, %17, %cst_7 {dimension_numbers = #tpu.dot_dimension_numbers<[1], [0], [0], [1], [0, 0, 1, 1], [], []>} : vector<8x8xbf16>, vector<8x128xbf16>, vector<8x128xf32> -> vector<8x128xf32>
    %21 = arith.truncf %20 : vector<8x128xf32> to vector<8x128xbf16>
    %c0_8 = arith.constant 0 : index
    %c0_9 = arith.constant 0 : index
    %c0_10 = arith.constant 0 : index
    %22 = vector.load %arg2[%c0_8, %c0_9, %c0_10] : memref<3x128x512xbf16, #tpu.memory_space<vmem>>, vector<1x128x512xbf16>
    %23 = vector.shape_cast %22 : vector<1x128x512xbf16> to vector<128x512xbf16>
    %cst_11 = arith.constant dense<0.000000e+00> : vector<8x512xf32>
    %24 = tpu.matmul %19, %23, %cst_11 {dimension_numbers = #tpu.dot_dimension_numbers<[1], [0], [0], [1], [0, 0, 1, 1], [], []>} : vector<8x128xbf16>, vector<128x512xbf16>, vector<8x512xf32> -> vector<8x512xf32>
    %c1 = arith.constant 1 : index
    %c0_12 = arith.constant 0 : index
    %c0_13 = arith.constant 0 : index
    %25 = vector.load %arg2[%c1, %c0_12, %c0_13] : memref<3x128x512xbf16, #tpu.memory_space<vmem>>, vector<1x128x512xbf16>
    %26 = vector.shape_cast %25 : vector<1x128x512xbf16> to vector<128x512xbf16>
    %cst_14 = arith.constant dense<0.000000e+00> : vector<8x512xf32>
    %27 = tpu.matmul %17, %26, %cst_14 {dimension_numbers = #tpu.dot_dimension_numbers<[1], [0], [0], [1], [0, 0, 1, 1], [], []>} : vector<8x128xbf16>, vector<128x512xbf16>, vector<8x512xf32> -> vector<8x512xf32>
    %28 = arith.addf %24, %27 : vector<8x512xf32>
    %c2 = arith.constant 2 : index
    %c0_15 = arith.constant 0 : index
    %c0_16 = arith.constant 0 : index
    %29 = vector.load %arg2[%c2, %c0_15, %c0_16] : memref<3x128x512xbf16, #tpu.memory_space<vmem>>, vector<1x128x512xbf16>
    %30 = vector.shape_cast %29 : vector<1x128x512xbf16> to vector<128x512xbf16>
    %cst_17 = arith.constant dense<0.000000e+00> : vector<8x512xf32>
    %31 = tpu.matmul %21, %30, %cst_17 {dimension_numbers = #tpu.dot_dimension_numbers<[1], [0], [0], [1], [0, 0, 1, 1], [], []>} : vector<8x128xbf16>, vector<128x512xbf16>, vector<8x512xf32> -> vector<8x512xf32>
    %32 = arith.addf %28, %31 : vector<8x512xf32>
    %c0_18 = arith.constant 0 : index
    %c0_19 = arith.constant 0 : index
    %33 = vector.load %arg3[%c0_18, %c0_19] : memref<1x512xf32, #tpu.memory_space<vmem>>, vector<1x512xf32>
    %34 = vector.broadcast %33 : vector<1x512xf32> to vector<8x512xf32>
    %35 = arith.addf %32, %34 : vector<8x512xf32>
    %36 = vector.extract_strided_slice %35 {offsets = [0, 0], sizes = [8, 256], strides = [1, 1]} : vector<8x512xf32> to vector<8x256xf32>
    %cst_20 = arith.constant 0.000000e+00 : f32
    %37 = vector.broadcast %cst_20 : f32 to vector<8x256xf32>
    %38 = arith.maximumf %36, %37 : vector<8x256xf32>
    %39 = arith.truncf %38 : vector<8x256xf32> to vector<8x256xbf16>
    %40 = vector.extract_strided_slice %39 {offsets = [0, 0], sizes = [8, 128], strides = [1, 1]} : vector<8x256xbf16> to vector<8x128xbf16>
    %41 = vector.extract_strided_slice %39 {offsets = [0, 128], sizes = [8, 128], strides = [1, 1]} : vector<8x256xbf16> to vector<8x128xbf16>
    %cst_21 = arith.constant dense<0.000000e+00> : vector<8x128xf32>
    %42 = tpu.matmul %8, %41, %cst_21 {dimension_numbers = #tpu.dot_dimension_numbers<[1], [0], [0], [1], [0, 0, 1, 1], [], []>} : vector<8x8xbf16>, vector<8x128xbf16>, vector<8x128xf32> -> vector<8x128xf32>
    %43 = arith.truncf %42 : vector<8x128xf32> to vector<8x128xbf16>
    %cst_22 = arith.constant dense<0.000000e+00> : vector<8x128xf32>
    %44 = tpu.matmul %15, %40, %cst_22 {dimension_numbers = #tpu.dot_dimension_numbers<[1], [0], [0], [1], [0, 0, 1, 1], [], []>} : vector<8x8xbf16>, vector<8x128xbf16>, vector<8x128xf32> -> vector<8x128xf32>
    %45 = arith.truncf %44 : vector<8x128xf32> to vector<8x128xbf16>
    %c0_23 = arith.constant 0 : index
    %c0_24 = arith.constant 0 : index
    %c0_25 = arith.constant 0 : index
    %46 = vector.load %arg4[%c0_23, %c0_24, %c0_25] : memref<3x128x128xbf16, #tpu.memory_space<vmem>>, vector<1x128x128xbf16>
    %47 = vector.shape_cast %46 : vector<1x128x128xbf16> to vector<128x128xbf16>
    %cst_26 = arith.constant dense<0.000000e+00> : vector<8x128xf32>
    %48 = tpu.matmul %43, %47, %cst_26 {dimension_numbers = #tpu.dot_dimension_numbers<[1], [0], [0], [1], [0, 0, 1, 1], [], []>} : vector<8x128xbf16>, vector<128x128xbf16>, vector<8x128xf32> -> vector<8x128xf32>
    %c1_27 = arith.constant 1 : index
    %c0_28 = arith.constant 0 : index
    %c0_29 = arith.constant 0 : index
    %49 = vector.load %arg4[%c1_27, %c0_28, %c0_29] : memref<3x128x128xbf16, #tpu.memory_space<vmem>>, vector<1x128x128xbf16>
    %50 = vector.shape_cast %49 : vector<1x128x128xbf16> to vector<128x128xbf16>
    %cst_30 = arith.constant dense<0.000000e+00> : vector<8x128xf32>
    %51 = tpu.matmul %40, %50, %cst_30 {dimension_numbers = #tpu.dot_dimension_numbers<[1], [0], [0], [1], [0, 0, 1, 1], [], []>} : vector<8x128xbf16>, vector<128x128xbf16>, vector<8x128xf32> -> vector<8x128xf32>
    %52 = arith.addf %48, %51 : vector<8x128xf32>
    %c2_31 = arith.constant 2 : index
    %c0_32 = arith.constant 0 : index
    %c0_33 = arith.constant 0 : index
    %53 = vector.load %arg4[%c2_31, %c0_32, %c0_33] : memref<3x128x128xbf16, #tpu.memory_space<vmem>>, vector<1x128x128xbf16>
    %54 = vector.shape_cast %53 : vector<1x128x128xbf16> to vector<128x128xbf16>
    %cst_34 = arith.constant dense<0.000000e+00> : vector<8x128xf32>
    %55 = tpu.matmul %41, %54, %cst_34 {dimension_numbers = #tpu.dot_dimension_numbers<[1], [0], [0], [1], [0, 0, 1, 1], [], []>} : vector<8x128xbf16>, vector<128x128xbf16>, vector<8x128xf32> -> vector<8x128xf32>
    %56 = arith.addf %52, %55 : vector<8x128xf32>
    %c0_35 = arith.constant 0 : index
    %c0_36 = arith.constant 0 : index
    %c0_37 = arith.constant 0 : index
    %57 = vector.load %arg4[%c0_35, %c0_36, %c0_37] : memref<3x128x128xbf16, #tpu.memory_space<vmem>>, vector<1x128x128xbf16>
    %58 = vector.shape_cast %57 : vector<1x128x128xbf16> to vector<128x128xbf16>
    %cst_38 = arith.constant dense<0.000000e+00> : vector<8x128xf32>
    %59 = tpu.matmul %40, %58, %cst_38 {dimension_numbers = #tpu.dot_dimension_numbers<[1], [0], [0], [1], [0, 0, 1, 1], [], []>} : vector<8x128xbf16>, vector<128x128xbf16>, vector<8x128xf32> -> vector<8x128xf32>
    %c1_39 = arith.constant 1 : index
    %c0_40 = arith.constant 0 : index
    %c0_41 = arith.constant 0 : index
    %60 = vector.load %arg4[%c1_39, %c0_40, %c0_41] : memref<3x128x128xbf16, #tpu.memory_space<vmem>>, vector<1x128x128xbf16>
    %61 = vector.shape_cast %60 : vector<1x128x128xbf16> to vector<128x128xbf16>
    %cst_42 = arith.constant dense<0.000000e+00> : vector<8x128xf32>
    %62 = tpu.matmul %41, %61, %cst_42 {dimension_numbers = #tpu.dot_dimension_numbers<[1], [0], [0], [1], [0, 0, 1, 1], [], []>} : vector<8x128xbf16>, vector<128x128xbf16>, vector<8x128xf32> -> vector<8x128xf32>
    %63 = arith.addf %59, %62 : vector<8x128xf32>
    %c2_43 = arith.constant 2 : index
    %c0_44 = arith.constant 0 : index
    %c0_45 = arith.constant 0 : index
    %64 = vector.load %arg4[%c2_43, %c0_44, %c0_45] : memref<3x128x128xbf16, #tpu.memory_space<vmem>>, vector<1x128x128xbf16>
    %65 = vector.shape_cast %64 : vector<1x128x128xbf16> to vector<128x128xbf16>
    %cst_46 = arith.constant dense<0.000000e+00> : vector<8x128xf32>
    %66 = tpu.matmul %45, %65, %cst_46 {dimension_numbers = #tpu.dot_dimension_numbers<[1], [0], [0], [1], [0, 0, 1, 1], [], []>} : vector<8x128xbf16>, vector<128x128xbf16>, vector<8x128xf32> -> vector<8x128xf32>
    %67 = arith.addf %63, %66 : vector<8x128xf32>
    %c0_47 = arith.constant 0 : index
    %c0_48 = arith.constant 0 : index
    %68 = vector.load %arg5[%c0_47, %c0_48] : memref<1x128xf32, #tpu.memory_space<vmem>>, vector<1x128xf32>
    %69 = vector.broadcast %68 : vector<1x128xf32> to vector<8x128xf32>
    %70 = arith.addf %56, %69 : vector<8x128xf32>
    %71 = vector.extract_strided_slice %35 {offsets = [0, 256], sizes = [8, 128], strides = [1, 1]} : vector<8x512xf32> to vector<8x128xf32>
    %72 = arith.addf %70, %71 : vector<8x128xf32>
    %cst_49 = arith.constant 0.000000e+00 : f32
    %73 = vector.broadcast %cst_49 : f32 to vector<8x128xf32>
    %74 = arith.maximumf %72, %73 : vector<8x128xf32>
    %75 = vector.broadcast %68 : vector<1x128xf32> to vector<8x128xf32>
    %76 = arith.addf %67, %75 : vector<8x128xf32>
    %77 = vector.extract_strided_slice %35 {offsets = [0, 384], sizes = [8, 128], strides = [1, 1]} : vector<8x512xf32> to vector<8x128xf32>
    %78 = arith.addf %76, %77 : vector<8x128xf32>
    %cst_50 = arith.constant 0.000000e+00 : f32
    %79 = vector.broadcast %cst_50 : f32 to vector<8x128xf32>
    %80 = arith.maximumf %78, %79 : vector<8x128xf32>
    %81 = arith.truncf %74 : vector<8x128xf32> to vector<8x128xbf16>
    %c0_51 = arith.constant 0 : index
    %c0_52 = arith.constant 0 : index
    %c0_53 = arith.constant 0 : index
    %82 = vector.load %arg6[%c0_51, %c0_52, %c0_53] : memref<1x8x256xbf16, #tpu.memory_space<vmem>>, vector<1x8x128xbf16>
    %83 = vector.shape_cast %82 : vector<1x8x128xbf16> to vector<8x128xbf16>
    %84 = vector.shape_cast %81 : vector<8x128xbf16> to vector<1x8x128xbf16>
    tpu.vector_store %arg6[%c0_51, %c0_52, %c0_53], %84 {strides = array<i32>} : memref<1x8x256xbf16, #tpu.memory_space<vmem>>, vector<1x8x128xbf16>,
    %85 = arith.truncf %80 : vector<8x128xf32> to vector<8x128xbf16>
    %c0_54 = arith.constant 0 : index
    %c0_55 = arith.constant 0 : index
    %c128 = arith.constant 128 : index
    %86 = vector.load %arg6[%c0_54, %c0_55, %c128] : memref<1x8x256xbf16, #tpu.memory_space<vmem>>, vector<1x8x128xbf16>
    %87 = vector.shape_cast %86 : vector<1x8x128xbf16> to vector<8x128xbf16>
    %88 = vector.shape_cast %85 : vector<8x128xbf16> to vector<1x8x128xbf16>
    tpu.vector_store %arg6[%c0_54, %c0_55, %c128], %88 {strides = array<i32>} : memref<1x8x256xbf16, #tpu.memory_space<vmem>>, vector<1x8x128xbf16>,
    return
  }
  func.func @transform_0(%arg0: i32) -> (i32, i32, i32) {
    %c0_i32 = arith.constant 0 : i32
    %c0_i32_0 = arith.constant 0 : i32
    %c0_i32_1 = arith.constant 0 : i32
    return %arg0, %c0_i32, %c0_i32_0 : i32, i32, i32
  }
  func.func @transform_1(%arg0: i32) -> (i32, i32, i32) {
    %c0_i32 = arith.constant 0 : i32
    %c0_i32_0 = arith.constant 0 : i32
    %c0_i32_1 = arith.constant 0 : i32
    %c0_i32_2 = arith.constant 0 : i32
    return %c0_i32, %c0_i32_0, %c0_i32_1 : i32, i32, i32
  }
  func.func @transform_2(%arg0: i32) -> (i32, i32) {
    %c0_i32 = arith.constant 0 : i32
    %c0_i32_0 = arith.constant 0 : i32
    %c0_i32_1 = arith.constant 0 : i32
    return %c0_i32, %c0_i32_0 : i32, i32
  }
  func.func @transform_3(%arg0: i32) -> (i32, i32, i32) {
    %c0_i32 = arith.constant 0 : i32
    %c0_i32_0 = arith.constant 0 : i32
    %c0_i32_1 = arith.constant 0 : i32
    %c0_i32_2 = arith.constant 0 : i32
    return %c0_i32, %c0_i32_0, %c0_i32_1 : i32, i32, i32
  }
  func.func @transform_4(%arg0: i32) -> (i32, i32) {
    %c0_i32 = arith.constant 0 : i32
    %c0_i32_0 = arith.constant 0 : i32
    %c0_i32_1 = arith.constant 0 : i32
    return %c0_i32, %c0_i32_0 : i32, i32
  }
  func.func @transform_5(%arg0: i32) -> (i32, i32, i32) {
    %c0_i32 = arith.constant 0 : i32
    %c0_i32_0 = arith.constant 0 : i32
    %c0_i32_1 = arith.constant 0 : i32
    return %arg0, %c0_i32, %c0_i32_0 : i32, i32, i32
  }
}

module attributes {stable_mosaic.version = 11 : i64} {
  func.func @_upproj_module_kernel(%arg0: i32, %arg1: memref<1x16x128xbf16, #tpu.memory_space<vmem>>, %arg2: memref<3x128x512xbf16, #tpu.memory_space<vmem>>, %arg3: memref<1x512xf32, #tpu.memory_space<vmem>>, %arg4: memref<3x128x128xbf16, #tpu.memory_space<vmem>>, %arg5: memref<1x128xf32, #tpu.memory_space<vmem>>, %arg6: memref<1x16x256xbf16, #tpu.memory_space<vmem>>) attributes {dimension_semantics = [#tpu.dimension_semantics<parallel>], iteration_bounds = array<i64: 2>, scalar_prefetch = 0 : i64, scratch_operands = 0 : i64, tpu.core_type = #tpu.core_type<tc>, window_params = [{transform_indices = @transform_0, window_bounds = array<i64: 1, 16, 128>}, {pipeline_mode = #tpu.pipeline_mode<synchronous>, transform_indices = @transform_1, window_bounds = array<i64: 3, 128, 512>}, {pipeline_mode = #tpu.pipeline_mode<synchronous>, transform_indices = @transform_2, window_bounds = array<i64: 1, 512>}, {pipeline_mode = #tpu.pipeline_mode<synchronous>, transform_indices = @transform_3, window_bounds = array<i64: 3, 128, 128>}, {pipeline_mode = #tpu.pipeline_mode<synchronous>, transform_indices = @transform_4, window_bounds = array<i64: 1, 128>}, {transform_indices = @transform_5, window_bounds = array<i64: 1, 16, 256>}]} {
    %0 = tpu.iota {dimensions = array<i32: 0>} : vector<16x16xi32>
    %1 = tpu.iota {dimensions = array<i32: 1>} : vector<16x16xi32>
    %c1_i32 = arith.constant 1 : i32
    %2 = vector.broadcast %c1_i32 : i32 to vector<16x16xi32>
    %3 = arith.addi %1, %2 : vector<16x16xi32>
    %4 = arith.cmpi eq, %0, %3 : vector<16x16xi32>
    %cst = arith.constant 1.000000e+00 : f32
    %cst_0 = arith.constant 0.000000e+00 : f32
    %5 = vector.broadcast %cst : f32 to vector<16x16xf32>
    %6 = vector.broadcast %cst_0 : f32 to vector<16x16xf32>
    %7 = arith.select %4, %5, %6 : vector<16x16xi1>, vector<16x16xf32>
    %8 = arith.truncf %7 : vector<16x16xf32> to vector<16x16xbf16>
    %c1_i32_1 = arith.constant 1 : i32
    %9 = vector.broadcast %c1_i32_1 : i32 to vector<16x16xi32>
    %10 = arith.subi %1, %9 : vector<16x16xi32>
    %11 = arith.cmpi eq, %0, %10 : vector<16x16xi32>
    %cst_2 = arith.constant 1.000000e+00 : f32
    %cst_3 = arith.constant 0.000000e+00 : f32
    %12 = vector.broadcast %cst_2 : f32 to vector<16x16xf32>
    %13 = vector.broadcast %cst_3 : f32 to vector<16x16xf32>
    %14 = arith.select %11, %12, %13 : vector<16x16xi1>, vector<16x16xf32>
    %15 = arith.truncf %14 : vector<16x16xf32> to vector<16x16xbf16>
    %c0 = arith.constant 0 : index
    %c0_4 = arith.constant 0 : index
    %c0_5 = arith.constant 0 : index
    %16 = vector.load %arg1[%c0, %c0_4, %c0_5] : memref<1x16x128xbf16, #tpu.memory_space<vmem>>, vector<1x16x128xbf16>
    %17 = vector.shape_cast %16 : vector<1x16x128xbf16> to vector<16x128xbf16>
    %cst_6 = arith.constant dense<0.000000e+00> : vector<16x128xf32>
    %18 = tpu.matmul %8, %17, %cst_6 {dimension_numbers = #tpu.dot_dimension_numbers<[1], [0], [0], [1], [0, 0, 1, 1], [], []>} : vector<16x16xbf16>, vector<16x128xbf16>, vector<16x128xf32> -> vector<16x128xf32>
    %19 = arith.truncf %18 : vector<16x128xf32> to vector<16x128xbf16>
    %cst_7 = arith.constant dense<0.000000e+00> : vector<16x128xf32>
    %20 = tpu.matmul %15, %17, %cst_7 {dimension_numbers = #tpu.dot_dimension_numbers<[1], [0], [0], [1], [0, 0, 1, 1], [], []>} : vector<16x16xbf16>, vector<16x128xbf16>, vector<16x128xf32> -> vector<16x128xf32>
    %21 = arith.truncf %20 : vector<16x128xf32> to vector<16x128xbf16>
    %c0_8 = arith.constant 0 : index
    %c0_9 = arith.constant 0 : index
    %c0_10 = arith.constant 0 : index
    %22 = vector.load %arg2[%c0_8, %c0_9, %c0_10] : memref<3x128x512xbf16, #tpu.memory_space<vmem>>, vector<1x128x512xbf16>
    %23 = vector.shape_cast %22 : vector<1x128x512xbf16> to vector<128x512xbf16>
    %cst_11 = arith.constant dense<0.000000e+00> : vector<16x512xf32>
    %24 = tpu.matmul %19, %23, %cst_11 {dimension_numbers = #tpu.dot_dimension_numbers<[1], [0], [0], [1], [0, 0, 1, 1], [], []>} : vector<16x128xbf16>, vector<128x512xbf16>, vector<16x512xf32> -> vector<16x512xf32>
    %c1 = arith.constant 1 : index
    %c0_12 = arith.constant 0 : index
    %c0_13 = arith.constant 0 : index
    %25 = vector.load %arg2[%c1, %c0_12, %c0_13] : memref<3x128x512xbf16, #tpu.memory_space<vmem>>, vector<1x128x512xbf16>
    %26 = vector.shape_cast %25 : vector<1x128x512xbf16> to vector<128x512xbf16>
    %cst_14 = arith.constant dense<0.000000e+00> : vector<16x512xf32>
    %27 = tpu.matmul %17, %26, %cst_14 {dimension_numbers = #tpu.dot_dimension_numbers<[1], [0], [0], [1], [0, 0, 1, 1], [], []>} : vector<16x128xbf16>, vector<128x512xbf16>, vector<16x512xf32> -> vector<16x512xf32>
    %28 = arith.addf %24, %27 : vector<16x512xf32>
    %c2 = arith.constant 2 : index
    %c0_15 = arith.constant 0 : index
    %c0_16 = arith.constant 0 : index
    %29 = vector.load %arg2[%c2, %c0_15, %c0_16] : memref<3x128x512xbf16, #tpu.memory_space<vmem>>, vector<1x128x512xbf16>
    %30 = vector.shape_cast %29 : vector<1x128x512xbf16> to vector<128x512xbf16>
    %cst_17 = arith.constant dense<0.000000e+00> : vector<16x512xf32>
    %31 = tpu.matmul %21, %30, %cst_17 {dimension_numbers = #tpu.dot_dimension_numbers<[1], [0], [0], [1], [0, 0, 1, 1], [], []>} : vector<16x128xbf16>, vector<128x512xbf16>, vector<16x512xf32> -> vector<16x512xf32>
    %32 = arith.addf %28, %31 : vector<16x512xf32>
    %c0_18 = arith.constant 0 : index
    %c0_19 = arith.constant 0 : index
    %33 = vector.load %arg3[%c0_18, %c0_19] : memref<1x512xf32, #tpu.memory_space<vmem>>, vector<1x512xf32>
    %34 = vector.broadcast %33 : vector<1x512xf32> to vector<16x512xf32>
    %35 = arith.addf %32, %34 : vector<16x512xf32>
    %36 = vector.extract_strided_slice %35 {offsets = [0, 0], sizes = [16, 256], strides = [1, 1]} : vector<16x512xf32> to vector<16x256xf32>
    %cst_20 = arith.constant 0.000000e+00 : f32
    %37 = vector.broadcast %cst_20 : f32 to vector<16x256xf32>
    %38 = arith.maximumf %36, %37 : vector<16x256xf32>
    %39 = arith.truncf %38 : vector<16x256xf32> to vector<16x256xbf16>
    %40 = vector.extract_strided_slice %39 {offsets = [0, 0], sizes = [16, 128], strides = [1, 1]} : vector<16x256xbf16> to vector<16x128xbf16>
    %41 = vector.extract_strided_slice %39 {offsets = [0, 128], sizes = [16, 128], strides = [1, 1]} : vector<16x256xbf16> to vector<16x128xbf16>
    %cst_21 = arith.constant dense<0.000000e+00> : vector<16x128xf32>
    %42 = tpu.matmul %8, %41, %cst_21 {dimension_numbers = #tpu.dot_dimension_numbers<[1], [0], [0], [1], [0, 0, 1, 1], [], []>} : vector<16x16xbf16>, vector<16x128xbf16>, vector<16x128xf32> -> vector<16x128xf32>
    %43 = arith.truncf %42 : vector<16x128xf32> to vector<16x128xbf16>
    %cst_22 = arith.constant dense<0.000000e+00> : vector<16x128xf32>
    %44 = tpu.matmul %15, %40, %cst_22 {dimension_numbers = #tpu.dot_dimension_numbers<[1], [0], [0], [1], [0, 0, 1, 1], [], []>} : vector<16x16xbf16>, vector<16x128xbf16>, vector<16x128xf32> -> vector<16x128xf32>
    %45 = arith.truncf %44 : vector<16x128xf32> to vector<16x128xbf16>
    %c0_23 = arith.constant 0 : index
    %c0_24 = arith.constant 0 : index
    %c0_25 = arith.constant 0 : index
    %46 = vector.load %arg4[%c0_23, %c0_24, %c0_25] : memref<3x128x128xbf16, #tpu.memory_space<vmem>>, vector<1x128x128xbf16>
    %47 = vector.shape_cast %46 : vector<1x128x128xbf16> to vector<128x128xbf16>
    %cst_26 = arith.constant dense<0.000000e+00> : vector<16x128xf32>
    %48 = tpu.matmul %43, %47, %cst_26 {dimension_numbers = #tpu.dot_dimension_numbers<[1], [0], [0], [1], [0, 0, 1, 1], [], []>} : vector<16x128xbf16>, vector<128x128xbf16>, vector<16x128xf32> -> vector<16x128xf32>
    %c1_27 = arith.constant 1 : index
    %c0_28 = arith.constant 0 : index
    %c0_29 = arith.constant 0 : index
    %49 = vector.load %arg4[%c1_27, %c0_28, %c0_29] : memref<3x128x128xbf16, #tpu.memory_space<vmem>>, vector<1x128x128xbf16>
    %50 = vector.shape_cast %49 : vector<1x128x128xbf16> to vector<128x128xbf16>
    %cst_30 = arith.constant dense<0.000000e+00> : vector<16x128xf32>
    %51 = tpu.matmul %40, %50, %cst_30 {dimension_numbers = #tpu.dot_dimension_numbers<[1], [0], [0], [1], [0, 0, 1, 1], [], []>} : vector<16x128xbf16>, vector<128x128xbf16>, vector<16x128xf32> -> vector<16x128xf32>
    %52 = arith.addf %48, %51 : vector<16x128xf32>
    %c2_31 = arith.constant 2 : index
    %c0_32 = arith.constant 0 : index
    %c0_33 = arith.constant 0 : index
    %53 = vector.load %arg4[%c2_31, %c0_32, %c0_33] : memref<3x128x128xbf16, #tpu.memory_space<vmem>>, vector<1x128x128xbf16>
    %54 = vector.shape_cast %53 : vector<1x128x128xbf16> to vector<128x128xbf16>
    %cst_34 = arith.constant dense<0.000000e+00> : vector<16x128xf32>
    %55 = tpu.matmul %41, %54, %cst_34 {dimension_numbers = #tpu.dot_dimension_numbers<[1], [0], [0], [1], [0, 0, 1, 1], [], []>} : vector<16x128xbf16>, vector<128x128xbf16>, vector<16x128xf32> -> vector<16x128xf32>
    %56 = arith.addf %52, %55 : vector<16x128xf32>
    %c0_35 = arith.constant 0 : index
    %c0_36 = arith.constant 0 : index
    %c0_37 = arith.constant 0 : index
    %57 = vector.load %arg4[%c0_35, %c0_36, %c0_37] : memref<3x128x128xbf16, #tpu.memory_space<vmem>>, vector<1x128x128xbf16>
    %58 = vector.shape_cast %57 : vector<1x128x128xbf16> to vector<128x128xbf16>
    %cst_38 = arith.constant dense<0.000000e+00> : vector<16x128xf32>
    %59 = tpu.matmul %40, %58, %cst_38 {dimension_numbers = #tpu.dot_dimension_numbers<[1], [0], [0], [1], [0, 0, 1, 1], [], []>} : vector<16x128xbf16>, vector<128x128xbf16>, vector<16x128xf32> -> vector<16x128xf32>
    %c1_39 = arith.constant 1 : index
    %c0_40 = arith.constant 0 : index
    %c0_41 = arith.constant 0 : index
    %60 = vector.load %arg4[%c1_39, %c0_40, %c0_41] : memref<3x128x128xbf16, #tpu.memory_space<vmem>>, vector<1x128x128xbf16>
    %61 = vector.shape_cast %60 : vector<1x128x128xbf16> to vector<128x128xbf16>
    %cst_42 = arith.constant dense<0.000000e+00> : vector<16x128xf32>
    %62 = tpu.matmul %41, %61, %cst_42 {dimension_numbers = #tpu.dot_dimension_numbers<[1], [0], [0], [1], [0, 0, 1, 1], [], []>} : vector<16x128xbf16>, vector<128x128xbf16>, vector<16x128xf32> -> vector<16x128xf32>
    %63 = arith.addf %59, %62 : vector<16x128xf32>
    %c2_43 = arith.constant 2 : index
    %c0_44 = arith.constant 0 : index
    %c0_45 = arith.constant 0 : index
    %64 = vector.load %arg4[%c2_43, %c0_44, %c0_45] : memref<3x128x128xbf16, #tpu.memory_space<vmem>>, vector<1x128x128xbf16>
    %65 = vector.shape_cast %64 : vector<1x128x128xbf16> to vector<128x128xbf16>
    %cst_46 = arith.constant dense<0.000000e+00> : vector<16x128xf32>
    %66 = tpu.matmul %45, %65, %cst_46 {dimension_numbers = #tpu.dot_dimension_numbers<[1], [0], [0], [1], [0, 0, 1, 1], [], []>} : vector<16x128xbf16>, vector<128x128xbf16>, vector<16x128xf32> -> vector<16x128xf32>
    %67 = arith.addf %63, %66 : vector<16x128xf32>
    %c0_47 = arith.constant 0 : index
    %c0_48 = arith.constant 0 : index
    %68 = vector.load %arg5[%c0_47, %c0_48] : memref<1x128xf32, #tpu.memory_space<vmem>>, vector<1x128xf32>
    %69 = vector.broadcast %68 : vector<1x128xf32> to vector<16x128xf32>
    %70 = arith.addf %56, %69 : vector<16x128xf32>
    %71 = vector.extract_strided_slice %35 {offsets = [0, 256], sizes = [16, 128], strides = [1, 1]} : vector<16x512xf32> to vector<16x128xf32>
    %72 = arith.addf %70, %71 : vector<16x128xf32>
    %cst_49 = arith.constant 0.000000e+00 : f32
    %73 = vector.broadcast %cst_49 : f32 to vector<16x128xf32>
    %74 = arith.maximumf %72, %73 : vector<16x128xf32>
    %75 = vector.broadcast %68 : vector<1x128xf32> to vector<16x128xf32>
    %76 = arith.addf %67, %75 : vector<16x128xf32>
    %77 = vector.extract_strided_slice %35 {offsets = [0, 384], sizes = [16, 128], strides = [1, 1]} : vector<16x512xf32> to vector<16x128xf32>
    %78 = arith.addf %76, %77 : vector<16x128xf32>
    %cst_50 = arith.constant 0.000000e+00 : f32
    %79 = vector.broadcast %cst_50 : f32 to vector<16x128xf32>
    %80 = arith.maximumf %78, %79 : vector<16x128xf32>
    %81 = arith.truncf %74 : vector<16x128xf32> to vector<16x128xbf16>
    %c0_51 = arith.constant 0 : index
    %c0_52 = arith.constant 0 : index
    %c0_53 = arith.constant 0 : index
    %82 = vector.load %arg6[%c0_51, %c0_52, %c0_53] : memref<1x16x256xbf16, #tpu.memory_space<vmem>>, vector<1x16x128xbf16>
    %83 = vector.shape_cast %82 : vector<1x16x128xbf16> to vector<16x128xbf16>
    %84 = vector.shape_cast %81 : vector<16x128xbf16> to vector<1x16x128xbf16>
    tpu.vector_store %arg6[%c0_51, %c0_52, %c0_53], %84 {strides = array<i32>} : memref<1x16x256xbf16, #tpu.memory_space<vmem>>, vector<1x16x128xbf16>,
    %85 = arith.truncf %80 : vector<16x128xf32> to vector<16x128xbf16>
    %c0_54 = arith.constant 0 : index
    %c0_55 = arith.constant 0 : index
    %c128 = arith.constant 128 : index
    %86 = vector.load %arg6[%c0_54, %c0_55, %c128] : memref<1x16x256xbf16, #tpu.memory_space<vmem>>, vector<1x16x128xbf16>
    %87 = vector.shape_cast %86 : vector<1x16x128xbf16> to vector<16x128xbf16>
    %88 = vector.shape_cast %85 : vector<16x128xbf16> to vector<1x16x128xbf16>
    tpu.vector_store %arg6[%c0_54, %c0_55, %c128], %88 {strides = array<i32>} : memref<1x16x256xbf16, #tpu.memory_space<vmem>>, vector<1x16x128xbf16>,
    return
  }
  func.func @transform_0(%arg0: i32) -> (i32, i32, i32) {
    %c0_i32 = arith.constant 0 : i32
    %c0_i32_0 = arith.constant 0 : i32
    %c0_i32_1 = arith.constant 0 : i32
    return %arg0, %c0_i32, %c0_i32_0 : i32, i32, i32
  }
  func.func @transform_1(%arg0: i32) -> (i32, i32, i32) {
    %c0_i32 = arith.constant 0 : i32
    %c0_i32_0 = arith.constant 0 : i32
    %c0_i32_1 = arith.constant 0 : i32
    %c0_i32_2 = arith.constant 0 : i32
    return %c0_i32, %c0_i32_0, %c0_i32_1 : i32, i32, i32
  }
  func.func @transform_2(%arg0: i32) -> (i32, i32) {
    %c0_i32 = arith.constant 0 : i32
    %c0_i32_0 = arith.constant 0 : i32
    %c0_i32_1 = arith.constant 0 : i32
    return %c0_i32, %c0_i32_0 : i32, i32
  }
  func.func @transform_3(%arg0: i32) -> (i32, i32, i32) {
    %c0_i32 = arith.constant 0 : i32
    %c0_i32_0 = arith.constant 0 : i32
    %c0_i32_1 = arith.constant 0 : i32
    %c0_i32_2 = arith.constant 0 : i32
    return %c0_i32, %c0_i32_0, %c0_i32_1 : i32, i32, i32
  }
  func.func @transform_4(%arg0: i32) -> (i32, i32) {
    %c0_i32 = arith.constant 0 : i32
    %c0_i32_0 = arith.constant 0 : i32
    %c0_i32_1 = arith.constant 0 : i32
    return %c0_i32, %c0_i32_0 : i32, i32
  }
  func.func @transform_5(%arg0: i32) -> (i32, i32, i32) {
    %c0_i32 = arith.constant 0 : i32
    %c0_i32_0 = arith.constant 0 : i32
    %c0_i32_1 = arith.constant 0 : i32
    return %arg0, %c0_i32, %c0_i32_0 : i32, i32, i32
  }
}

module attributes {stable_mosaic.version = 11 : i64} {
  func.func @_upproj_module_kernel(%arg0: i32, %arg1: memref<1x32x128xbf16, #tpu.memory_space<vmem>>, %arg2: memref<3x128x512xbf16, #tpu.memory_space<vmem>>, %arg3: memref<1x512xf32, #tpu.memory_space<vmem>>, %arg4: memref<3x128x128xbf16, #tpu.memory_space<vmem>>, %arg5: memref<1x128xf32, #tpu.memory_space<vmem>>, %arg6: memref<1x32x256xbf16, #tpu.memory_space<vmem>>) attributes {dimension_semantics = [#tpu.dimension_semantics<parallel>], iteration_bounds = array<i64: 2>, scalar_prefetch = 0 : i64, scratch_operands = 0 : i64, tpu.core_type = #tpu.core_type<tc>, window_params = [{transform_indices = @transform_0, window_bounds = array<i64: 1, 32, 128>}, {pipeline_mode = #tpu.pipeline_mode<synchronous>, transform_indices = @transform_1, window_bounds = array<i64: 3, 128, 512>}, {pipeline_mode = #tpu.pipeline_mode<synchronous>, transform_indices = @transform_2, window_bounds = array<i64: 1, 512>}, {pipeline_mode = #tpu.pipeline_mode<synchronous>, transform_indices = @transform_3, window_bounds = array<i64: 3, 128, 128>}, {pipeline_mode = #tpu.pipeline_mode<synchronous>, transform_indices = @transform_4, window_bounds = array<i64: 1, 128>}, {transform_indices = @transform_5, window_bounds = array<i64: 1, 32, 256>}]} {
    %0 = tpu.iota {dimensions = array<i32: 0>} : vector<32x32xi32>
    %1 = tpu.iota {dimensions = array<i32: 1>} : vector<32x32xi32>
    %c1_i32 = arith.constant 1 : i32
    %2 = vector.broadcast %c1_i32 : i32 to vector<32x32xi32>
    %3 = arith.addi %1, %2 : vector<32x32xi32>
    %4 = arith.cmpi eq, %0, %3 : vector<32x32xi32>
    %cst = arith.constant 1.000000e+00 : f32
    %cst_0 = arith.constant 0.000000e+00 : f32
    %5 = vector.broadcast %cst : f32 to vector<32x32xf32>
    %6 = vector.broadcast %cst_0 : f32 to vector<32x32xf32>
    %7 = arith.select %4, %5, %6 : vector<32x32xi1>, vector<32x32xf32>
    %8 = arith.truncf %7 : vector<32x32xf32> to vector<32x32xbf16>
    %c1_i32_1 = arith.constant 1 : i32
    %9 = vector.broadcast %c1_i32_1 : i32 to vector<32x32xi32>
    %10 = arith.subi %1, %9 : vector<32x32xi32>
    %11 = arith.cmpi eq, %0, %10 : vector<32x32xi32>
    %cst_2 = arith.constant 1.000000e+00 : f32
    %cst_3 = arith.constant 0.000000e+00 : f32
    %12 = vector.broadcast %cst_2 : f32 to vector<32x32xf32>
    %13 = vector.broadcast %cst_3 : f32 to vector<32x32xf32>
    %14 = arith.select %11, %12, %13 : vector<32x32xi1>, vector<32x32xf32>
    %15 = arith.truncf %14 : vector<32x32xf32> to vector<32x32xbf16>
    %c0 = arith.constant 0 : index
    %c0_4 = arith.constant 0 : index
    %c0_5 = arith.constant 0 : index
    %16 = vector.load %arg1[%c0, %c0_4, %c0_5] : memref<1x32x128xbf16, #tpu.memory_space<vmem>>, vector<1x32x128xbf16>
    %17 = vector.shape_cast %16 : vector<1x32x128xbf16> to vector<32x128xbf16>
    %cst_6 = arith.constant dense<0.000000e+00> : vector<32x128xf32>
    %18 = tpu.matmul %8, %17, %cst_6 {dimension_numbers = #tpu.dot_dimension_numbers<[1], [0], [0], [1], [0, 0, 1, 1], [], []>} : vector<32x32xbf16>, vector<32x128xbf16>, vector<32x128xf32> -> vector<32x128xf32>
    %19 = arith.truncf %18 : vector<32x128xf32> to vector<32x128xbf16>
    %cst_7 = arith.constant dense<0.000000e+00> : vector<32x128xf32>
    %20 = tpu.matmul %15, %17, %cst_7 {dimension_numbers = #tpu.dot_dimension_numbers<[1], [0], [0], [1], [0, 0, 1, 1], [], []>} : vector<32x32xbf16>, vector<32x128xbf16>, vector<32x128xf32> -> vector<32x128xf32>
    %21 = arith.truncf %20 : vector<32x128xf32> to vector<32x128xbf16>
    %c0_8 = arith.constant 0 : index
    %c0_9 = arith.constant 0 : index
    %c0_10 = arith.constant 0 : index
    %22 = vector.load %arg2[%c0_8, %c0_9, %c0_10] : memref<3x128x512xbf16, #tpu.memory_space<vmem>>, vector<1x128x512xbf16>
    %23 = vector.shape_cast %22 : vector<1x128x512xbf16> to vector<128x512xbf16>
    %cst_11 = arith.constant dense<0.000000e+00> : vector<32x512xf32>
    %24 = tpu.matmul %19, %23, %cst_11 {dimension_numbers = #tpu.dot_dimension_numbers<[1], [0], [0], [1], [0, 0, 1, 1], [], []>} : vector<32x128xbf16>, vector<128x512xbf16>, vector<32x512xf32> -> vector<32x512xf32>
    %c1 = arith.constant 1 : index
    %c0_12 = arith.constant 0 : index
    %c0_13 = arith.constant 0 : index
    %25 = vector.load %arg2[%c1, %c0_12, %c0_13] : memref<3x128x512xbf16, #tpu.memory_space<vmem>>, vector<1x128x512xbf16>
    %26 = vector.shape_cast %25 : vector<1x128x512xbf16> to vector<128x512xbf16>
    %cst_14 = arith.constant dense<0.000000e+00> : vector<32x512xf32>
    %27 = tpu.matmul %17, %26, %cst_14 {dimension_numbers = #tpu.dot_dimension_numbers<[1], [0], [0], [1], [0, 0, 1, 1], [], []>} : vector<32x128xbf16>, vector<128x512xbf16>, vector<32x512xf32> -> vector<32x512xf32>
    %28 = arith.addf %24, %27 : vector<32x512xf32>
    %c2 = arith.constant 2 : index
    %c0_15 = arith.constant 0 : index
    %c0_16 = arith.constant 0 : index
    %29 = vector.load %arg2[%c2, %c0_15, %c0_16] : memref<3x128x512xbf16, #tpu.memory_space<vmem>>, vector<1x128x512xbf16>
    %30 = vector.shape_cast %29 : vector<1x128x512xbf16> to vector<128x512xbf16>
    %cst_17 = arith.constant dense<0.000000e+00> : vector<32x512xf32>
    %31 = tpu.matmul %21, %30, %cst_17 {dimension_numbers = #tpu.dot_dimension_numbers<[1], [0], [0], [1], [0, 0, 1, 1], [], []>} : vector<32x128xbf16>, vector<128x512xbf16>, vector<32x512xf32> -> vector<32x512xf32>
    %32 = arith.addf %28, %31 : vector<32x512xf32>
    %c0_18 = arith.constant 0 : index
    %c0_19 = arith.constant 0 : index
    %33 = vector.load %arg3[%c0_18, %c0_19] : memref<1x512xf32, #tpu.memory_space<vmem>>, vector<1x512xf32>
    %34 = vector.broadcast %33 : vector<1x512xf32> to vector<32x512xf32>
    %35 = arith.addf %32, %34 : vector<32x512xf32>
    %36 = vector.extract_strided_slice %35 {offsets = [0, 0], sizes = [32, 256], strides = [1, 1]} : vector<32x512xf32> to vector<32x256xf32>
    %cst_20 = arith.constant 0.000000e+00 : f32
    %37 = vector.broadcast %cst_20 : f32 to vector<32x256xf32>
    %38 = arith.maximumf %36, %37 : vector<32x256xf32>
    %39 = arith.truncf %38 : vector<32x256xf32> to vector<32x256xbf16>
    %40 = vector.extract_strided_slice %39 {offsets = [0, 0], sizes = [32, 128], strides = [1, 1]} : vector<32x256xbf16> to vector<32x128xbf16>
    %41 = vector.extract_strided_slice %39 {offsets = [0, 128], sizes = [32, 128], strides = [1, 1]} : vector<32x256xbf16> to vector<32x128xbf16>
    %cst_21 = arith.constant dense<0.000000e+00> : vector<32x128xf32>
    %42 = tpu.matmul %8, %41, %cst_21 {dimension_numbers = #tpu.dot_dimension_numbers<[1], [0], [0], [1], [0, 0, 1, 1], [], []>} : vector<32x32xbf16>, vector<32x128xbf16>, vector<32x128xf32> -> vector<32x128xf32>
    %43 = arith.truncf %42 : vector<32x128xf32> to vector<32x128xbf16>
    %cst_22 = arith.constant dense<0.000000e+00> : vector<32x128xf32>
    %44 = tpu.matmul %15, %40, %cst_22 {dimension_numbers = #tpu.dot_dimension_numbers<[1], [0], [0], [1], [0, 0, 1, 1], [], []>} : vector<32x32xbf16>, vector<32x128xbf16>, vector<32x128xf32> -> vector<32x128xf32>
    %45 = arith.truncf %44 : vector<32x128xf32> to vector<32x128xbf16>
    %c0_23 = arith.constant 0 : index
    %c0_24 = arith.constant 0 : index
    %c0_25 = arith.constant 0 : index
    %46 = vector.load %arg4[%c0_23, %c0_24, %c0_25] : memref<3x128x128xbf16, #tpu.memory_space<vmem>>, vector<1x128x128xbf16>
    %47 = vector.shape_cast %46 : vector<1x128x128xbf16> to vector<128x128xbf16>
    %cst_26 = arith.constant dense<0.000000e+00> : vector<32x128xf32>
    %48 = tpu.matmul %43, %47, %cst_26 {dimension_numbers = #tpu.dot_dimension_numbers<[1], [0], [0], [1], [0, 0, 1, 1], [], []>} : vector<32x128xbf16>, vector<128x128xbf16>, vector<32x128xf32> -> vector<32x128xf32>
    %c1_27 = arith.constant 1 : index
    %c0_28 = arith.constant 0 : index
    %c0_29 = arith.constant 0 : index
    %49 = vector.load %arg4[%c1_27, %c0_28, %c0_29] : memref<3x128x128xbf16, #tpu.memory_space<vmem>>, vector<1x128x128xbf16>
    %50 = vector.shape_cast %49 : vector<1x128x128xbf16> to vector<128x128xbf16>
    %cst_30 = arith.constant dense<0.000000e+00> : vector<32x128xf32>
    %51 = tpu.matmul %40, %50, %cst_30 {dimension_numbers = #tpu.dot_dimension_numbers<[1], [0], [0], [1], [0, 0, 1, 1], [], []>} : vector<32x128xbf16>, vector<128x128xbf16>, vector<32x128xf32> -> vector<32x128xf32>
    %52 = arith.addf %48, %51 : vector<32x128xf32>
    %c2_31 = arith.constant 2 : index
    %c0_32 = arith.constant 0 : index
    %c0_33 = arith.constant 0 : index
    %53 = vector.load %arg4[%c2_31, %c0_32, %c0_33] : memref<3x128x128xbf16, #tpu.memory_space<vmem>>, vector<1x128x128xbf16>
    %54 = vector.shape_cast %53 : vector<1x128x128xbf16> to vector<128x128xbf16>
    %cst_34 = arith.constant dense<0.000000e+00> : vector<32x128xf32>
    %55 = tpu.matmul %41, %54, %cst_34 {dimension_numbers = #tpu.dot_dimension_numbers<[1], [0], [0], [1], [0, 0, 1, 1], [], []>} : vector<32x128xbf16>, vector<128x128xbf16>, vector<32x128xf32> -> vector<32x128xf32>
    %56 = arith.addf %52, %55 : vector<32x128xf32>
    %c0_35 = arith.constant 0 : index
    %c0_36 = arith.constant 0 : index
    %c0_37 = arith.constant 0 : index
    %57 = vector.load %arg4[%c0_35, %c0_36, %c0_37] : memref<3x128x128xbf16, #tpu.memory_space<vmem>>, vector<1x128x128xbf16>
    %58 = vector.shape_cast %57 : vector<1x128x128xbf16> to vector<128x128xbf16>
    %cst_38 = arith.constant dense<0.000000e+00> : vector<32x128xf32>
    %59 = tpu.matmul %40, %58, %cst_38 {dimension_numbers = #tpu.dot_dimension_numbers<[1], [0], [0], [1], [0, 0, 1, 1], [], []>} : vector<32x128xbf16>, vector<128x128xbf16>, vector<32x128xf32> -> vector<32x128xf32>
    %c1_39 = arith.constant 1 : index
    %c0_40 = arith.constant 0 : index
    %c0_41 = arith.constant 0 : index
    %60 = vector.load %arg4[%c1_39, %c0_40, %c0_41] : memref<3x128x128xbf16, #tpu.memory_space<vmem>>, vector<1x128x128xbf16>
    %61 = vector.shape_cast %60 : vector<1x128x128xbf16> to vector<128x128xbf16>
    %cst_42 = arith.constant dense<0.000000e+00> : vector<32x128xf32>
    %62 = tpu.matmul %41, %61, %cst_42 {dimension_numbers = #tpu.dot_dimension_numbers<[1], [0], [0], [1], [0, 0, 1, 1], [], []>} : vector<32x128xbf16>, vector<128x128xbf16>, vector<32x128xf32> -> vector<32x128xf32>
    %63 = arith.addf %59, %62 : vector<32x128xf32>
    %c2_43 = arith.constant 2 : index
    %c0_44 = arith.constant 0 : index
    %c0_45 = arith.constant 0 : index
    %64 = vector.load %arg4[%c2_43, %c0_44, %c0_45] : memref<3x128x128xbf16, #tpu.memory_space<vmem>>, vector<1x128x128xbf16>
    %65 = vector.shape_cast %64 : vector<1x128x128xbf16> to vector<128x128xbf16>
    %cst_46 = arith.constant dense<0.000000e+00> : vector<32x128xf32>
    %66 = tpu.matmul %45, %65, %cst_46 {dimension_numbers = #tpu.dot_dimension_numbers<[1], [0], [0], [1], [0, 0, 1, 1], [], []>} : vector<32x128xbf16>, vector<128x128xbf16>, vector<32x128xf32> -> vector<32x128xf32>
    %67 = arith.addf %63, %66 : vector<32x128xf32>
    %c0_47 = arith.constant 0 : index
    %c0_48 = arith.constant 0 : index
    %68 = vector.load %arg5[%c0_47, %c0_48] : memref<1x128xf32, #tpu.memory_space<vmem>>, vector<1x128xf32>
    %69 = vector.broadcast %68 : vector<1x128xf32> to vector<32x128xf32>
    %70 = arith.addf %56, %69 : vector<32x128xf32>
    %71 = vector.extract_strided_slice %35 {offsets = [0, 256], sizes = [32, 128], strides = [1, 1]} : vector<32x512xf32> to vector<32x128xf32>
    %72 = arith.addf %70, %71 : vector<32x128xf32>
    %cst_49 = arith.constant 0.000000e+00 : f32
    %73 = vector.broadcast %cst_49 : f32 to vector<32x128xf32>
    %74 = arith.maximumf %72, %73 : vector<32x128xf32>
    %75 = vector.broadcast %68 : vector<1x128xf32> to vector<32x128xf32>
    %76 = arith.addf %67, %75 : vector<32x128xf32>
    %77 = vector.extract_strided_slice %35 {offsets = [0, 384], sizes = [32, 128], strides = [1, 1]} : vector<32x512xf32> to vector<32x128xf32>
    %78 = arith.addf %76, %77 : vector<32x128xf32>
    %cst_50 = arith.constant 0.000000e+00 : f32
    %79 = vector.broadcast %cst_50 : f32 to vector<32x128xf32>
    %80 = arith.maximumf %78, %79 : vector<32x128xf32>
    %81 = arith.truncf %74 : vector<32x128xf32> to vector<32x128xbf16>
    %c0_51 = arith.constant 0 : index
    %c0_52 = arith.constant 0 : index
    %c0_53 = arith.constant 0 : index
    %82 = vector.load %arg6[%c0_51, %c0_52, %c0_53] : memref<1x32x256xbf16, #tpu.memory_space<vmem>>, vector<1x32x128xbf16>
    %83 = vector.shape_cast %82 : vector<1x32x128xbf16> to vector<32x128xbf16>
    %84 = vector.shape_cast %81 : vector<32x128xbf16> to vector<1x32x128xbf16>
    tpu.vector_store %arg6[%c0_51, %c0_52, %c0_53], %84 {strides = array<i32>} : memref<1x32x256xbf16, #tpu.memory_space<vmem>>, vector<1x32x128xbf16>,
    %85 = arith.truncf %80 : vector<32x128xf32> to vector<32x128xbf16>
    %c0_54 = arith.constant 0 : index
    %c0_55 = arith.constant 0 : index
    %c128 = arith.constant 128 : index
    %86 = vector.load %arg6[%c0_54, %c0_55, %c128] : memref<1x32x256xbf16, #tpu.memory_space<vmem>>, vector<1x32x128xbf16>
    %87 = vector.shape_cast %86 : vector<1x32x128xbf16> to vector<32x128xbf16>
    %88 = vector.shape_cast %85 : vector<32x128xbf16> to vector<1x32x128xbf16>
    tpu.vector_store %arg6[%c0_54, %c0_55, %c128], %88 {strides = array<i32>} : memref<1x32x256xbf16, #tpu.memory_space<vmem>>, vector<1x32x128xbf16>,
    return
  }
  func.func @transform_0(%arg0: i32) -> (i32, i32, i32) {
    %c0_i32 = arith.constant 0 : i32
    %c0_i32_0 = arith.constant 0 : i32
    %c0_i32_1 = arith.constant 0 : i32
    return %arg0, %c0_i32, %c0_i32_0 : i32, i32, i32
  }
  func.func @transform_1(%arg0: i32) -> (i32, i32, i32) {
    %c0_i32 = arith.constant 0 : i32
    %c0_i32_0 = arith.constant 0 : i32
    %c0_i32_1 = arith.constant 0 : i32
    %c0_i32_2 = arith.constant 0 : i32
    return %c0_i32, %c0_i32_0, %c0_i32_1 : i32, i32, i32
  }
  func.func @transform_2(%arg0: i32) -> (i32, i32) {
    %c0_i32 = arith.constant 0 : i32
    %c0_i32_0 = arith.constant 0 : i32
    %c0_i32_1 = arith.constant 0 : i32
    return %c0_i32, %c0_i32_0 : i32, i32
  }
  func.func @transform_3(%arg0: i32) -> (i32, i32, i32) {
    %c0_i32 = arith.constant 0 : i32
    %c0_i32_0 = arith.constant 0 : i32
    %c0_i32_1 = arith.constant 0 : i32
    %c0_i32_2 = arith.constant 0 : i32
    return %c0_i32, %c0_i32_0, %c0_i32_1 : i32, i32, i32
  }
  func.func @transform_4(%arg0: i32) -> (i32, i32) {
    %c0_i32 = arith.constant 0 : i32
    %c0_i32_0 = arith.constant 0 : i32
    %c0_i32_1 = arith.constant 0 : i32
    return %c0_i32, %c0_i32_0 : i32, i32
  }
  func.func @transform_5(%arg0: i32) -> (i32, i32, i32) {
    %c0_i32 = arith.constant 0 : i32
    %c0_i32_0 = arith.constant 0 : i32
    %c0_i32_1 = arith.constant 0 : i32
    return %arg0, %c0_i32, %c0_i32_0 : i32, i32, i32
  }
}

module attributes {stable_mosaic.version = 11 : i64} {
  func.func @_upproj_module_kernel(%arg0: i32, %arg1: memref<1x64x128xbf16, #tpu.memory_space<vmem>>, %arg2: memref<3x128x512xbf16, #tpu.memory_space<vmem>>, %arg3: memref<1x512xf32, #tpu.memory_space<vmem>>, %arg4: memref<3x128x128xbf16, #tpu.memory_space<vmem>>, %arg5: memref<1x128xf32, #tpu.memory_space<vmem>>, %arg6: memref<1x64x256xf32, #tpu.memory_space<vmem>>) attributes {dimension_semantics = [#tpu.dimension_semantics<parallel>], iteration_bounds = array<i64: 2>, scalar_prefetch = 0 : i64, scratch_operands = 0 : i64, tpu.core_type = #tpu.core_type<tc>, window_params = [{transform_indices = @transform_0, window_bounds = array<i64: 1, 64, 128>}, {pipeline_mode = #tpu.pipeline_mode<synchronous>, transform_indices = @transform_1, window_bounds = array<i64: 3, 128, 512>}, {pipeline_mode = #tpu.pipeline_mode<synchronous>, transform_indices = @transform_2, window_bounds = array<i64: 1, 512>}, {pipeline_mode = #tpu.pipeline_mode<synchronous>, transform_indices = @transform_3, window_bounds = array<i64: 3, 128, 128>}, {pipeline_mode = #tpu.pipeline_mode<synchronous>, transform_indices = @transform_4, window_bounds = array<i64: 1, 128>}, {transform_indices = @transform_5, window_bounds = array<i64: 1, 64, 256>}]} {
    %0 = tpu.iota {dimensions = array<i32: 0>} : vector<64x64xi32>
    %1 = tpu.iota {dimensions = array<i32: 1>} : vector<64x64xi32>
    %c1_i32 = arith.constant 1 : i32
    %2 = vector.broadcast %c1_i32 : i32 to vector<64x64xi32>
    %3 = arith.addi %1, %2 : vector<64x64xi32>
    %4 = arith.cmpi eq, %0, %3 : vector<64x64xi32>
    %cst = arith.constant 1.000000e+00 : f32
    %cst_0 = arith.constant 0.000000e+00 : f32
    %5 = vector.broadcast %cst : f32 to vector<64x64xf32>
    %6 = vector.broadcast %cst_0 : f32 to vector<64x64xf32>
    %7 = arith.select %4, %5, %6 : vector<64x64xi1>, vector<64x64xf32>
    %8 = arith.truncf %7 : vector<64x64xf32> to vector<64x64xbf16>
    %c1_i32_1 = arith.constant 1 : i32
    %9 = vector.broadcast %c1_i32_1 : i32 to vector<64x64xi32>
    %10 = arith.subi %1, %9 : vector<64x64xi32>
    %11 = arith.cmpi eq, %0, %10 : vector<64x64xi32>
    %cst_2 = arith.constant 1.000000e+00 : f32
    %cst_3 = arith.constant 0.000000e+00 : f32
    %12 = vector.broadcast %cst_2 : f32 to vector<64x64xf32>
    %13 = vector.broadcast %cst_3 : f32 to vector<64x64xf32>
    %14 = arith.select %11, %12, %13 : vector<64x64xi1>, vector<64x64xf32>
    %15 = arith.truncf %14 : vector<64x64xf32> to vector<64x64xbf16>
    %c0 = arith.constant 0 : index
    %c0_4 = arith.constant 0 : index
    %c0_5 = arith.constant 0 : index
    %16 = vector.load %arg1[%c0, %c0_4, %c0_5] : memref<1x64x128xbf16, #tpu.memory_space<vmem>>, vector<1x64x128xbf16>
    %17 = vector.shape_cast %16 : vector<1x64x128xbf16> to vector<64x128xbf16>
    %cst_6 = arith.constant dense<0.000000e+00> : vector<64x128xf32>
    %18 = tpu.matmul %8, %17, %cst_6 {dimension_numbers = #tpu.dot_dimension_numbers<[1], [0], [0], [1], [0, 0, 1, 1], [], []>} : vector<64x64xbf16>, vector<64x128xbf16>, vector<64x128xf32> -> vector<64x128xf32>
    %19 = arith.truncf %18 : vector<64x128xf32> to vector<64x128xbf16>
    %cst_7 = arith.constant dense<0.000000e+00> : vector<64x128xf32>
    %20 = tpu.matmul %15, %17, %cst_7 {dimension_numbers = #tpu.dot_dimension_numbers<[1], [0], [0], [1], [0, 0, 1, 1], [], []>} : vector<64x64xbf16>, vector<64x128xbf16>, vector<64x128xf32> -> vector<64x128xf32>
    %21 = arith.truncf %20 : vector<64x128xf32> to vector<64x128xbf16>
    %c0_8 = arith.constant 0 : index
    %c0_9 = arith.constant 0 : index
    %c0_10 = arith.constant 0 : index
    %22 = vector.load %arg2[%c0_8, %c0_9, %c0_10] : memref<3x128x512xbf16, #tpu.memory_space<vmem>>, vector<1x128x512xbf16>
    %23 = vector.shape_cast %22 : vector<1x128x512xbf16> to vector<128x512xbf16>
    %cst_11 = arith.constant dense<0.000000e+00> : vector<64x512xf32>
    %24 = tpu.matmul %19, %23, %cst_11 {dimension_numbers = #tpu.dot_dimension_numbers<[1], [0], [0], [1], [0, 0, 1, 1], [], []>} : vector<64x128xbf16>, vector<128x512xbf16>, vector<64x512xf32> -> vector<64x512xf32>
    %c1 = arith.constant 1 : index
    %c0_12 = arith.constant 0 : index
    %c0_13 = arith.constant 0 : index
    %25 = vector.load %arg2[%c1, %c0_12, %c0_13] : memref<3x128x512xbf16, #tpu.memory_space<vmem>>, vector<1x128x512xbf16>
    %26 = vector.shape_cast %25 : vector<1x128x512xbf16> to vector<128x512xbf16>
    %cst_14 = arith.constant dense<0.000000e+00> : vector<64x512xf32>
    %27 = tpu.matmul %17, %26, %cst_14 {dimension_numbers = #tpu.dot_dimension_numbers<[1], [0], [0], [1], [0, 0, 1, 1], [], []>} : vector<64x128xbf16>, vector<128x512xbf16>, vector<64x512xf32> -> vector<64x512xf32>
    %28 = arith.addf %24, %27 : vector<64x512xf32>
    %c2 = arith.constant 2 : index
    %c0_15 = arith.constant 0 : index
    %c0_16 = arith.constant 0 : index
    %29 = vector.load %arg2[%c2, %c0_15, %c0_16] : memref<3x128x512xbf16, #tpu.memory_space<vmem>>, vector<1x128x512xbf16>
    %30 = vector.shape_cast %29 : vector<1x128x512xbf16> to vector<128x512xbf16>
    %cst_17 = arith.constant dense<0.000000e+00> : vector<64x512xf32>
    %31 = tpu.matmul %21, %30, %cst_17 {dimension_numbers = #tpu.dot_dimension_numbers<[1], [0], [0], [1], [0, 0, 1, 1], [], []>} : vector<64x128xbf16>, vector<128x512xbf16>, vector<64x512xf32> -> vector<64x512xf32>
    %32 = arith.addf %28, %31 : vector<64x512xf32>
    %c0_18 = arith.constant 0 : index
    %c0_19 = arith.constant 0 : index
    %33 = vector.load %arg3[%c0_18, %c0_19] : memref<1x512xf32, #tpu.memory_space<vmem>>, vector<1x512xf32>
    %34 = vector.broadcast %33 : vector<1x512xf32> to vector<64x512xf32>
    %35 = arith.addf %32, %34 : vector<64x512xf32>
    %36 = vector.extract_strided_slice %35 {offsets = [0, 0], sizes = [64, 256], strides = [1, 1]} : vector<64x512xf32> to vector<64x256xf32>
    %cst_20 = arith.constant 0.000000e+00 : f32
    %37 = vector.broadcast %cst_20 : f32 to vector<64x256xf32>
    %38 = arith.maximumf %36, %37 : vector<64x256xf32>
    %39 = arith.truncf %38 : vector<64x256xf32> to vector<64x256xbf16>
    %40 = vector.extract_strided_slice %39 {offsets = [0, 0], sizes = [64, 128], strides = [1, 1]} : vector<64x256xbf16> to vector<64x128xbf16>
    %41 = vector.extract_strided_slice %39 {offsets = [0, 128], sizes = [64, 128], strides = [1, 1]} : vector<64x256xbf16> to vector<64x128xbf16>
    %cst_21 = arith.constant dense<0.000000e+00> : vector<64x128xf32>
    %42 = tpu.matmul %8, %41, %cst_21 {dimension_numbers = #tpu.dot_dimension_numbers<[1], [0], [0], [1], [0, 0, 1, 1], [], []>} : vector<64x64xbf16>, vector<64x128xbf16>, vector<64x128xf32> -> vector<64x128xf32>
    %43 = arith.truncf %42 : vector<64x128xf32> to vector<64x128xbf16>
    %cst_22 = arith.constant dense<0.000000e+00> : vector<64x128xf32>
    %44 = tpu.matmul %15, %40, %cst_22 {dimension_numbers = #tpu.dot_dimension_numbers<[1], [0], [0], [1], [0, 0, 1, 1], [], []>} : vector<64x64xbf16>, vector<64x128xbf16>, vector<64x128xf32> -> vector<64x128xf32>
    %45 = arith.truncf %44 : vector<64x128xf32> to vector<64x128xbf16>
    %c0_23 = arith.constant 0 : index
    %c0_24 = arith.constant 0 : index
    %c0_25 = arith.constant 0 : index
    %46 = vector.load %arg4[%c0_23, %c0_24, %c0_25] : memref<3x128x128xbf16, #tpu.memory_space<vmem>>, vector<1x128x128xbf16>
    %47 = vector.shape_cast %46 : vector<1x128x128xbf16> to vector<128x128xbf16>
    %cst_26 = arith.constant dense<0.000000e+00> : vector<64x128xf32>
    %48 = tpu.matmul %43, %47, %cst_26 {dimension_numbers = #tpu.dot_dimension_numbers<[1], [0], [0], [1], [0, 0, 1, 1], [], []>} : vector<64x128xbf16>, vector<128x128xbf16>, vector<64x128xf32> -> vector<64x128xf32>
    %c1_27 = arith.constant 1 : index
    %c0_28 = arith.constant 0 : index
    %c0_29 = arith.constant 0 : index
    %49 = vector.load %arg4[%c1_27, %c0_28, %c0_29] : memref<3x128x128xbf16, #tpu.memory_space<vmem>>, vector<1x128x128xbf16>
    %50 = vector.shape_cast %49 : vector<1x128x128xbf16> to vector<128x128xbf16>
    %cst_30 = arith.constant dense<0.000000e+00> : vector<64x128xf32>
    %51 = tpu.matmul %40, %50, %cst_30 {dimension_numbers = #tpu.dot_dimension_numbers<[1], [0], [0], [1], [0, 0, 1, 1], [], []>} : vector<64x128xbf16>, vector<128x128xbf16>, vector<64x128xf32> -> vector<64x128xf32>
    %52 = arith.addf %48, %51 : vector<64x128xf32>
    %c2_31 = arith.constant 2 : index
    %c0_32 = arith.constant 0 : index
    %c0_33 = arith.constant 0 : index
    %53 = vector.load %arg4[%c2_31, %c0_32, %c0_33] : memref<3x128x128xbf16, #tpu.memory_space<vmem>>, vector<1x128x128xbf16>
    %54 = vector.shape_cast %53 : vector<1x128x128xbf16> to vector<128x128xbf16>
    %cst_34 = arith.constant dense<0.000000e+00> : vector<64x128xf32>
    %55 = tpu.matmul %41, %54, %cst_34 {dimension_numbers = #tpu.dot_dimension_numbers<[1], [0], [0], [1], [0, 0, 1, 1], [], []>} : vector<64x128xbf16>, vector<128x128xbf16>, vector<64x128xf32> -> vector<64x128xf32>
    %56 = arith.addf %52, %55 : vector<64x128xf32>
    %c0_35 = arith.constant 0 : index
    %c0_36 = arith.constant 0 : index
    %c0_37 = arith.constant 0 : index
    %57 = vector.load %arg4[%c0_35, %c0_36, %c0_37] : memref<3x128x128xbf16, #tpu.memory_space<vmem>>, vector<1x128x128xbf16>
    %58 = vector.shape_cast %57 : vector<1x128x128xbf16> to vector<128x128xbf16>
    %cst_38 = arith.constant dense<0.000000e+00> : vector<64x128xf32>
    %59 = tpu.matmul %40, %58, %cst_38 {dimension_numbers = #tpu.dot_dimension_numbers<[1], [0], [0], [1], [0, 0, 1, 1], [], []>} : vector<64x128xbf16>, vector<128x128xbf16>, vector<64x128xf32> -> vector<64x128xf32>
    %c1_39 = arith.constant 1 : index
    %c0_40 = arith.constant 0 : index
    %c0_41 = arith.constant 0 : index
    %60 = vector.load %arg4[%c1_39, %c0_40, %c0_41] : memref<3x128x128xbf16, #tpu.memory_space<vmem>>, vector<1x128x128xbf16>
    %61 = vector.shape_cast %60 : vector<1x128x128xbf16> to vector<128x128xbf16>
    %cst_42 = arith.constant dense<0.000000e+00> : vector<64x128xf32>
    %62 = tpu.matmul %41, %61, %cst_42 {dimension_numbers = #tpu.dot_dimension_numbers<[1], [0], [0], [1], [0, 0, 1, 1], [], []>} : vector<64x128xbf16>, vector<128x128xbf16>, vector<64x128xf32> -> vector<64x128xf32>
    %63 = arith.addf %59, %62 : vector<64x128xf32>
    %c2_43 = arith.constant 2 : index
    %c0_44 = arith.constant 0 : index
    %c0_45 = arith.constant 0 : index
    %64 = vector.load %arg4[%c2_43, %c0_44, %c0_45] : memref<3x128x128xbf16, #tpu.memory_space<vmem>>, vector<1x128x128xbf16>
    %65 = vector.shape_cast %64 : vector<1x128x128xbf16> to vector<128x128xbf16>
    %cst_46 = arith.constant dense<0.000000e+00> : vector<64x128xf32>
    %66 = tpu.matmul %45, %65, %cst_46 {dimension_numbers = #tpu.dot_dimension_numbers<[1], [0], [0], [1], [0, 0, 1, 1], [], []>} : vector<64x128xbf16>, vector<128x128xbf16>, vector<64x128xf32> -> vector<64x128xf32>
    %67 = arith.addf %63, %66 : vector<64x128xf32>
    %c0_47 = arith.constant 0 : index
    %c0_48 = arith.constant 0 : index
    %68 = vector.load %arg5[%c0_47, %c0_48] : memref<1x128xf32, #tpu.memory_space<vmem>>, vector<1x128xf32>
    %69 = vector.broadcast %68 : vector<1x128xf32> to vector<64x128xf32>
    %70 = arith.addf %56, %69 : vector<64x128xf32>
    %71 = vector.extract_strided_slice %35 {offsets = [0, 256], sizes = [64, 128], strides = [1, 1]} : vector<64x512xf32> to vector<64x128xf32>
    %72 = arith.addf %70, %71 : vector<64x128xf32>
    %cst_49 = arith.constant 0.000000e+00 : f32
    %73 = vector.broadcast %cst_49 : f32 to vector<64x128xf32>
    %74 = arith.maximumf %72, %73 : vector<64x128xf32>
    %75 = vector.broadcast %68 : vector<1x128xf32> to vector<64x128xf32>
    %76 = arith.addf %67, %75 : vector<64x128xf32>
    %77 = vector.extract_strided_slice %35 {offsets = [0, 384], sizes = [64, 128], strides = [1, 1]} : vector<64x512xf32> to vector<64x128xf32>
    %78 = arith.addf %76, %77 : vector<64x128xf32>
    %cst_50 = arith.constant 0.000000e+00 : f32
    %79 = vector.broadcast %cst_50 : f32 to vector<64x128xf32>
    %80 = arith.maximumf %78, %79 : vector<64x128xf32>
    %c0_51 = arith.constant 0 : index
    %c0_52 = arith.constant 0 : index
    %c0_53 = arith.constant 0 : index
    %81 = vector.load %arg6[%c0_51, %c0_52, %c0_53] : memref<1x64x256xf32, #tpu.memory_space<vmem>>, vector<1x64x128xf32>
    %82 = vector.shape_cast %81 : vector<1x64x128xf32> to vector<64x128xf32>
    %83 = vector.shape_cast %74 : vector<64x128xf32> to vector<1x64x128xf32>
    tpu.vector_store %arg6[%c0_51, %c0_52, %c0_53], %83 {strides = array<i32>} : memref<1x64x256xf32, #tpu.memory_space<vmem>>, vector<1x64x128xf32>,
    %c0_54 = arith.constant 0 : index
    %c0_55 = arith.constant 0 : index
    %c128 = arith.constant 128 : index
    %84 = vector.load %arg6[%c0_54, %c0_55, %c128] : memref<1x64x256xf32, #tpu.memory_space<vmem>>, vector<1x64x128xf32>
    %85 = vector.shape_cast %84 : vector<1x64x128xf32> to vector<64x128xf32>
    %86 = vector.shape_cast %80 : vector<64x128xf32> to vector<1x64x128xf32>
    tpu.vector_store %arg6[%c0_54, %c0_55, %c128], %86 {strides = array<i32>} : memref<1x64x256xf32, #tpu.memory_space<vmem>>, vector<1x64x128xf32>,
    return
  }
  func.func @transform_0(%arg0: i32) -> (i32, i32, i32) {
    %c0_i32 = arith.constant 0 : i32
    %c0_i32_0 = arith.constant 0 : i32
    %c0_i32_1 = arith.constant 0 : i32
    return %arg0, %c0_i32, %c0_i32_0 : i32, i32, i32
  }
  func.func @transform_1(%arg0: i32) -> (i32, i32, i32) {
    %c0_i32 = arith.constant 0 : i32
    %c0_i32_0 = arith.constant 0 : i32
    %c0_i32_1 = arith.constant 0 : i32
    %c0_i32_2 = arith.constant 0 : i32
    return %c0_i32, %c0_i32_0, %c0_i32_1 : i32, i32, i32
  }
  func.func @transform_2(%arg0: i32) -> (i32, i32) {
    %c0_i32 = arith.constant 0 : i32
    %c0_i32_0 = arith.constant 0 : i32
    %c0_i32_1 = arith.constant 0 : i32
    return %c0_i32, %c0_i32_0 : i32, i32
  }
  func.func @transform_3(%arg0: i32) -> (i32, i32, i32) {
    %c0_i32 = arith.constant 0 : i32
    %c0_i32_0 = arith.constant 0 : i32
    %c0_i32_1 = arith.constant 0 : i32
    %c0_i32_2 = arith.constant 0 : i32
    return %c0_i32, %c0_i32_0, %c0_i32_1 : i32, i32, i32
  }
  func.func @transform_4(%arg0: i32) -> (i32, i32) {
    %c0_i32 = arith.constant 0 : i32
    %c0_i32_0 = arith.constant 0 : i32
    %c0_i32_1 = arith.constant 0 : i32
    return %c0_i32, %c0_i32_0 : i32, i32
  }
  func.func @transform_5(%arg0: i32) -> (i32, i32, i32) {
    %c0_i32 = arith.constant 0 : i32
    %c0_i32_0 = arith.constant 0 : i32
    %c0_i32_1 = arith.constant 0 : i32
    return %arg0, %c0_i32, %c0_i32_0 : i32, i32, i32
  }
}

</mosaic_0001>

<bundles_post_ra>
// kernel: _lambda_.4
= control target key start
LH: loop header
LB: loop body
LE: loop exit
PB: predicated region body
PF: predicated region fallthrough
CT: control target
= control target key end

     0   :  { %s2447_s18 = smov 0   ;;  %s3038_s0 = inlined_call_operand.vmem [shape: bf16[2,8,128], index: 0, kind: input, shape index: {}]   ;;  %s3039_s1 = inlined_call_operand.vmem [shape: bf16[3,128,512], index: 1, kind: input, shape index: {}]   ;;  %s3040_s2 = inlined_call_operand.vmem [shape: f32[1,512], index: 2, kind: input, shape index: {}]   ;;  %s3041_s3 = inlined_call_operand.vmem [shape: bf16[3,128,128], index: 3, kind: input, shape index: {}]   ;;  %s3042_s4 = inlined_call_operand.vmem [shape: f32[1,128], index: 4, kind: input, shape index: {}]   ;;  %s3043_s5 = inlined_call_operand.vmem [shape: bf16[2,8,256], index: 5, kind: output, shape index: {}]  }
   0x1 LB: > { %s1783_s19 = sadd.s32 4294967295, %s2412_s18   ;;  %p1787_p0 = scmp.ge.s32.totalorder %s2412_s18, 1  ;;  %s2412_s18 = sphi %s2447_s18, %s15_s18  }
   0x2   : > { %p186_p1 = scmp.lt.s32.totalorder %s2412_s18, 3 }
   0x4   : > { %p187_p2 = pnand %p1787_p0, %p186_p1 }
   0x5   : > { %p213_p3 = scmp.lt.s32.totalorder (!%p187_p2), %s1783_s19, 1  ;;  %v223_v0 = vlaneseq (!%p187_p2)  ;;  %v2414_v1 = vmov (!%p187_p2), 0.0   ;;  %vm2415_vm0 = vmmov (!%p187_p2), 0   ;;  %vm240_vm1 = vcmask (!%p187_p2), 1043456   ;;  %v2240_v6 = vld [vmem:[%s3039_s1 + $0x104] ss:$16 sps:$4 sm:$0xff] (!%p187_p2)  }
   0x6   : > { %190 = sbr.rel (%p187_p2) target bundleno = 993 (0x3e1), region = 40  ;;  %2083 = vmatprep.subr.bf16.mxu0 (!%p187_p2), %v2414_v1  ;;  %2085 = vmatprep.mubr.msk.bf16.mxu0 (!%p187_p2), %vm2415_vm0, %v2414_v1  ;;  %v2243_v7 = vld [vmem:[%s3039_s1 + $0x10c] ss:$16 sps:$4 sm:$0xff] (!%p187_p2)   ;;  %vm236_vm4 = vcmask (!%p187_p2), 64512   ;;  %v2238_v14 = vld [vmem:[%s3039_s1 + $0x100] ss:$16 sps:$4 sm:$0xff] (!%p187_p2)  }
   0x7   : > { %v2460_v2 = vshrl.u32 (!%p187_p2), %v223_v0, 7  ;;  %v226_v3 = vand.u32 (!%p187_p2), 127, %v223_v0  ;;  %2089 = vmatprep.subr.bf16.mxu1 (!%p187_p2), %v2414_v1  ;;  %2091 = vmatprep.mubr.msk.bf16.mxu1 (!%p187_p2), %vm2415_vm0, %v2414_v1  ;;  %v2241_v15 = vld [vmem:[%s3039_s1 + $0x108] ss:$16 sps:$4 sm:$0xff] (!%p187_p2)   ;;  %v2246_v16 = vld [vmem:[%s3039_s1 + $0x124] ss:$16 sps:$4 sm:$0xff] (!%p187_p2)  }
   0x8   : > { %v2249_v17 = vld [vmem:[%s3039_s1 + $0x12c] ss:$16 sps:$4 sm:$0xff] (!%p187_p2)   ;;  %v2244_v18 = vld [vmem:[%s3039_s1 + $0x120] ss:$16 sps:$4 sm:$0xff] (!%p187_p2)   ;;  %v2247_v19 = vld [vmem:[%s3039_s1 + $0x128] ss:$16 sps:$4 sm:$0xff] (!%p187_p2)  }
   0x9   : > { %v227_v4 = vadd.s32 (!%p187_p2), 1, %v226_v3  ;;  %v1791_v5 = vadd.s32 (!%p187_p2), 4294967295, %v226_v3  ;;  %v2252_v20 = vld [vmem:[%s3039_s1 + $0x144] ss:$16 sps:$4 sm:$0xff] (!%p187_p2)   ;;  %v2255_v21 = vld [vmem:[%s3039_s1 + $0x14c] ss:$16 sps:$4 sm:$0xff] (!%p187_p2)  }
   0xa   : > { %v2416_v22 = vmov (!%p187_p2), 0   ;;  %v2250_v23 = vld [vmem:[%s3039_s1 + $0x140] ss:$16 sps:$4 sm:$0xff] (!%p187_p2)   ;;  %v2253_v24 = vld [vmem:[%s3039_s1 + $0x148] ss:$16 sps:$4 sm:$0xff] (!%p187_p2)  }
   0xb   : > { %vm228_vm2 = vcmp.eq.s32.totalorder (!%p187_p2), %v2460_v2, %v227_v4  ;;  %vm232_vm3 = vcmp.eq.s32.totalorder (!%p187_p2), %v2460_v2, %v1791_v5  ;;  %v2258_v25 = vld [vmem:[%s3039_s1 + $0x164] ss:$16 sps:$4 sm:$0xff] (!%p187_p2)   ;;  %v2261_v26 = vld [vmem:[%s3039_s1 + $0x16c] ss:$16 sps:$4 sm:$0xff] (!%p187_p2)   ;;  %v2256_v27 = vld [vmem:[%s3039_s1 + $0x160] ss:$16 sps:$4 sm:$0xff] (!%p187_p2)  }
   0xc   : > { %v229_v10 = vsel (!%p187_p2), %vm228_vm2, 1.0, %v2414_v1  ;;  %v233_v11 = vsel (!%p187_p2), %vm232_vm3, 1.0, %v2414_v1  ;;  %v2259_v28 = vld [vmem:[%s3039_s1 + $0x168] ss:$16 sps:$4 sm:$0xff] (!%p187_p2)   ;;  %v2264_v29 = vld [vmem:[%s3039_s1 + $0x184] ss:$16 sps:$4 sm:$0xff] (!%p187_p2)  }
   0xd   : > { %s3045_s19 = smov (!%p213_p3, %s1783_s19), 1  ;;  %v2483_v12 = vpack.c.bf16 %v229_v10, %v229_v10  ;;  %v2485_v13 = vpack.c.bf16 %v233_v11, %v233_v11  ;;  %v2267_v30 = vld [vmem:[%s3039_s1 + $0x18c] ss:$16 sps:$4 sm:$0xff]   ;;  %v2262_v31 = vld [vmem:[%s3039_s1 + $0x180] ss:$16 sps:$4 sm:$0xff]  }
   0xe   : > { %s1788_s20 = sshll.u32 %s3045_s19, 2  ;;  %v2265_v32 = vld [vmem:[%s3039_s1 + $0x188] ss:$16 sps:$4 sm:$0xff]   ;;  %v2270_v33 = vld [vmem:[%s3039_s1 + $0x1a4] ss:$16 sps:$4 sm:$0xff]   ;;  %s2015_s13 = sshll.u32 %s3045_s19, 3 }
   0xf   : > { %s216_s25 = scalar_lea.vmem %s3038_s0, %s1788_s20  ;;  %v2273_v34 = vld [vmem:[%s3039_s1 + $0x1ac] ss:$16 sps:$4 sm:$0xff]   ;;  %v2268_v35 = vld [vmem:[%s3039_s1 + $0x1a0] ss:$16 sps:$4 sm:$0xff]   ;;  %v2271_v36 = vld [vmem:[%s3039_s1 + $0x1a8] ss:$16 sps:$4 sm:$0xff]   ;;  %s221_s16 = scalar_lea.vmem %s3043_s5, %s2015_s13 }
  0x10   : > { %v2475_v8 = vld [vmem:[%s216_s25] sm:$0xf]  ;;  %v2276_v37 = vld [vmem:[%s3039_s1 + $0x1c4] ss:$16 sps:$4 sm:$0xff]   ;;  %v2279_v38 = vld [vmem:[%s3039_s1 + $0x1cc] ss:$16 sps:$4 sm:$0xff]  }
  0x11   : > { %v242_v9 = vsel %vm240_vm1, %v2475_v8, 0  ;;  %v2274_v39 = vld [vmem:[%s3039_s1 + $0x1c0] ss:$16 sps:$4 sm:$0xff]   ;;  %v2277_v40 = vld [vmem:[%s3039_s1 + $0x1c8] ss:$16 sps:$4 sm:$0xff]  }
  0x12   : > { %2084 = vmatpush3.bf16.msra.mxu0 %v242_v9  ;;  %2090 = vmatpush3.bf16.msra.mxu1 %v242_v9  ;;  %v2282_v41 = vld [vmem:[%s3039_s1 + $0x1e4] ss:$16 sps:$4 sm:$0xff]   ;;  %v2285_v42 = vld [vmem:[%s3039_s1 + $0x1ec] ss:$16 sps:$4 sm:$0xff]   ;;  %v2280_v43 = vld [vmem:[%s3039_s1 + $0x1e0] ss:$16 sps:$4 sm:$0xff]  }
  0x13   : > { %554 = vmatprep.subr.bf16.mxu0 %v2240_v6  ;;  %595 = vmatprep.subr.bf16.mxu1 %v2243_v7  ;;  %v2283_v44 = vld [vmem:[%s3039_s1 + $0x1e8] ss:$16 sps:$4 sm:$0xff]   ;;  %v2288_v45 = vld [vmem:[%s3039_s1 + $0x4] ss:$16 sps:$4 sm:$0xff]   ;;  %v2291_v46 = vld [vmem:[%s3039_s1 + $0xc] ss:$16 sps:$4 sm:$0xff]  }
  0x14   : > { %v2286_v47 = vld [vmem:[%s3039_s1] ss:$16 sps:$4 sm:$0xff]   ;;  %v2289_v48 = vld [vmem:[%s3039_s1 + $0x8] ss:$16 sps:$4 sm:$0xff]   ;;  %v2294_v49 = vld [vmem:[%s3039_s1 + $0x24] ss:$16 sps:$4 sm:$0xff]  }
  0x15   : > { %2086 = vmatmul.mubr.msk.bf16.vlgmr.msra.gmra.mrb[0].mxu0 %vm236_vm4, %v2483_v12  ;;  %2092 = vmatmul.mubr.msk.bf16.vlgmr.msra.gmra.mrb[0].mxu1 %vm236_vm4, %v2485_v13  ;;  %v2297_v50 = vld [vmem:[%s3039_s1 + $0x2c] ss:$16 sps:$4 sm:$0xff]   ;;  %v2292_v51 = vld [vmem:[%s3039_s1 + $0x20] ss:$16 sps:$4 sm:$0xff]   ;;  %v2295_v52 = vld [vmem:[%s3039_s1 + $0x28] ss:$16 sps:$4 sm:$0xff]  }
  0x16   : > { %555 = vmatpush1.bf16.msra.mxu0 %v2238_v14  ;;  %596 = vmatpush1.bf16.msra.mxu1 %v2241_v15  ;;  %v2300_v53 = vld [vmem:[%s3039_s1 + $0x44] ss:$16 sps:$4 sm:$0xff]   ;;  %v2303_v54 = vld [vmem:[%s3039_s1 + $0x4c] ss:$16 sps:$4 sm:$0xff]   ;;  %v2298_v55 = vld [vmem:[%s3039_s1 + $0x40] ss:$16 sps:$4 sm:$0xff]  }
  0x17   : > { %556 = vmatprep.subr.bf16.mxu0 %v2246_v16  ;;  %597 = vmatprep.subr.bf16.mxu1 %v2249_v17  ;;  %v2301_v56 = vld [vmem:[%s3039_s1 + $0x48] ss:$16 sps:$4 sm:$0xff]   ;;  %v2306_v57 = vld [vmem:[%s3039_s1 + $0x64] ss:$16 sps:$4 sm:$0xff]   ;;  %v2309_v58 = vld [vmem:[%s3039_s1 + $0x6c] ss:$16 sps:$4 sm:$0xff]  }
  0x18   : > { %586 = vmatprep.mubr.bf16.mxu0 %v2416_v22  ;;  %627 = vmatprep.mubr.bf16.mxu1 %v2416_v22  ;;  %v2304_v59 = vld [vmem:[%s3039_s1 + $0x60] ss:$16 sps:$4 sm:$0xff]   ;;  %v2307_v60 = vld [vmem:[%s3039_s1 + $0x68] ss:$16 sps:$4 sm:$0xff]   ;;  %v2312_v61 = vld [vmem:[%s3039_s1 + $0x84] ss:$16 sps:$4 sm:$0xff]  }
  0x19   : > { %v2315_v62 = vld [vmem:[%s3039_s1 + $0x8c] ss:$16 sps:$4 sm:$0xff]   ;;  %v2310_v63 = vld [vmem:[%s3039_s1 + $0x80] ss:$16 sps:$4 sm:$0xff]   ;;  %v2313_v0 = vld [vmem:[%s3039_s1 + $0x88] ss:$16 sps:$4 sm:$0xff]  }
  0x1a   : > { %557 = vmatpush1.bf16.msra.mxu0 %v2244_v18  ;;  %598 = vmatpush1.bf16.msra.mxu1 %v2247_v19  ;;  %v2318_v3 = vld [vmem:[%s3039_s1 + $0xa4] ss:$16 sps:$4 sm:$0xff]   ;;  %v2321_v4 = vld [vmem:[%s3039_s1 + $0xac] ss:$16 sps:$4 sm:$0xff]   ;;  %v2316_v5 = vld [vmem:[%s3039_s1 + $0xa0] ss:$16 sps:$4 sm:$0xff]  }
  0x1b   : > { %558 = vmatprep.subr.bf16.mxu0 %v2252_v20  ;;  %599 = vmatprep.subr.bf16.mxu1 %v2255_v21  ;;  %v2319_v6 = vld [vmem:[%s3039_s1 + $0xa8] ss:$16 sps:$4 sm:$0xff]   ;;  %v2324_v7 = vld [vmem:[%s3039_s1 + $0xc4] ss:$16 sps:$4 sm:$0xff]   ;;  %v2322_v9 = vld [vmem:[%s3039_s1 + $0xc0] ss:$16 sps:$4 sm:$0xff]  }
  0x1c   : > { %v2325_v10 = vld [vmem:[%s3039_s1 + $0xc8] ss:$16 sps:$4 sm:$0xff]   ;;  %v2330_v11 = vld [vmem:[%s3039_s1 + $0xe4] ss:$16 sps:$4 sm:$0xff]   ;;  %v2333_v14 = vld [vmem:[%s3039_s1 + $0xec] ss:$16 sps:$4 sm:$0xff]  }
  0x1d   : > { %v2328_v15 = vld [vmem:[%s3039_s1 + $0xe0] ss:$16 sps:$4 sm:$0xff]   ;;  %v2331_v16 = vld [vmem:[%s3039_s1 + $0xe8] ss:$16 sps:$4 sm:$0xff]   ;;  %v2336_v17 = vld [vmem:[%s3039_s1 + $0x204] ss:$16 sps:$4 sm:$0xff]  }
  0x1e   : > { %559 = vmatpush1.bf16.msra.mxu0 %v2250_v23  ;;  %600 = vmatpush1.bf16.msra.mxu1 %v2253_v24  ;;  %v2339_v18 = vld [vmem:[%s3039_s1 + $0x20c] ss:$16 sps:$4 sm:$0xff]   ;;  %v2334_v20 = vld [vmem:[%s3039_s1 + $0x200] ss:$16 sps:$4 sm:$0xff]   ;;  %v2337_v21 = vld [vmem:[%s3039_s1 + $0x208] ss:$16 sps:$4 sm:$0xff]  }
  0x1f   : > { %560 = vmatprep.subr.bf16.mxu0 %v2258_v25  ;;  %601 = vmatprep.subr.bf16.mxu1 %v2261_v26  ;;  %v2342_v26 = vld [vmem:[%s3039_s1 + $0x224] ss:$16 sps:$4 sm:$0xff]  }
  0x22   : > { %561 = vmatpush1.bf16.msra.mxu0 %v2256_v27  ;;  %602 = vmatpush1.bf16.msra.mxu1 %v2259_v28  ;;  %v2345_v27 = vld [vmem:[%s3039_s1 + $0x22c] ss:$16 sps:$4 sm:$0xff]  }
  0x23   : > { %562 = vmatprep.subr.bf16.mxu0 %v2264_v29  ;;  %603 = vmatprep.subr.bf16.mxu1 %v2267_v30 }
  0x26   : > { %563 = vmatpush1.bf16.msra.mxu0 %v2262_v31  ;;  %604 = vmatpush1.bf16.msra.mxu1 %v2265_v32 }
  0x27   : > { %564 = vmatprep.subr.bf16.mxu0 %v2270_v33  ;;  %605 = vmatprep.subr.bf16.mxu1 %v2273_v34  ;;  %v2340_v33 = vld [vmem:[%s3039_s1 + $0x220] ss:$16 sps:$4 sm:$0xff]   ;;  %v2343_v34 = vld [vmem:[%s3039_s1 + $0x228] ss:$16 sps:$4 sm:$0xff]  }
  0x2a   : > { %565 = vmatpush1.bf16.msra.mxu0 %v2268_v35  ;;  %606 = vmatpush1.bf16.msra.mxu1 %v2271_v36  ;;  %v2348_v35 = vld [vmem:[%s3039_s1 + $0x244] ss:$16 sps:$4 sm:$0xff]   ;;  %v2351_v36 = vld [vmem:[%s3039_s1 + $0x24c] ss:$16 sps:$4 sm:$0xff]  }
  0x2b   : > { %566 = vmatprep.subr.bf16.mxu0 %v2276_v37  ;;  %607 = vmatprep.subr.bf16.mxu1 %v2279_v38  ;;  %v2346_v37 = vld [vmem:[%s3039_s1 + $0x240] ss:$16 sps:$4 sm:$0xff]   ;;  %v2349_v38 = vld [vmem:[%s3039_s1 + $0x248] ss:$16 sps:$4 sm:$0xff]  }
  0x2e   : > { %567 = vmatpush1.bf16.msra.mxu0 %v2274_v39  ;;  %608 = vmatpush1.bf16.msra.mxu1 %v2277_v40  ;;  %v2354_v39 = vld [vmem:[%s3039_s1 + $0x264] ss:$16 sps:$4 sm:$0xff]   ;;  %v2352_v40 = vld [vmem:[%s3039_s1 + $0x260] ss:$16 sps:$4 sm:$0xff]  }
  0x2f   : > { %568 = vmatprep.subr.bf16.mxu0 %v2282_v41  ;;  %609 = vmatprep.subr.bf16.mxu1 %v2285_v42  ;;  %v2355_v41 = vld [vmem:[%s3039_s1 + $0x268] ss:$16 sps:$4 sm:$0xff]   ;;  %v2360_v42 = vld [vmem:[%s3039_s1 + $0x284] ss:$16 sps:$4 sm:$0xff]  }
  0x32   : > { %569 = vmatpush1.bf16.msra.mxu0 %v2280_v43  ;;  %610 = vmatpush1.bf16.msra.mxu1 %v2283_v44  ;;  %v2363_v43 = vld [vmem:[%s3039_s1 + $0x28c] ss:$16 sps:$4 sm:$0xff]   ;;  %v2358_v44 = vld [vmem:[%s3039_s1 + $0x280] ss:$16 sps:$4 sm:$0xff]  }
  0x33   : > { %796 = vmatprep.subr.bf16.mxu0 %v2288_v45  ;;  %837 = vmatprep.subr.bf16.mxu1 %v2291_v46  ;;  %v2361_v45 = vld [vmem:[%s3039_s1 + $0x288] ss:$16 sps:$4 sm:$0xff]   ;;  %v2366_v46 = vld [vmem:[%s3039_s1 + $0x2a4] ss:$16 sps:$4 sm:$0xff]  }
  0x35   : > { %587 = vmatmul.mubr.bf16.vlgmr.msra.gmra.mrb[4].mxu0 %v2475_v8  ;;  %628 = vmatmul.mubr.bf16.vlgmr.msra.gmra.mrb[4].mxu1 %v2475_v8  ;;  %v2327_v8 = vld [vmem:[%s3039_s1 + $0xcc] ss:$16 sps:$4 sm:$0xff]  }
  0x36   : > { %797 = vmatpush1.bf16.msra.mxu0 %v2286_v47  ;;  %838 = vmatpush1.bf16.msra.mxu1 %v2289_v48  ;;  %v2369_v47 = vld [vmem:[%s3039_s1 + $0x2ac] ss:$16 sps:$4 sm:$0xff]   ;;  %v2364_v48 = vld [vmem:[%s3039_s1 + $0x2a0] ss:$16 sps:$4 sm:$0xff]  }
  0x37   : > { %798 = vmatprep.subr.bf16.mxu0 %v2294_v49  ;;  %839 = vmatprep.subr.bf16.mxu1 %v2297_v50  ;;  %v2367_v49 = vld [vmem:[%s3039_s1 + $0x2a8] ss:$16 sps:$4 sm:$0xff]   ;;  %v2372_v50 = vld [vmem:[%s3039_s1 + $0x2c4] ss:$16 sps:$4 sm:$0xff]  }
  0x38   : > { %828 = vmatprep.mubr.bf16.mxu0 %v2416_v22  ;;  %869 = vmatprep.mubr.bf16.mxu1 %v2416_v22 }
  0x3a   : > { %799 = vmatpush1.bf16.msra.mxu0 %v2292_v51  ;;  %840 = vmatpush1.bf16.msra.mxu1 %v2295_v52  ;;  %v2375_v51 = vld [vmem:[%s3039_s1 + $0x2cc] ss:$16 sps:$4 sm:$0xff]   ;;  %v2370_v52 = vld [vmem:[%s3039_s1 + $0x2c0] ss:$16 sps:$4 sm:$0xff]  }
  0x3b   : > { %800 = vmatprep.subr.bf16.mxu0 %v2300_v53  ;;  %841 = vmatprep.subr.bf16.mxu1 %v2303_v54  ;;  %v2373_v53 = vld [vmem:[%s3039_s1 + $0x2c8] ss:$16 sps:$4 sm:$0xff]   ;;  %v2378_v54 = vld [vmem:[%s3039_s1 + $0x2e4] ss:$16 sps:$4 sm:$0xff]  }
  0x3e   : > { %801 = vmatpush1.bf16.msra.mxu0 %v2298_v55  ;;  %842 = vmatpush1.bf16.msra.mxu1 %v2301_v56  ;;  %v2381_v55 = vld [vmem:[%s3039_s1 + $0x2ec] ss:$16 sps:$4 sm:$0xff]   ;;  %v2376_v56 = vld [vmem:[%s3039_s1 + $0x2e0] ss:$16 sps:$4 sm:$0xff]  }
  0x3f   : > { %802 = vmatprep.subr.bf16.mxu0 %v2306_v57  ;;  %843 = vmatprep.subr.bf16.mxu1 %v2309_v58  ;;  %v2379_v57 = vld [vmem:[%s3039_s1 + $0x2e8] ss:$16 sps:$4 sm:$0xff]  }
  0x42   : > { %803 = vmatpush1.bf16.msra.mxu0 %v2304_v59  ;;  %844 = vmatpush1.bf16.msra.mxu1 %v2307_v60 }
  0x43   : > { %804 = vmatprep.subr.bf16.mxu0 %v2312_v61  ;;  %845 = vmatprep.subr.bf16.mxu1 %v2315_v62 }
  0x46   : > { %805 = vmatpush1.bf16.msra.mxu0 %v2310_v63  ;;  %846 = vmatpush1.bf16.msra.mxu1 %v2313_v0 }
  0x47   : > { %806 = vmatprep.subr.bf16.mxu0 %v2318_v3  ;;  %847 = vmatprep.subr.bf16.mxu1 %v2321_v4 }
  0x4a   : > { %807 = vmatpush1.bf16.msra.mxu0 %v2316_v5  ;;  %848 = vmatpush1.bf16.msra.mxu1 %v2319_v6 }
  0x4b   : > { %808 = vmatprep.subr.bf16.mxu0 %v2324_v7  ;;  %849 = vmatprep.subr.bf16.mxu1 %v2327_v8 }
  0x4e   : > { %809 = vmatpush1.bf16.msra.mxu0 %v2322_v9  ;;  %850 = vmatpush1.bf16.msra.mxu1 %v2325_v10 }
  0x4f   : > { %810 = vmatprep.subr.bf16.mxu0 %v2330_v11  ;;  %851 = vmatprep.subr.bf16.mxu1 %v2333_v14 }
  0x52   : > { %811 = vmatpush1.bf16.msra.mxu0 %v2328_v15  ;;  %852 = vmatpush1.bf16.msra.mxu1 %v2331_v16 }
  0x53   : > { %1071 = vmatprep.subr.bf16.mxu0 %v2336_v17  ;;  %1112 = vmatprep.subr.bf16.mxu1 %v2339_v18 }
  0xe8   : > { %v278_v19 = vpop.f32.mrb[0].mxu0  ;;  %v2695_v23 = vpop.f32.mrb[0].mxu1 }
  0xe9   : > { %v284_v24 = vpack.c.bf16 %v278_v19, %v278_v19  ;;  %v2087_v25 = vpop.f32.mrb[1].mxu0  ;;  %v2093_v28 = vpop.f32.mrb[1].mxu1  ;;  %v328_v58 = vpack.c.bf16 %v2695_v23, %v2695_v23  ;;  %v1161_v19 = vsub.s32 0, %v2460_v2  ;;  %v1165_v23 = vsub.s32 1, %v2460_v2 }
  0xea   : > { %v281_v29 = vpop.f32.mrb[2].mxu0  ;;  %v325_v30 = vpop.f32.mrb[2].mxu1 }
  0xeb   : > { %v2088_v31 = vpop.f32.mrb[3].mxu0  ;;  %829 = vmatmul.mubr.bf16.vlgmr.msra.gmra.mrb[8].mxu0 %v284_v24  ;;  %870 = vmatmul.mubr.bf16.vlgmr.msra.gmra.mrb[8].mxu1 %v284_v24  ;;  %v2094_v32 = vpop.f32.mrb[3].mxu1  ;;  %v1173_v24 = vsub.s32 3, %v2460_v2 }
  0xec   : > { %1072 = vmatpush1.bf16.msra.mxu0 %v2334_v20  ;;  %1113 = vmatpush1.bf16.msra.mxu1 %v2337_v21  ;;  %v1169_v20 = vsub.s32 2, %v2460_v2  ;;  %v1157_v21 = vld [vmem:[%s3040_s2] sm:$0xf] }
  0xed   : > { %1073 = vmatprep.subr.bf16.mxu0 %v2342_v26  ;;  %1114 = vmatprep.subr.bf16.mxu1 %v2345_v27  ;;  %v1162_v25 = vrot.slane %v1157_v21, %v1161_v19  ;;  %v1166_v29 = vrot.slane %v1157_v21, %v1165_v23  ;;  %v1174_v30 = vrot.slane %v1157_v21, %v1173_v24 }
  0xee   : > { %1103 = vmatprep.mubr.bf16.mxu0 %v2416_v22  ;;  %1144 = vmatprep.mubr.bf16.mxu1 %v2416_v22  ;;  %v2357_v22 = vld [vmem:[%s3039_s1 + $0x26c] ss:$16 sps:$4 sm:$0xff]   ;;  %v1170_v26 = vrot.slane %v1157_v21, %v1169_v20 }
  0xf0   : > { %1074 = vmatpush1.bf16.msra.mxu0 %v2340_v33  ;;  %1115 = vmatpush1.bf16.msra.mxu1 %v2343_v34 }
  0xf1   : > { %1075 = vmatprep.subr.bf16.mxu0 %v2348_v35  ;;  %1116 = vmatprep.subr.bf16.mxu1 %v2351_v36 }
  0xf4   : > { %1076 = vmatpush1.bf16.msra.mxu0 %v2346_v37  ;;  %1117 = vmatpush1.bf16.msra.mxu1 %v2349_v38 }
  0xf5   : > { %1077 = vmatprep.subr.bf16.mxu0 %v2354_v39  ;;  %1118 = vmatprep.subr.bf16.mxu1 %v2357_v22 }
  0xf8   : > { %1078 = vmatpush1.bf16.msra.mxu0 %v2352_v40  ;;  %1119 = vmatpush1.bf16.msra.mxu1 %v2355_v41 }
  0xf9   : > { %1079 = vmatprep.subr.bf16.mxu0 %v2360_v42  ;;  %1120 = vmatprep.subr.bf16.mxu1 %v2363_v43 }
  0xfc   : > { %1080 = vmatpush1.bf16.msra.mxu0 %v2358_v44  ;;  %1121 = vmatpush1.bf16.msra.mxu1 %v2361_v45 }
  0xfd   : > { %1081 = vmatprep.subr.bf16.mxu0 %v2366_v46  ;;  %1122 = vmatprep.subr.bf16.mxu1 %v2369_v47 }
 0x100   : > { %1082 = vmatpush1.bf16.msra.mxu0 %v2364_v48  ;;  %1123 = vmatpush1.bf16.msra.mxu1 %v2367_v49  ;;  %v2813_v49 = vld [vmem:[%s3041_s3 + $0x40] sm:$0xff]  }
 0x101   : > { %1083 = vmatprep.subr.bf16.mxu0 %v2372_v50  ;;  %1124 = vmatprep.subr.bf16.mxu1 %v2375_v51  ;;  %v2820_v50 = vld [vmem:[%s3041_s3] sm:$0xff]   ;;  %v2831_v51 = vld [vmem:[%s3041_s3 + $0x48] sm:$0xff]  }
 0x104   : > { %1084 = vmatpush1.bf16.msra.mxu0 %v2370_v52  ;;  %1125 = vmatpush1.bf16.msra.mxu1 %v2373_v53  ;;  %v2856_v52 = vld [vmem:[%s3041_s3 + $0x10] sm:$0xff]   ;;  %v2863_v53 = vld [vmem:[%s3041_s3 + $0x58] sm:$0xff]  }
 0x105   : > { %1085 = vmatprep.subr.bf16.mxu0 %v2378_v54  ;;  %1126 = vmatprep.subr.bf16.mxu1 %v2381_v55  ;;  %v2401_v54 = vld [vmem:[%s3041_s3 + $0x18] sm:$0xff]   ;;  %v2874_v55 = vld [vmem:[%s3041_s3 + $0x60] sm:$0xff]  }
 0x108   : > { %1086 = vmatpush1.bf16.msra.mxu0 %v2376_v56  ;;  %1127 = vmatpush1.bf16.msra.mxu1 %v2379_v57  ;;  %v588_v59 = vpop.f32.mrb[4].mxu0  ;;  %v629_v60 = vpop.f32.mrb[4].mxu1  ;;  %v2402_v56 = vld [vmem:[%s3041_s3 + $0x20] sm:$0xff]   ;;  %v2885_v57 = vld [vmem:[%s3041_s3 + $0x68] sm:$0xff]  }
 0x109   : > { %v590_v61 = vpop.f32.mrb[5].mxu0  ;;  %v631_v62 = vpop.f32.mrb[5].mxu1  ;;  %2101 = vmatprep.subr.bf16.mxu1 %v2414_v1  ;;  %2095 = vmatprep.subr.bf16.mxu0 %v2414_v1 }
 0x10a   : > { %v592_v63 = vpop.f32.mrb[6].mxu0  ;;  %v633_v0 = vpop.f32.mrb[6].mxu1 }
 0x10b   : > { %1104 = vmatmul.mubr.bf16.vlgmr.msra.gmra.mrb[12].mxu0 %v328_v58  ;;  %1145 = vmatmul.mubr.bf16.vlgmr.msra.gmra.mrb[12].mxu1 %v328_v58  ;;  %v593_v3 = vpop.f32.mrb[7].mxu0  ;;  %v634_v4 = vpop.f32.mrb[7].mxu1  ;;  %v2403_v58 = vld [vmem:[%s3041_s3 + $0x28] sm:$0xff]   ;;  %v2918_v63 = vld [vmem:[%s3041_s3 + $0x80] sm:$0xff]  }
 0x10c   : > { %2097 = vmatprep.mubr.msk.bf16.mxu0 %vm2415_vm0, %v2414_v1  ;;  %2103 = vmatprep.mubr.msk.bf16.mxu1 %vm2415_vm0, %v2414_v1  ;;  %v2927_v0 = vld [vmem:[%s3041_s3 + $0x88] sm:$0xff]   ;;  %v2936_v3 = vld [vmem:[%s3041_s3 + $0x90] sm:$0xff]   ;;  %v2943_v4 = vld [vmem:[%s3041_s3 + $0x98] sm:$0xff]  }
 0x1be   : > { %v830_v5 = vpop.f32.mrb[8].mxu0  ;;  %v871_v6 = vpop.f32.mrb[8].mxu1 }
 0x1bf   : > { %v831_v7 = vadd.f32 %v830_v5, %v588_v59  ;;  %v872_v8 = vadd.f32 %v871_v6, %v629_v60  ;;  %v832_v9 = vpop.f32.mrb[9].mxu0  ;;  %v873_v10 = vpop.f32.mrb[9].mxu1  ;;  %v2896_v59 = vld [vmem:[%s3041_s3 + $0x70] sm:$0xff]   ;;  %v2950_v5 = vld [vmem:[%s3041_s3 + $0xa0] sm:$0xff]   ;;  %v2957_v6 = vld [vmem:[%s3041_s3 + $0xa8] sm:$0xff]  }
 0x1c0   : > { %v833_v11 = vadd.f32 %v832_v9, %v590_v61  ;;  %v874_v14 = vadd.f32 %v873_v10, %v631_v62  ;;  %v834_v15 = vpop.f32.mrb[10].mxu0  ;;  %v875_v16 = vpop.f32.mrb[10].mxu1  ;;  %v2404_v60 = vld [vmem:[%s3041_s3 + $0x30] sm:$0xff]   ;;  %v2907_v61 = vld [vmem:[%s3041_s3 + $0x78] sm:$0xff]  }
 0x1c1   : > { %v835_v17 = vpop.f32.mrb[11].mxu0  ;;  %v876_v18 = vpop.f32.mrb[11].mxu1  ;;  %v2405_v62 = vld [vmem:[%s3041_s3 + $0x38] sm:$0xff]  }
 0x1de   : > { %v1105_v27 = vpop.f32.mrb[12].mxu0  ;;  %v1146_v28 = vpop.f32.mrb[12].mxu1 }
 0x1df   : > { %v1153_v31 = vadd.f32 %v1105_v27, %v831_v7  ;;  %v1155_v32 = vadd.f32 %v1146_v28, %v872_v8  ;;  %v1107_v33 = vpop.f32.mrb[13].mxu0  ;;  %v1148_v34 = vpop.f32.mrb[13].mxu1  ;;  %v2964_v7 = vld [vmem:[%s3041_s3 + $0xb0] sm:$0xff]   ;;  %v2971_v8 = vld [vmem:[%s3041_s3 + $0xb8] sm:$0xff]  }
 0x1e0   : > { %v1154_v35 = vadd.f32 %v1107_v33, %v833_v11  ;;  %v1156_v36 = vadd.f32 %v1148_v34, %v874_v14  ;;  %v1109_v37 = vpop.f32.mrb[14].mxu0  ;;  %v1150_v38 = vpop.f32.mrb[14].mxu1 }
 0x1e1   : > { %v1179_v39 = vadd.f32 %v1162_v25, %v1153_v31  ;;  %v2798_v22 = vadd.f32 %v1170_v26, %v1155_v32  ;;  %v1110_v40 = vpop.f32.mrb[15].mxu0  ;;  %v1151_v41 = vpop.f32.mrb[15].mxu1 }
 0x1e2   : > { %v1180_v2 = vadd.f32 %v1166_v29, %v1154_v35  ;;  %v2800_v42 = vadd.f32 %v1174_v30, %v1156_v36 }
 0x1e3   : > { %v1183_v43 = vmax.f32 %v1179_v39, 0.0 }
 0x1e4   : > { %v1184_v44 = vmax.f32 %v1180_v2, 0.0 }
 0x1e5   : > { %v2802_v45 = vpack.c.bf16 %v1183_v43, %v1183_v43 }
 0x1e6   : > { %v2804_v46 = vpack.c.bf16 %v1184_v44, %v1184_v44 }
 0x1e7   : > { %v1232_v47 = vsel %vm240_vm1, %v2802_v45, 0 }
 0x1e8   : > { %2102 = vmatpush3.bf16.msra.mxu1 %v1232_v47  ;;  %v1188_v48 = vsel %vm240_vm1, %v2804_v46, 0 }
 0x1e9   : > { %2096 = vmatpush3.bf16.msra.mxu0 %v1188_v48  ;;  %2127 = vmatprep.subr.bf16.mxu1 %v2414_v1 }
 0x1ea   : > { %2107 = vmatprep.subr.bf16.mxu0 %v2414_v1 }
 0x1eb   : > { %2104 = vmatmul.mubr.msk.bf16.vlgmr.msra.gmra.mrb[16].mxu1 %vm236_vm4, %v2485_v13  ;;  %v2839_v13 = vld [vmem:[%s3041_s3 + $0x8] sm:$0xff]  }
 0x1ec   : > { %2098 = vmatmul.mubr.msk.bf16.vlgmr.msra.gmra.mrb[16].mxu0 %vm236_vm4, %v2483_v12  ;;  %2128 = vmatpush3.bf16.msra.mxu1 %v2820_v50  ;;  %v2849_v12 = vld [vmem:[%s3041_s3 + $0x50] sm:$0xff]  }
 0x1ed   : > { %2108 = vmatpush3.bf16.msra.mxu0 %v2813_v49  ;;  %2123 = vmatprep.mubr.msk.bf16.mxu0 %vm2415_vm0, %v2414_v1 }
 0x1ee   : > { %2109 = vmatprep.subr.bf16.mxu0 %v2414_v1  ;;  %2129 = vmatprep.subr.bf16.mxu1 %v2414_v1 }
 0x1ef   : > { %2143 = vmatprep.mubr.msk.bf16.mxu1 %vm2415_vm0, %v2414_v1 }
 0x1f0   : > { %2130 = vmatpush3.bf16.msra.mxu1 %v2839_v13 }
 0x1f1   : > { %2110 = vmatpush3.bf16.msra.mxu0 %v2831_v51  ;;  %2131 = vmatprep.subr.bf16.mxu1 %v2414_v1 }
 0x1f2   : > { %2111 = vmatprep.subr.bf16.mxu0 %v2414_v1 }
 0x1f4   : > { %2132 = vmatpush3.bf16.msra.mxu1 %v2856_v52 }
 0x1f5   : > { %2112 = vmatpush3.bf16.msra.mxu0 %v2849_v12  ;;  %2133 = vmatprep.subr.bf16.mxu1 %v2414_v1 }
 0x1f6   : > { %2113 = vmatprep.subr.bf16.mxu0 %v2414_v1 }
 0x1f8   : > { %2134 = vmatpush3.bf16.msra.mxu1 %v2401_v54 }
 0x1f9   : > { %2114 = vmatpush3.bf16.msra.mxu0 %v2863_v53  ;;  %2135 = vmatprep.subr.bf16.mxu1 %v2414_v1 }
 0x1fa   : > { %2115 = vmatprep.subr.bf16.mxu0 %v2414_v1 }
 0x1fc   : > { %2136 = vmatpush3.bf16.msra.mxu1 %v2402_v56 }
 0x1fd   : > { %2116 = vmatpush3.bf16.msra.mxu0 %v2874_v55  ;;  %2137 = vmatprep.subr.bf16.mxu1 %v2414_v1 }
 0x1fe   : > { %2117 = vmatprep.subr.bf16.mxu0 %v2414_v1 }
 0x200   : > { %2138 = vmatpush3.bf16.msra.mxu1 %v2403_v58 }
 0x201   : > { %2118 = vmatpush3.bf16.msra.mxu0 %v2885_v57  ;;  %2139 = vmatprep.subr.bf16.mxu1 %v2414_v1 }
 0x202   : > { %2119 = vmatprep.subr.bf16.mxu0 %v2414_v1 }
 0x204   : > { %2140 = vmatpush3.bf16.msra.mxu1 %v2404_v60 }
 0x205   : > { %2120 = vmatpush3.bf16.msra.mxu0 %v2896_v59  ;;  %2141 = vmatprep.subr.bf16.mxu1 %v2414_v1 }
 0x206   : > { %2121 = vmatprep.subr.bf16.mxu0 %v2414_v1 }
 0x208   : > { %2142 = vmatpush3.bf16.msra.mxu1 %v2405_v62 }
 0x209   : > { %2122 = vmatpush3.bf16.msra.mxu0 %v2907_v61  ;;  %2167 = vmatprep.subr.bf16.mxu1 %v2414_v1 }
 0x20a   : > { %2147 = vmatprep.subr.bf16.mxu0 %v2414_v1 }
 0x20c   : > { %2124 = vmatmul.mubr.bf16.vlgmr.msra.gmra.mrb[20].mxu0 %v2802_v45 }
 0x20d   : > { %2148 = vmatpush3.bf16.msra.mxu0 %v2918_v63  ;;  %2163 = vmatprep.mubr.msk.bf16.mxu0 %vm2415_vm0, %v2414_v1 }
 0x20e   : > { %2149 = vmatprep.subr.bf16.mxu0 %v2414_v1 }
 0x211   : > { %2150 = vmatpush3.bf16.msra.mxu0 %v2927_v0 }
 0x212   : > { %2151 = vmatprep.subr.bf16.mxu0 %v2414_v1 }
 0x215   : > { %2152 = vmatpush3.bf16.msra.mxu0 %v2936_v3 }
 0x216   : > { %2153 = vmatprep.subr.bf16.mxu0 %v2414_v1 }
 0x219   : > { %2154 = vmatpush3.bf16.msra.mxu0 %v2943_v4 }
 0x21a   : > { %2155 = vmatprep.subr.bf16.mxu0 %v2414_v1 }
 0x21d   : > { %2156 = vmatpush3.bf16.msra.mxu0 %v2950_v5 }
 0x21e   : > { %2157 = vmatprep.subr.bf16.mxu0 %v2414_v1 }
 0x221   : > { %2158 = vmatpush3.bf16.msra.mxu0 %v2957_v6 }
 0x222   : > { %2159 = vmatprep.subr.bf16.mxu0 %v2414_v1 }
 0x225   : > { %2160 = vmatpush3.bf16.msra.mxu0 %v2964_v7 }
 0x226   : > { %2161 = vmatprep.subr.bf16.mxu0 %v2414_v1 }
 0x229   : > { %2162 = vmatpush3.bf16.msra.mxu0 %v2971_v8 }
 0x22a   : > { %2187 = vmatprep.subr.bf16.mxu0 %v2414_v1 }
 0x22c   : > { %2164 = vmatmul.mubr.bf16.vlgmr.msra.gmra.mrb[24].mxu0 %v2804_v46 }
 0x22d   : > { %2188 = vmatpush3.bf16.msra.mxu0 %v2820_v50  ;;  %2203 = vmatprep.mubr.msk.bf16.mxu0 %vm2415_vm0, %v2414_v1 }
 0x22e   : > { %2189 = vmatprep.subr.bf16.mxu0 %v2414_v1 }
 0x231   : > { %2190 = vmatpush3.bf16.msra.mxu0 %v2839_v13 }
 0x232   : > { %2191 = vmatprep.subr.bf16.mxu0 %v2414_v1 }
 0x235   : > { %2192 = vmatpush3.bf16.msra.mxu0 %v2856_v52 }
 0x236   : > { %2193 = vmatprep.subr.bf16.mxu0 %v2414_v1 }
 0x239   : > { %2194 = vmatpush3.bf16.msra.mxu0 %v2401_v54 }
 0x23a   : > { %2195 = vmatprep.subr.bf16.mxu0 %v2414_v1 }
 0x23d   : > { %2196 = vmatpush3.bf16.msra.mxu0 %v2402_v56 }
 0x23e   : > { %2197 = vmatprep.subr.bf16.mxu0 %v2414_v1 }
 0x241   : > { %2198 = vmatpush3.bf16.msra.mxu0 %v2403_v58 }
 0x242   : > { %2199 = vmatprep.subr.bf16.mxu0 %v2414_v1 }
 0x245   : > { %2200 = vmatpush3.bf16.msra.mxu0 %v2404_v60 }
 0x246   : > { %2201 = vmatprep.subr.bf16.mxu0 %v2414_v1 }
 0x249   : > { %2202 = vmatpush3.bf16.msra.mxu0 %v2405_v62 }
 0x24c   : > { %2204 = vmatmul.mubr.bf16.vlgmr.msra.gmra.mrb[28].mxu0 %v2802_v45 }
 0x2be   : > { %v1268_v9 = vpop.f32.mrb[16].mxu1 }
 0x2bf   : > { %v1224_v10 = vpop.f32.mrb[16].mxu0  ;;  %v2105_v11 = vpop.f32.mrb[17].mxu1  ;;  %v1274_v25 = vpack.c.bf16 %v1268_v9, %v1268_v9 }
 0x2c0   : > { %v1230_v14 = vpack.c.bf16 %v1224_v10, %v1224_v10  ;;  %v2099_v15 = vpop.f32.mrb[17].mxu0  ;;  %v1271_v16 = vpop.f32.mrb[18].mxu1 }
 0x2c1   : > { %v1227_v17 = vpop.f32.mrb[18].mxu0  ;;  %v2106_v18 = vpop.f32.mrb[19].mxu1 }
 0x2c2   : > { %2144 = vmatmul.mubr.bf16.vlgmr.msra.gmra.mrb[20].mxu1 %v1230_v14  ;;  %v2100_v19 = vpop.f32.mrb[19].mxu0 }
 0x2c3   : > { %2168 = vmatpush3.bf16.msra.mxu1 %v2813_v49  ;;  %2183 = vmatprep.mubr.msk.bf16.mxu1 %vm2415_vm0, %v2414_v1 }
 0x2c4   : > { %2169 = vmatprep.subr.bf16.mxu1 %v2414_v1 }
 0x2c7   : > { %2170 = vmatpush3.bf16.msra.mxu1 %v2831_v51 }
 0x2c8   : > { %2171 = vmatprep.subr.bf16.mxu1 %v2414_v1 }
 0x2cb   : > { %2172 = vmatpush3.bf16.msra.mxu1 %v2849_v12 }
 0x2cc   : > { %2173 = vmatprep.subr.bf16.mxu1 %v2414_v1 }
 0x2cf   : > { %2174 = vmatpush3.bf16.msra.mxu1 %v2863_v53 }
 0x2d0   : > { %2175 = vmatprep.subr.bf16.mxu1 %v2414_v1 }
 0x2d3   : > { %2176 = vmatpush3.bf16.msra.mxu1 %v2874_v55 }
 0x2d4   : > { %2177 = vmatprep.subr.bf16.mxu1 %v2414_v1 }
 0x2d7   : > { %2178 = vmatpush3.bf16.msra.mxu1 %v2885_v57 }
 0x2d8   : > { %2179 = vmatprep.subr.bf16.mxu1 %v2414_v1 }
 0x2db   : > { %2180 = vmatpush3.bf16.msra.mxu1 %v2896_v59 }
 0x2dc   : > { %2181 = vmatprep.subr.bf16.mxu1 %v2414_v1 }
 0x2df   : > { %2182 = vmatpush3.bf16.msra.mxu1 %v2907_v61  ;;  %v1390_v20 = vpop.f32.mrb[20].mxu0 }
 0x2e0   : > { %v2125_v21 = vpop.f32.mrb[21].mxu0  ;;  %2207 = vmatprep.subr.bf16.mxu1 %v2414_v1 }
 0x2e1   : > { %v1393_v23 = vpop.f32.mrb[22].mxu0 }
 0x2e2   : > { %2184 = vmatmul.mubr.bf16.vlgmr.msra.gmra.mrb[24].mxu1 %v2804_v46  ;;  %v2126_v24 = vpop.f32.mrb[23].mxu0 }
 0x2e3   : > { %2208 = vmatpush3.bf16.msra.mxu1 %v2918_v63  ;;  %2223 = vmatprep.mubr.msk.bf16.mxu1 %vm2415_vm0, %v2414_v1 }
 0x2e4   : > { %2209 = vmatprep.subr.bf16.mxu1 %v2414_v1 }
 0x2e7   : > { %2210 = vmatpush3.bf16.msra.mxu1 %v2927_v0 }
 0x2e8   : > { %2211 = vmatprep.subr.bf16.mxu1 %v2414_v1 }
 0x2eb   : > { %2212 = vmatpush3.bf16.msra.mxu1 %v2936_v3 }
 0x2ec   : > { %2213 = vmatprep.subr.bf16.mxu1 %v2414_v1 }
 0x2ef   : > { %2214 = vmatpush3.bf16.msra.mxu1 %v2943_v4 }
 0x2f0   : > { %2215 = vmatprep.subr.bf16.mxu1 %v2414_v1 }
 0x2f3   : > { %2216 = vmatpush3.bf16.msra.mxu1 %v2950_v5 }
 0x2f4   : > { %2217 = vmatprep.subr.bf16.mxu1 %v2414_v1 }
 0x2f7   : > { %2218 = vmatpush3.bf16.msra.mxu1 %v2957_v6 }
 0x2f8   : > { %2219 = vmatprep.subr.bf16.mxu1 %v2414_v1 }
 0x2fb   : > { %2220 = vmatpush3.bf16.msra.mxu1 %v2964_v7 }
 0x2fc   : > { %2221 = vmatprep.subr.bf16.mxu1 %v2414_v1  ;;  %v2012_v1 = vld [vmem:[%s3042_s4] ss:$0 sm:$0xff] }
 0x2ff   : > { %2222 = vmatpush3.bf16.msra.mxu1 %v2971_v8  ;;  %v1583_v26 = vpop.f32.mrb[24].mxu0 }
 0x300   : > { %v2165_v27 = vpop.f32.mrb[25].mxu0 }
 0x301   : > { %v1586_v28 = vpop.f32.mrb[26].mxu0 }
 0x302   : > { %2224 = vmatmul.mubr.bf16.vlgmr.msra.gmra.mrb[28].mxu1 %v1274_v25  ;;  %v2166_v29 = vpop.f32.mrb[27].mxu0 }
 0x31f   : > { %v1664_v30 = vpop.f32.mrb[28].mxu0 }
 0x320   : > { %v2205_v31 = vpop.f32.mrb[29].mxu0 }
 0x321   : > { %v1667_v32 = vpop.f32.mrb[30].mxu0 }
 0x322   : > { %v2206_v33 = vpop.f32.mrb[31].mxu0 }
 0x395   : > { %v1478_v34 = vpop.f32.mrb[20].mxu1 }
 0x396   : > { %v1479_v35 = vadd.f32 %v1478_v34, %v1390_v20  ;;  %v2145_v36 = vpop.f32.mrb[21].mxu1 }
 0x397   : > { %v1481_v37 = vpop.f32.mrb[22].mxu1 }
 0x398   : > { %v1589_v38 = vadd.f32 %v1583_v26, %v1479_v35  ;;  %v2146_v39 = vpop.f32.mrb[23].mxu1 }
 0x39a   : > { %v1718_v40 = vadd.f32 %v2012_v1, %v1589_v38 }
 0x39c   : > { %v1719_v41 = vadd.f32 %v1718_v40, %v2798_v22 }
 0x39e   : > { %v1720_v52 = vmax.f32 %v1719_v41, 0.0 }
 0x3b5   : > { %v1624_v2 = vpop.f32.mrb[24].mxu1 }
 0x3b6   : > { %v1665_v43 = vadd.f32 %v1664_v30, %v1624_v2  ;;  %v2185_v44 = vpop.f32.mrb[25].mxu1 }
 0x3b7   : > { %v1627_v45 = vpop.f32.mrb[26].mxu1 }
 0x3b8   : > { %v2186_v46 = vpop.f32.mrb[27].mxu1 }
 0x3d5   : > { %v1704_v47 = vpop.f32.mrb[28].mxu1 }
 0x3d6   : > { %v1710_v48 = vadd.f32 %v1704_v47, %v1665_v43  ;;  %v2225_v49 = vpop.f32.mrb[29].mxu1 }
 0x3d7   : > { %v1707_v50 = vpop.f32.mrb[30].mxu1 }
 0x3d8   : > { %v1721_v51 = vadd.f32 %v2012_v1, %v1710_v48  ;;  %v2226_v13 = vpop.f32.mrb[31].mxu1 }
 0x3da   : > { %v1722_v12 = vadd.f32 %v1721_v51, %v2800_v42 }
 0x3dc   : > { %v1723_v53 = vmax.f32 %v1722_v12, 0.0 }
 0x3de   : > { %v2019_v22 = vpack.c.bf16 %v1723_v53, %v1720_v52 }
 0x3e0   : > { %2020 = vst [vmem:[%s221_s16] sm:$0xff] %v2019_v22  }
 0x3e1 PF: > { %s15_s18 = sadd.s32 1, %s2412_s18  }
 0x3e2   : > { %p12_p4 = scmp.ge.s32.totalorder %s15_s18, 4  }
 0x3e4   :  { %14 = sbr.rel (!%p12_p4) target bundleno = 1 (0x1), region = 74 }

// kernel: _lambda_.5
= control target key start
LH: loop header
LB: loop body
LE: loop exit
PB: predicated region body
PF: predicated region fallthrough
CT: control target
= control target key end

     0   :  { %s2542_s18 = smov 0   ;;  %s3140_s0 = inlined_call_operand.vmem [shape: bf16[2,16,128], index: 0, kind: input, shape index: {}]   ;;  %s3141_s1 = inlined_call_operand.vmem [shape: bf16[3,128,512], index: 1, kind: input, shape index: {}]   ;;  %s3142_s2 = inlined_call_operand.vmem [shape: f32[1,512], index: 2, kind: input, shape index: {}]   ;;  %s3143_s3 = inlined_call_operand.vmem [shape: bf16[3,128,128], index: 3, kind: input, shape index: {}]   ;;  %s3144_s4 = inlined_call_operand.vmem [shape: f32[1,128], index: 4, kind: input, shape index: {}]   ;;  %s3145_s5 = inlined_call_operand.vmem [shape: bf16[2,16,256], index: 5, kind: output, shape index: {}]  }
   0x1 LB: > { %s1844_s19 = sadd.s32 4294967295, %s2507_s18   ;;  %p1848_p0 = scmp.ge.s32.totalorder %s2507_s18, 1  ;;  %s2507_s18 = sphi %s2542_s18, %s15_s18  }
   0x2   : > { %p187_p1 = scmp.lt.s32.totalorder %s2507_s18, 3 }
   0x4   : > { %p188_p2 = pnand %p1848_p0, %p187_p1 }
   0x5   : > { %p215_p3 = scmp.lt.s32.totalorder (!%p188_p2), %s1844_s19, 1  ;;  %v226_v0 = vlaneseq (!%p188_p2)  ;;  %v2509_v1 = vmov (!%p188_p2), 0.0   ;;  %vm2510_vm0 = vmmov (!%p188_p2), 0   ;;  %v2335_v7 = vld [vmem:[%s3141_s1 + $0x104] ss:$16 sps:$4 sm:$0xff] (!%p188_p2)   ;;  %vm251_vm5 = vcmask (!%p188_p2), 130048  }
   0x6   : > { %191 = sbr.rel (%p188_p2) target bundleno = 997 (0x3e5), region = 40  ;;  %2161 = vmatprep.subr.bf16.mxu0 (!%p188_p2), %v2509_v1  ;;  %2163 = vmatprep.mubr.msk.bf16.mxu0 (!%p188_p2), %vm2510_vm0, %v2509_v1  ;;  %v2338_v8 = vld [vmem:[%s3141_s1 + $0x10c] ss:$16 sps:$4 sm:$0xff] (!%p188_p2)   ;;  %v2333_v14 = vld [vmem:[%s3141_s1 + $0x100] ss:$16 sps:$4 sm:$0xff] (!%p188_p2)   ;;  %v2511_v24 = vmov (!%p188_p2), 0  }
   0x7   : > { %v2555_v2 = vshrl.u32 (!%p188_p2), %v226_v0, 7  ;;  %v230_v3 = vand.u32 (!%p188_p2), 127, %v226_v0  ;;  %2167 = vmatprep.subr.bf16.mxu1 (!%p188_p2), %v2509_v1  ;;  %2169 = vmatprep.mubr.msk.bf16.mxu1 (!%p188_p2), %vm2510_vm0, %v2509_v1  ;;  %v2336_v17 = vld [vmem:[%s3141_s1 + $0x108] ss:$16 sps:$4 sm:$0xff] (!%p188_p2)   ;;  %v2341_v18 = vld [vmem:[%s3141_s1 + $0x124] ss:$16 sps:$4 sm:$0xff] (!%p188_p2)  }
   0x8   : > { %v2344_v19 = vld [vmem:[%s3141_s1 + $0x12c] ss:$16 sps:$4 sm:$0xff] (!%p188_p2)   ;;  %v2339_v20 = vld [vmem:[%s3141_s1 + $0x120] ss:$16 sps:$4 sm:$0xff] (!%p188_p2)   ;;  %v2342_v21 = vld [vmem:[%s3141_s1 + $0x128] ss:$16 sps:$4 sm:$0xff] (!%p188_p2)  }
   0x9   : > { %v228_v4 = vadd.s32 (!%p188_p2), 8, %v2555_v2  ;;  %v231_v5 = vadd.s32 (!%p188_p2), 1, %v230_v3  ;;  %v1853_v6 = vadd.s32 (!%p188_p2), 4294967295, %v230_v3  ;;  %v2347_v22 = vld [vmem:[%s3141_s1 + $0x144] ss:$16 sps:$4 sm:$0xff] (!%p188_p2)  }
   0xa   : > { %v2350_v23 = vld [vmem:[%s3141_s1 + $0x14c] ss:$16 sps:$4 sm:$0xff] (!%p188_p2)   ;;  %v2345_v25 = vld [vmem:[%s3141_s1 + $0x140] ss:$16 sps:$4 sm:$0xff] (!%p188_p2)   ;;  %v2348_v26 = vld [vmem:[%s3141_s1 + $0x148] ss:$16 sps:$4 sm:$0xff] (!%p188_p2)  }
   0xb   : > { %vm232_vm1 = vcmp.eq.s32.totalorder (!%p188_p2), %v2555_v2, %v231_v5  ;;  %vm233_vm2 = vcmp.eq.s32.totalorder (!%p188_p2), %v228_v4, %v231_v5  ;;  %vm238_vm3 = vcmp.eq.s32.totalorder (!%p188_p2), %v2555_v2, %v1853_v6  ;;  %vm239_vm4 = vcmp.eq.s32.totalorder (!%p188_p2), %v228_v4, %v1853_v6  ;;  %v2353_v27 = vld [vmem:[%s3141_s1 + $0x164] ss:$16 sps:$4 sm:$0xff] (!%p188_p2)   ;;  %v2356_v28 = vld [vmem:[%s3141_s1 + $0x16c] ss:$16 sps:$4 sm:$0xff] (!%p188_p2)   ;;  %v2351_v29 = vld [vmem:[%s3141_s1 + $0x160] ss:$16 sps:$4 sm:$0xff] (!%p188_p2)  }
   0xc   : > { %v234_v10 = vsel (!%p188_p2), %vm232_vm1, 1.0, %v2509_v1  ;;  %v235_v11 = vsel (!%p188_p2), %vm233_vm2, 1.0, %v2509_v1  ;;  %v240_v12 = vsel (!%p188_p2), %vm238_vm3, 1.0, %v2509_v1  ;;  %v241_v13 = vsel (!%p188_p2), %vm239_vm4, 1.0, %v2509_v1  ;;  %v2354_v30 = vld [vmem:[%s3141_s1 + $0x168] ss:$16 sps:$4 sm:$0xff] (!%p188_p2)  }
   0xd   : > { %s3147_s19 = smov (!%p215_p3, %s1844_s19), 1  ;;  %v2583_v15 = vpack.c.bf16 %v235_v11, %v234_v10  ;;  %v2586_v16 = vpack.c.bf16 %v241_v13, %v240_v12  ;;  %v2359_v31 = vld [vmem:[%s3141_s1 + $0x184] ss:$16 sps:$4 sm:$0xff]   ;;  %v2362_v32 = vld [vmem:[%s3141_s1 + $0x18c] ss:$16 sps:$4 sm:$0xff]  }
   0xe   : > { %s2082_s20 = sshll.u32 %s3147_s19, 3  ;;  %v2357_v33 = vld [vmem:[%s3141_s1 + $0x180] ss:$16 sps:$4 sm:$0xff]   ;;  %v2360_v34 = vld [vmem:[%s3141_s1 + $0x188] ss:$16 sps:$4 sm:$0xff]   ;;  %s2083_s13 = sshll.u32 %s3147_s19, 4 }
   0xf   : > { %s219_s25 = scalar_lea.vmem %s3140_s0, %s2082_s20  ;;  %v2365_v35 = vld [vmem:[%s3141_s1 + $0x1a4] ss:$16 sps:$4 sm:$0xff]   ;;  %v2368_v36 = vld [vmem:[%s3141_s1 + $0x1ac] ss:$16 sps:$4 sm:$0xff]   ;;  %v2363_v37 = vld [vmem:[%s3141_s1 + $0x1a0] ss:$16 sps:$4 sm:$0xff]   ;;  %s224_s16 = scalar_lea.vmem %s3145_s5, %s2083_s13 }
  0x10   : > { %v2571_v9 = vld [vmem:[%s219_s25] sm:$0xff]   ;;  %v2366_v38 = vld [vmem:[%s3141_s1 + $0x1a8] ss:$16 sps:$4 sm:$0xff]   ;;  %v2374_v40 = vld [vmem:[%s3141_s1 + $0x1cc] ss:$16 sps:$4 sm:$0xff]  }
  0x11   : > { %2162 = vmatpush3.bf16.msra.mxu0 %v2571_v9  ;;  %2168 = vmatpush3.bf16.msra.mxu1 %v2571_v9  ;;  %v2371_v39 = vld [vmem:[%s3141_s1 + $0x1c4] ss:$16 sps:$4 sm:$0xff]   ;;  %v2369_v41 = vld [vmem:[%s3141_s1 + $0x1c0] ss:$16 sps:$4 sm:$0xff]   ;;  %v2372_v42 = vld [vmem:[%s3141_s1 + $0x1c8] ss:$16 sps:$4 sm:$0xff]  }
  0x12   : > { %567 = vmatprep.subr.bf16.mxu0 %v2335_v7  ;;  %610 = vmatprep.subr.bf16.mxu1 %v2338_v8  ;;  %v2377_v43 = vld [vmem:[%s3141_s1 + $0x1e4] ss:$16 sps:$4 sm:$0xff]   ;;  %v2380_v44 = vld [vmem:[%s3141_s1 + $0x1ec] ss:$16 sps:$4 sm:$0xff]   ;;  %v2375_v45 = vld [vmem:[%s3141_s1 + $0x1e0] ss:$16 sps:$4 sm:$0xff]  }
  0x13   : > { %v2378_v46 = vld [vmem:[%s3141_s1 + $0x1e8] ss:$16 sps:$4 sm:$0xff]   ;;  %v2383_v47 = vld [vmem:[%s3141_s1 + $0x4] ss:$16 sps:$4 sm:$0xff]   ;;  %v2386_v48 = vld [vmem:[%s3141_s1 + $0xc] ss:$16 sps:$4 sm:$0xff]  }
  0x14   : > { %2164 = vmatmul.mubr.msk.bf16.vlgmr.msra.gmra.mrb[0].mxu0 %vm251_vm5, %v2583_v15  ;;  %2170 = vmatmul.mubr.msk.bf16.vlgmr.msra.gmra.mrb[0].mxu1 %vm251_vm5, %v2586_v16  ;;  %v2381_v49 = vld [vmem:[%s3141_s1] ss:$16 sps:$4 sm:$0xff]   ;;  %v2384_v50 = vld [vmem:[%s3141_s1 + $0x8] ss:$16 sps:$4 sm:$0xff]   ;;  %v2389_v51 = vld [vmem:[%s3141_s1 + $0x24] ss:$16 sps:$4 sm:$0xff]  }
  0x15   : > { %568 = vmatpush1.bf16.msra.mxu0 %v2333_v14  ;;  %611 = vmatpush1.bf16.msra.mxu1 %v2336_v17  ;;  %v2392_v52 = vld [vmem:[%s3141_s1 + $0x2c] ss:$16 sps:$4 sm:$0xff]   ;;  %v2387_v53 = vld [vmem:[%s3141_s1 + $0x20] ss:$16 sps:$4 sm:$0xff]   ;;  %v2390_v54 = vld [vmem:[%s3141_s1 + $0x28] ss:$16 sps:$4 sm:$0xff]  }
  0x16   : > { %569 = vmatprep.subr.bf16.mxu0 %v2341_v18  ;;  %612 = vmatprep.subr.bf16.mxu1 %v2344_v19  ;;  %v2395_v55 = vld [vmem:[%s3141_s1 + $0x44] ss:$16 sps:$4 sm:$0xff]   ;;  %v2398_v56 = vld [vmem:[%s3141_s1 + $0x4c] ss:$16 sps:$4 sm:$0xff]   ;;  %v2393_v57 = vld [vmem:[%s3141_s1 + $0x40] ss:$16 sps:$4 sm:$0xff]  }
  0x17   : > { %599 = vmatprep.mubr.bf16.mxu0 %v2511_v24  ;;  %642 = vmatprep.mubr.bf16.mxu1 %v2511_v24  ;;  %v2396_v58 = vld [vmem:[%s3141_s1 + $0x48] ss:$16 sps:$4 sm:$0xff]   ;;  %v2401_v59 = vld [vmem:[%s3141_s1 + $0x64] ss:$16 sps:$4 sm:$0xff]   ;;  %v2404_v60 = vld [vmem:[%s3141_s1 + $0x6c] ss:$16 sps:$4 sm:$0xff]  }
  0x18   : > { %v2399_v61 = vld [vmem:[%s3141_s1 + $0x60] ss:$16 sps:$4 sm:$0xff]   ;;  %v2402_v62 = vld [vmem:[%s3141_s1 + $0x68] ss:$16 sps:$4 sm:$0xff]   ;;  %v2407_v63 = vld [vmem:[%s3141_s1 + $0x84] ss:$16 sps:$4 sm:$0xff]  }
  0x19   : > { %570 = vmatpush1.bf16.msra.mxu0 %v2339_v20  ;;  %613 = vmatpush1.bf16.msra.mxu1 %v2342_v21  ;;  %v2410_v0 = vld [vmem:[%s3141_s1 + $0x8c] ss:$16 sps:$4 sm:$0xff]   ;;  %v2405_v3 = vld [vmem:[%s3141_s1 + $0x80] ss:$16 sps:$4 sm:$0xff]   ;;  %v2408_v4 = vld [vmem:[%s3141_s1 + $0x88] ss:$16 sps:$4 sm:$0xff]  }
  0x1a   : > { %571 = vmatprep.subr.bf16.mxu0 %v2347_v22  ;;  %614 = vmatprep.subr.bf16.mxu1 %v2350_v23  ;;  %v2413_v5 = vld [vmem:[%s3141_s1 + $0xa4] ss:$16 sps:$4 sm:$0xff]   ;;  %v2416_v6 = vld [vmem:[%s3141_s1 + $0xac] ss:$16 sps:$4 sm:$0xff]   ;;  %v2411_v7 = vld [vmem:[%s3141_s1 + $0xa0] ss:$16 sps:$4 sm:$0xff]  }
  0x1b   : > { %v2414_v8 = vld [vmem:[%s3141_s1 + $0xa8] ss:$16 sps:$4 sm:$0xff]   ;;  %v2422_v10 = vld [vmem:[%s3141_s1 + $0xcc] ss:$16 sps:$4 sm:$0xff]   ;;  %v2417_v11 = vld [vmem:[%s3141_s1 + $0xc0] ss:$16 sps:$4 sm:$0xff]  }
  0x1c   : > { %v2420_v12 = vld [vmem:[%s3141_s1 + $0xc8] ss:$16 sps:$4 sm:$0xff]   ;;  %v2425_v13 = vld [vmem:[%s3141_s1 + $0xe4] ss:$16 sps:$4 sm:$0xff]   ;;  %v2428_v14 = vld [vmem:[%s3141_s1 + $0xec] ss:$16 sps:$4 sm:$0xff]  }
  0x1d   : > { %572 = vmatpush1.bf16.msra.mxu0 %v2345_v25  ;;  %615 = vmatpush1.bf16.msra.mxu1 %v2348_v26  ;;  %v2423_v17 = vld [vmem:[%s3141_s1 + $0xe0] ss:$16 sps:$4 sm:$0xff]   ;;  %v2426_v18 = vld [vmem:[%s3141_s1 + $0xe8] ss:$16 sps:$4 sm:$0xff]   ;;  %v2431_v19 = vld [vmem:[%s3141_s1 + $0x204] ss:$16 sps:$4 sm:$0xff]  }
  0x1e   : > { %573 = vmatprep.subr.bf16.mxu0 %v2353_v27  ;;  %616 = vmatprep.subr.bf16.mxu1 %v2356_v28  ;;  %v2434_v20 = vld [vmem:[%s3141_s1 + $0x20c] ss:$16 sps:$4 sm:$0xff]   ;;  %v2429_v27 = vld [vmem:[%s3141_s1 + $0x200] ss:$16 sps:$4 sm:$0xff]   ;;  %v2432_v28 = vld [vmem:[%s3141_s1 + $0x208] ss:$16 sps:$4 sm:$0xff]  }
  0x21   : > { %574 = vmatpush1.bf16.msra.mxu0 %v2351_v29  ;;  %617 = vmatpush1.bf16.msra.mxu1 %v2354_v30 }
  0x22   : > { %575 = vmatprep.subr.bf16.mxu0 %v2359_v31  ;;  %618 = vmatprep.subr.bf16.mxu1 %v2362_v32  ;;  %v2437_v32 = vld [vmem:[%s3141_s1 + $0x224] ss:$16 sps:$4 sm:$0xff]  }
  0x25   : > { %576 = vmatpush1.bf16.msra.mxu0 %v2357_v33  ;;  %619 = vmatpush1.bf16.msra.mxu1 %v2360_v34  ;;  %v2440_v33 = vld [vmem:[%s3141_s1 + $0x22c] ss:$16 sps:$4 sm:$0xff]  }
  0x26   : > { %577 = vmatprep.subr.bf16.mxu0 %v2365_v35  ;;  %620 = vmatprep.subr.bf16.mxu1 %v2368_v36  ;;  %v2435_v36 = vld [vmem:[%s3141_s1 + $0x220] ss:$16 sps:$4 sm:$0xff]  }
  0x29   : > { %578 = vmatpush1.bf16.msra.mxu0 %v2363_v37  ;;  %621 = vmatpush1.bf16.msra.mxu1 %v2366_v38  ;;  %v2438_v37 = vld [vmem:[%s3141_s1 + $0x228] ss:$16 sps:$4 sm:$0xff]   ;;  %v2443_v38 = vld [vmem:[%s3141_s1 + $0x244] ss:$16 sps:$4 sm:$0xff]  }
  0x2a   : > { %579 = vmatprep.subr.bf16.mxu0 %v2371_v39  ;;  %622 = vmatprep.subr.bf16.mxu1 %v2374_v40  ;;  %v2446_v39 = vld [vmem:[%s3141_s1 + $0x24c] ss:$16 sps:$4 sm:$0xff]   ;;  %v2441_v40 = vld [vmem:[%s3141_s1 + $0x240] ss:$16 sps:$4 sm:$0xff]  }
  0x2d   : > { %580 = vmatpush1.bf16.msra.mxu0 %v2369_v41  ;;  %623 = vmatpush1.bf16.msra.mxu1 %v2372_v42  ;;  %v2444_v41 = vld [vmem:[%s3141_s1 + $0x248] ss:$16 sps:$4 sm:$0xff]   ;;  %v2449_v42 = vld [vmem:[%s3141_s1 + $0x264] ss:$16 sps:$4 sm:$0xff]  }
  0x2e   : > { %581 = vmatprep.subr.bf16.mxu0 %v2377_v43  ;;  %624 = vmatprep.subr.bf16.mxu1 %v2380_v44  ;;  %v2447_v43 = vld [vmem:[%s3141_s1 + $0x260] ss:$16 sps:$4 sm:$0xff]   ;;  %v2450_v44 = vld [vmem:[%s3141_s1 + $0x268] ss:$16 sps:$4 sm:$0xff]  }
  0x31   : > { %582 = vmatpush1.bf16.msra.mxu0 %v2375_v45  ;;  %625 = vmatpush1.bf16.msra.mxu1 %v2378_v46  ;;  %v2455_v45 = vld [vmem:[%s3141_s1 + $0x284] ss:$16 sps:$4 sm:$0xff]   ;;  %v2458_v46 = vld [vmem:[%s3141_s1 + $0x28c] ss:$16 sps:$4 sm:$0xff]  }
  0x32   : > { %813 = vmatprep.subr.bf16.mxu0 %v2383_v47  ;;  %856 = vmatprep.subr.bf16.mxu1 %v2386_v48  ;;  %v2453_v47 = vld [vmem:[%s3141_s1 + $0x280] ss:$16 sps:$4 sm:$0xff]   ;;  %v2456_v48 = vld [vmem:[%s3141_s1 + $0x288] ss:$16 sps:$4 sm:$0xff]  }
  0x34   : > { %600 = vmatmul.mubr.bf16.vlgmr.msra.gmra.mrb[4].mxu0 %v2571_v9  ;;  %643 = vmatmul.mubr.bf16.vlgmr.msra.gmra.mrb[4].mxu1 %v2571_v9  ;;  %v2419_v9 = vld [vmem:[%s3141_s1 + $0xc4] ss:$16 sps:$4 sm:$0xff]  }
  0x35   : > { %814 = vmatpush1.bf16.msra.mxu0 %v2381_v49  ;;  %857 = vmatpush1.bf16.msra.mxu1 %v2384_v50  ;;  %v2461_v49 = vld [vmem:[%s3141_s1 + $0x2a4] ss:$16 sps:$4 sm:$0xff]   ;;  %v2464_v50 = vld [vmem:[%s3141_s1 + $0x2ac] ss:$16 sps:$4 sm:$0xff]  }
  0x36   : > { %815 = vmatprep.subr.bf16.mxu0 %v2389_v51  ;;  %858 = vmatprep.subr.bf16.mxu1 %v2392_v52  ;;  %v2459_v51 = vld [vmem:[%s3141_s1 + $0x2a0] ss:$16 sps:$4 sm:$0xff]   ;;  %v2462_v52 = vld [vmem:[%s3141_s1 + $0x2a8] ss:$16 sps:$4 sm:$0xff]  }
  0x37   : > { %845 = vmatprep.mubr.bf16.mxu0 %v2511_v24  ;;  %888 = vmatprep.mubr.bf16.mxu1 %v2511_v24 }
  0x39   : > { %816 = vmatpush1.bf16.msra.mxu0 %v2387_v53  ;;  %859 = vmatpush1.bf16.msra.mxu1 %v2390_v54  ;;  %v2467_v53 = vld [vmem:[%s3141_s1 + $0x2c4] ss:$16 sps:$4 sm:$0xff]   ;;  %v2470_v54 = vld [vmem:[%s3141_s1 + $0x2cc] ss:$16 sps:$4 sm:$0xff]  }
  0x3a   : > { %817 = vmatprep.subr.bf16.mxu0 %v2395_v55  ;;  %860 = vmatprep.subr.bf16.mxu1 %v2398_v56  ;;  %v2465_v55 = vld [vmem:[%s3141_s1 + $0x2c0] ss:$16 sps:$4 sm:$0xff]   ;;  %v2468_v56 = vld [vmem:[%s3141_s1 + $0x2c8] ss:$16 sps:$4 sm:$0xff]  }
  0x3d   : > { %818 = vmatpush1.bf16.msra.mxu0 %v2393_v57  ;;  %861 = vmatpush1.bf16.msra.mxu1 %v2396_v58  ;;  %v2473_v57 = vld [vmem:[%s3141_s1 + $0x2e4] ss:$16 sps:$4 sm:$0xff]   ;;  %v2476_v58 = vld [vmem:[%s3141_s1 + $0x2ec] ss:$16 sps:$4 sm:$0xff]  }
  0x3e   : > { %819 = vmatprep.subr.bf16.mxu0 %v2401_v59  ;;  %862 = vmatprep.subr.bf16.mxu1 %v2404_v60  ;;  %v2471_v59 = vld [vmem:[%s3141_s1 + $0x2e0] ss:$16 sps:$4 sm:$0xff]   ;;  %v2474_v60 = vld [vmem:[%s3141_s1 + $0x2e8] ss:$16 sps:$4 sm:$0xff]  }
  0x41   : > { %820 = vmatpush1.bf16.msra.mxu0 %v2399_v61  ;;  %863 = vmatpush1.bf16.msra.mxu1 %v2402_v62  ;;  %v1190_v61 = vsub.s32 0, %v2555_v2  ;;  %v1198_v62 = vsub.s32 2, %v2555_v2 }
  0x42   : > { %821 = vmatprep.subr.bf16.mxu0 %v2407_v63  ;;  %864 = vmatprep.subr.bf16.mxu1 %v2410_v0  ;;  %v1186_v63 = vld [vmem:[%s3142_s2] sm:$0xf]  ;;  %v1194_v0 = vsub.s32 1, %v2555_v2 }
  0x45   : > { %822 = vmatpush1.bf16.msra.mxu0 %v2405_v3  ;;  %865 = vmatpush1.bf16.msra.mxu1 %v2408_v4  ;;  %v1202_v3 = vsub.s32 3, %v2555_v2  ;;  %v1191_v4 = vrot.slane %v1186_v63, %v1190_v61 }
  0x46   : > { %823 = vmatprep.subr.bf16.mxu0 %v2413_v5  ;;  %866 = vmatprep.subr.bf16.mxu1 %v2416_v6  ;;  %v1199_v5 = vrot.slane %v1186_v63, %v1198_v62  ;;  %v1195_v6 = vrot.slane %v1186_v63, %v1194_v0 }
  0x49   : > { %824 = vmatpush1.bf16.msra.mxu0 %v2411_v7  ;;  %867 = vmatpush1.bf16.msra.mxu1 %v2414_v8  ;;  %v1203_v7 = vrot.slane %v1186_v63, %v1202_v3 }
  0x4a   : > { %825 = vmatprep.subr.bf16.mxu0 %v2419_v9  ;;  %868 = vmatprep.subr.bf16.mxu1 %v2422_v10 }
  0x4d   : > { %826 = vmatpush1.bf16.msra.mxu0 %v2417_v11  ;;  %869 = vmatpush1.bf16.msra.mxu1 %v2420_v12 }
  0x4e   : > { %827 = vmatprep.subr.bf16.mxu0 %v2425_v13  ;;  %870 = vmatprep.subr.bf16.mxu1 %v2428_v14 }
  0x51   : > { %828 = vmatpush1.bf16.msra.mxu0 %v2423_v17  ;;  %871 = vmatpush1.bf16.msra.mxu1 %v2426_v18 }
  0x52   : > { %1092 = vmatprep.subr.bf16.mxu0 %v2431_v19  ;;  %1135 = vmatprep.subr.bf16.mxu1 %v2434_v20 }
  0xe7   : > { %v289_v21 = vpop.f32.mrb[0].mxu0  ;;  %v334_v22 = vpop.f32.mrb[0].mxu1 }
  0xe8   : > { %v2165_v23 = vpop.f32.mrb[1].mxu0  ;;  %v2171_v25 = vpop.f32.mrb[1].mxu1 }
  0xe9   : > { %v292_v26 = vpop.f32.mrb[2].mxu0  ;;  %v337_v29 = vpop.f32.mrb[2].mxu1 }
  0xea   : > { %v296_v30 = vpack.c.bf16 %v292_v26, %v289_v21  ;;  %v2166_v31 = vpop.f32.mrb[3].mxu0  ;;  %v2799_v34 = vpack.c.bf16 %v337_v29, %v334_v22  ;;  %v2172_v35 = vpop.f32.mrb[3].mxu1 }
  0xeb   : > { %v2956_v35 = vld [vmem:[%s3143_s3 + $0x10] sm:$0xff]  }
  0xec   : > { %846 = vmatmul.mubr.bf16.vlgmr.msra.gmra.mrb[4].mxu0 %v296_v30  ;;  %889 = vmatmul.mubr.bf16.vlgmr.msra.gmra.mrb[4].mxu1 %v296_v30 }
  0xed   : > { %1093 = vmatpush1.bf16.msra.mxu0 %v2429_v27  ;;  %1136 = vmatpush1.bf16.msra.mxu1 %v2432_v28 }
  0xee   : > { %1094 = vmatprep.subr.bf16.mxu0 %v2437_v32  ;;  %1137 = vmatprep.subr.bf16.mxu1 %v2440_v33  ;;  %v2913_v32 = vld [vmem:[%s3143_s3 + $0x40] sm:$0xff]  }
  0xef   : > { %1124 = vmatprep.mubr.bf16.mxu0 %v2511_v24  ;;  %1167 = vmatprep.mubr.bf16.mxu1 %v2511_v24  ;;  %v2452_v24 = vld [vmem:[%s3141_s1 + $0x26c] ss:$16 sps:$4 sm:$0xff]   ;;  %v2920_v33 = vld [vmem:[%s3143_s3] sm:$0xff]  }
  0xf1   : > { %1095 = vmatpush1.bf16.msra.mxu0 %v2435_v36  ;;  %1138 = vmatpush1.bf16.msra.mxu1 %v2438_v37  ;;  %v2963_v36 = vld [vmem:[%s3143_s3 + $0x58] sm:$0xff]  }
  0xf2   : > { %1096 = vmatprep.subr.bf16.mxu0 %v2443_v38  ;;  %1139 = vmatprep.subr.bf16.mxu1 %v2446_v39  ;;  %v2496_v37 = vld [vmem:[%s3143_s3 + $0x18] sm:$0xff]   ;;  %v2974_v38 = vld [vmem:[%s3143_s3 + $0x60] sm:$0xff]  }
  0xf3   : > { %v2497_v39 = vld [vmem:[%s3143_s3 + $0x20] sm:$0xff]  }
  0xf5   : > { %1097 = vmatpush1.bf16.msra.mxu0 %v2441_v40  ;;  %1140 = vmatpush1.bf16.msra.mxu1 %v2444_v41  ;;  %v2985_v40 = vld [vmem:[%s3143_s3 + $0x68] sm:$0xff]  }
  0xf6   : > { %1098 = vmatprep.subr.bf16.mxu0 %v2449_v42  ;;  %1141 = vmatprep.subr.bf16.mxu1 %v2452_v24  ;;  %v2498_v41 = vld [vmem:[%s3143_s3 + $0x28] sm:$0xff]   ;;  %v2996_v42 = vld [vmem:[%s3143_s3 + $0x70] sm:$0xff]  }
  0xf7   : > { %v2499_v24 = vld [vmem:[%s3143_s3 + $0x30] sm:$0xff]  }
  0xf9   : > { %1099 = vmatpush1.bf16.msra.mxu0 %v2447_v43  ;;  %1142 = vmatpush1.bf16.msra.mxu1 %v2450_v44  ;;  %v3007_v43 = vld [vmem:[%s3143_s3 + $0x78] sm:$0xff]  }
  0xfa   : > { %1100 = vmatprep.subr.bf16.mxu0 %v2455_v45  ;;  %1143 = vmatprep.subr.bf16.mxu1 %v2458_v46  ;;  %v2500_v44 = vld [vmem:[%s3143_s3 + $0x38] sm:$0xff]   ;;  %v3018_v45 = vld [vmem:[%s3143_s3 + $0x80] sm:$0xff]   ;;  %v3027_v46 = vld [vmem:[%s3143_s3 + $0x88] sm:$0xff]  }
  0xfd   : > { %1101 = vmatpush1.bf16.msra.mxu0 %v2453_v47  ;;  %1144 = vmatpush1.bf16.msra.mxu1 %v2456_v48  ;;  %v3036_v47 = vld [vmem:[%s3143_s3 + $0x90] sm:$0xff]   ;;  %v3043_v48 = vld [vmem:[%s3143_s3 + $0x98] sm:$0xff]  }
  0xfe   : > { %1102 = vmatprep.subr.bf16.mxu0 %v2461_v49  ;;  %1145 = vmatprep.subr.bf16.mxu1 %v2464_v50  ;;  %v3050_v49 = vld [vmem:[%s3143_s3 + $0xa0] sm:$0xff]   ;;  %v3057_v50 = vld [vmem:[%s3143_s3 + $0xa8] sm:$0xff]  }
 0x101   : > { %1103 = vmatpush1.bf16.msra.mxu0 %v2459_v51  ;;  %1146 = vmatpush1.bf16.msra.mxu1 %v2462_v52  ;;  %v3064_v51 = vld [vmem:[%s3143_s3 + $0xb0] sm:$0xff]   ;;  %v3071_v52 = vld [vmem:[%s3143_s3 + $0xb8] sm:$0xff]  }
 0x102   : > { %1104 = vmatprep.subr.bf16.mxu0 %v2467_v53  ;;  %1147 = vmatprep.subr.bf16.mxu1 %v2470_v54 }
 0x105   : > { %1105 = vmatpush1.bf16.msra.mxu0 %v2465_v55  ;;  %1148 = vmatpush1.bf16.msra.mxu1 %v2468_v56 }
 0x106   : > { %1106 = vmatprep.subr.bf16.mxu0 %v2473_v57  ;;  %1149 = vmatprep.subr.bf16.mxu1 %v2476_v58 }
 0x109   : > { %1107 = vmatpush1.bf16.msra.mxu0 %v2471_v59  ;;  %1150 = vmatpush1.bf16.msra.mxu1 %v2474_v60 }
 0x10a   : > { %2179 = vmatprep.subr.bf16.mxu1 %v2509_v1  ;;  %2173 = vmatprep.subr.bf16.mxu0 %v2509_v1 }
 0x10c   : > { %1125 = vmatmul.mubr.bf16.vlgmr.msra.gmra.mrb[4].mxu0 %v2799_v34  ;;  %1168 = vmatmul.mubr.bf16.vlgmr.msra.gmra.mrb[4].mxu1 %v2799_v34  ;;  %v2931_v34 = vld [vmem:[%s3143_s3 + $0x48] sm:$0xff]  }
 0x10d   : > { %2175 = vmatprep.mubr.msk.bf16.mxu0 %vm2510_vm0, %v2509_v1  ;;  %2181 = vmatprep.mubr.msk.bf16.mxu1 %vm2510_vm0, %v2509_v1 }
 0x1df   : > { %v1126_v8 = vpop.f32.mrb[4].mxu0  ;;  %v1169_v9 = vpop.f32.mrb[4].mxu1 }
 0x1e0   : > { %v1208_v10 = vadd.f32 %v1191_v4, %v1126_v8  ;;  %v2896_v11 = vadd.f32 %v1199_v5, %v1169_v9  ;;  %v1128_v12 = vpop.f32.mrb[5].mxu0  ;;  %v1171_v13 = vpop.f32.mrb[5].mxu1 }
 0x1e1   : > { %v1209_v14 = vadd.f32 %v1195_v6, %v1128_v12  ;;  %v2898_v17 = vadd.f32 %v1203_v7, %v1171_v13  ;;  %v1130_v18 = vpop.f32.mrb[6].mxu0  ;;  %v1173_v19 = vpop.f32.mrb[6].mxu1 }
 0x1e2   : > { %v1212_v20 = vadd.f32 %v1191_v4, %v1130_v18  ;;  %v2900_v21 = vadd.f32 %v1199_v5, %v1173_v19  ;;  %v1132_v2 = vpop.f32.mrb[7].mxu0  ;;  %v1175_v22 = vpop.f32.mrb[7].mxu1  ;;  %v1216_v26 = vmax.f32 %v1208_v10, 0.0 }
 0x1e3   : > { %v1213_v23 = vadd.f32 %v1195_v6, %v1132_v2  ;;  %v2902_v25 = vadd.f32 %v1203_v7, %v1175_v22  ;;  %v1217_v28 = vmax.f32 %v1209_v14, 0.0 }
 0x1e4   : > { %v1218_v27 = vmax.f32 %v1212_v20, 0.0  ;;  %v2075_v20 = vld [vmem:[%s3144_s4] ss:$0 sm:$0xff] }
 0x1e5   : > { %v1219_v29 = vmax.f32 %v1213_v23, 0.0 }
 0x1e6   : > { %v2904_v30 = vpack.c.bf16 %v1218_v27, %v1216_v26 }
 0x1e7   : > { %v2906_v31 = vpack.c.bf16 %v1219_v29, %v1217_v28 }
 0x1e8   : > { %2180 = vmatpush3.bf16.msra.mxu1 %v2904_v30 }
 0x1e9   : > { %2174 = vmatpush3.bf16.msra.mxu0 %v2906_v31  ;;  %2205 = vmatprep.subr.bf16.mxu1 %v2509_v1 }
 0x1ea   : > { %2185 = vmatprep.subr.bf16.mxu0 %v2509_v1 }
 0x1eb   : > { %2182 = vmatmul.mubr.msk.bf16.vlgmr.msra.gmra.mrb[8].mxu1 %vm251_vm5, %v2586_v16  ;;  %v2939_v16 = vld [vmem:[%s3143_s3 + $0x8] sm:$0xff]  }
 0x1ec   : > { %2176 = vmatmul.mubr.msk.bf16.vlgmr.msra.gmra.mrb[8].mxu0 %vm251_vm5, %v2583_v15  ;;  %2206 = vmatpush3.bf16.msra.mxu1 %v2920_v33  ;;  %v2949_v15 = vld [vmem:[%s3143_s3 + $0x50] sm:$0xff]  }
 0x1ed   : > { %2186 = vmatpush3.bf16.msra.mxu0 %v2913_v32  ;;  %2201 = vmatprep.mubr.msk.bf16.mxu0 %vm2510_vm0, %v2509_v1 }
 0x1ee   : > { %2187 = vmatprep.subr.bf16.mxu0 %v2509_v1  ;;  %2207 = vmatprep.subr.bf16.mxu1 %v2509_v1 }
 0x1ef   : > { %2221 = vmatprep.mubr.msk.bf16.mxu1 %vm2510_vm0, %v2509_v1 }
 0x1f0   : > { %2208 = vmatpush3.bf16.msra.mxu1 %v2939_v16 }
 0x1f1   : > { %2188 = vmatpush3.bf16.msra.mxu0 %v2931_v34  ;;  %2209 = vmatprep.subr.bf16.mxu1 %v2509_v1 }
 0x1f2   : > { %2189 = vmatprep.subr.bf16.mxu0 %v2509_v1 }
 0x1f4   : > { %2210 = vmatpush3.bf16.msra.mxu1 %v2956_v35 }
 0x1f5   : > { %2190 = vmatpush3.bf16.msra.mxu0 %v2949_v15  ;;  %2211 = vmatprep.subr.bf16.mxu1 %v2509_v1 }
 0x1f6   : > { %2191 = vmatprep.subr.bf16.mxu0 %v2509_v1 }
 0x1f8   : > { %2212 = vmatpush3.bf16.msra.mxu1 %v2496_v37 }
 0x1f9   : > { %2192 = vmatpush3.bf16.msra.mxu0 %v2963_v36  ;;  %2213 = vmatprep.subr.bf16.mxu1 %v2509_v1 }
 0x1fa   : > { %2193 = vmatprep.subr.bf16.mxu0 %v2509_v1 }
 0x1fc   : > { %2214 = vmatpush3.bf16.msra.mxu1 %v2497_v39 }
 0x1fd   : > { %2194 = vmatpush3.bf16.msra.mxu0 %v2974_v38  ;;  %2215 = vmatprep.subr.bf16.mxu1 %v2509_v1 }
 0x1fe   : > { %2195 = vmatprep.subr.bf16.mxu0 %v2509_v1 }
 0x200   : > { %2216 = vmatpush3.bf16.msra.mxu1 %v2498_v41 }
 0x201   : > { %2196 = vmatpush3.bf16.msra.mxu0 %v2985_v40  ;;  %2217 = vmatprep.subr.bf16.mxu1 %v2509_v1 }
 0x202   : > { %2197 = vmatprep.subr.bf16.mxu0 %v2509_v1 }
 0x204   : > { %2218 = vmatpush3.bf16.msra.mxu1 %v2499_v24 }
 0x205   : > { %2198 = vmatpush3.bf16.msra.mxu0 %v2996_v42  ;;  %2219 = vmatprep.subr.bf16.mxu1 %v2509_v1 }
 0x206   : > { %2199 = vmatprep.subr.bf16.mxu0 %v2509_v1 }
 0x208   : > { %2220 = vmatpush3.bf16.msra.mxu1 %v2500_v44 }
 0x209   : > { %2200 = vmatpush3.bf16.msra.mxu0 %v3007_v43  ;;  %2245 = vmatprep.subr.bf16.mxu1 %v2509_v1 }
 0x20a   : > { %2225 = vmatprep.subr.bf16.mxu0 %v2509_v1 }
 0x20c   : > { %2202 = vmatmul.mubr.bf16.vlgmr.msra.gmra.mrb[12].mxu0 %v2904_v30 }
 0x20d   : > { %2226 = vmatpush3.bf16.msra.mxu0 %v3018_v45  ;;  %2241 = vmatprep.mubr.msk.bf16.mxu0 %vm2510_vm0, %v2509_v1 }
 0x20e   : > { %2227 = vmatprep.subr.bf16.mxu0 %v2509_v1 }
 0x211   : > { %2228 = vmatpush3.bf16.msra.mxu0 %v3027_v46 }
 0x212   : > { %2229 = vmatprep.subr.bf16.mxu0 %v2509_v1 }
 0x215   : > { %2230 = vmatpush3.bf16.msra.mxu0 %v3036_v47 }
 0x216   : > { %2231 = vmatprep.subr.bf16.mxu0 %v2509_v1 }
 0x219   : > { %2232 = vmatpush3.bf16.msra.mxu0 %v3043_v48 }
 0x21a   : > { %2233 = vmatprep.subr.bf16.mxu0 %v2509_v1 }
 0x21d   : > { %2234 = vmatpush3.bf16.msra.mxu0 %v3050_v49 }
 0x21e   : > { %2235 = vmatprep.subr.bf16.mxu0 %v2509_v1 }
 0x221   : > { %2236 = vmatpush3.bf16.msra.mxu0 %v3057_v50 }
 0x222   : > { %2237 = vmatprep.subr.bf16.mxu0 %v2509_v1 }
 0x225   : > { %2238 = vmatpush3.bf16.msra.mxu0 %v3064_v51 }
 0x226   : > { %2239 = vmatprep.subr.bf16.mxu0 %v2509_v1 }
 0x229   : > { %2240 = vmatpush3.bf16.msra.mxu0 %v3071_v52 }
 0x22a   : > { %2265 = vmatprep.subr.bf16.mxu0 %v2509_v1 }
 0x22c   : > { %2242 = vmatmul.mubr.bf16.vlgmr.msra.gmra.mrb[16].mxu0 %v2906_v31 }
 0x22d   : > { %2266 = vmatpush3.bf16.msra.mxu0 %v2920_v33  ;;  %2281 = vmatprep.mubr.msk.bf16.mxu0 %vm2510_vm0, %v2509_v1 }
 0x22e   : > { %2267 = vmatprep.subr.bf16.mxu0 %v2509_v1 }
 0x231   : > { %2268 = vmatpush3.bf16.msra.mxu0 %v2939_v16 }
 0x232   : > { %2269 = vmatprep.subr.bf16.mxu0 %v2509_v1 }
 0x235   : > { %2270 = vmatpush3.bf16.msra.mxu0 %v2956_v35 }
 0x236   : > { %2271 = vmatprep.subr.bf16.mxu0 %v2509_v1 }
 0x239   : > { %2272 = vmatpush3.bf16.msra.mxu0 %v2496_v37 }
 0x23a   : > { %2273 = vmatprep.subr.bf16.mxu0 %v2509_v1 }
 0x23d   : > { %2274 = vmatpush3.bf16.msra.mxu0 %v2497_v39 }
 0x23e   : > { %2275 = vmatprep.subr.bf16.mxu0 %v2509_v1 }
 0x241   : > { %2276 = vmatpush3.bf16.msra.mxu0 %v2498_v41 }
 0x242   : > { %2277 = vmatprep.subr.bf16.mxu0 %v2509_v1 }
 0x245   : > { %2278 = vmatpush3.bf16.msra.mxu0 %v2499_v24 }
 0x246   : > { %2279 = vmatprep.subr.bf16.mxu0 %v2509_v1 }
 0x249   : > { %2280 = vmatpush3.bf16.msra.mxu0 %v2500_v44 }
 0x24c   : > { %2282 = vmatmul.mubr.bf16.vlgmr.msra.gmra.mrb[20].mxu0 %v2904_v30 }
 0x2be   : > { %v1298_v53 = vpop.f32.mrb[8].mxu1 }
 0x2bf   : > { %v1256_v54 = vpop.f32.mrb[8].mxu0  ;;  %v2183_v55 = vpop.f32.mrb[9].mxu1 }
 0x2c0   : > { %v2177_v56 = vpop.f32.mrb[9].mxu0  ;;  %v1301_v57 = vpop.f32.mrb[10].mxu1 }
 0x2c1   : > { %v1259_v58 = vpop.f32.mrb[10].mxu0  ;;  %v1305_v59 = vpack.c.bf16 %v1301_v57, %v1298_v53  ;;  %v2184_v60 = vpop.f32.mrb[11].mxu1 }
 0x2c2   : > { %v1263_v61 = vpack.c.bf16 %v1259_v58, %v1256_v54  ;;  %v2178_v62 = vpop.f32.mrb[11].mxu0 }
 0x2c4   : > { %2222 = vmatmul.mubr.bf16.vlgmr.msra.gmra.mrb[12].mxu1 %v1263_v61 }
 0x2c5   : > { %2246 = vmatpush3.bf16.msra.mxu1 %v2913_v32  ;;  %2261 = vmatprep.mubr.msk.bf16.mxu1 %vm2510_vm0, %v2509_v1 }
 0x2c6   : > { %2247 = vmatprep.subr.bf16.mxu1 %v2509_v1 }
 0x2c9   : > { %2248 = vmatpush3.bf16.msra.mxu1 %v2931_v34 }
 0x2ca   : > { %2249 = vmatprep.subr.bf16.mxu1 %v2509_v1 }
 0x2cd   : > { %2250 = vmatpush3.bf16.msra.mxu1 %v2949_v15 }
 0x2ce   : > { %2251 = vmatprep.subr.bf16.mxu1 %v2509_v1 }
 0x2d1   : > { %2252 = vmatpush3.bf16.msra.mxu1 %v2963_v36 }
 0x2d2   : > { %2253 = vmatprep.subr.bf16.mxu1 %v2509_v1 }
 0x2d5   : > { %2254 = vmatpush3.bf16.msra.mxu1 %v2974_v38 }
 0x2d6   : > { %2255 = vmatprep.subr.bf16.mxu1 %v2509_v1 }
 0x2d9   : > { %2256 = vmatpush3.bf16.msra.mxu1 %v2985_v40 }
 0x2da   : > { %2257 = vmatprep.subr.bf16.mxu1 %v2509_v1 }
 0x2dd   : > { %2258 = vmatpush3.bf16.msra.mxu1 %v2996_v42 }
 0x2de   : > { %2259 = vmatprep.subr.bf16.mxu1 %v2509_v1 }
 0x2df   : > { %v1421_v63 = vpop.f32.mrb[12].mxu0 }
 0x2e0   : > { %v2203_v0 = vpop.f32.mrb[13].mxu0 }
 0x2e1   : > { %2260 = vmatpush3.bf16.msra.mxu1 %v3007_v43  ;;  %v1424_v3 = vpop.f32.mrb[14].mxu0 }
 0x2e2   : > { %v2204_v4 = vpop.f32.mrb[15].mxu0  ;;  %2285 = vmatprep.subr.bf16.mxu1 %v2509_v1 }
 0x2e4   : > { %2262 = vmatmul.mubr.bf16.vlgmr.msra.gmra.mrb[16].mxu1 %v2906_v31 }
 0x2e5   : > { %2286 = vmatpush3.bf16.msra.mxu1 %v3018_v45  ;;  %2301 = vmatprep.mubr.msk.bf16.mxu1 %vm2510_vm0, %v2509_v1 }
 0x2e6   : > { %2287 = vmatprep.subr.bf16.mxu1 %v2509_v1 }
 0x2e9   : > { %2288 = vmatpush3.bf16.msra.mxu1 %v3027_v46 }
 0x2ea   : > { %2289 = vmatprep.subr.bf16.mxu1 %v2509_v1 }
 0x2ed   : > { %2290 = vmatpush3.bf16.msra.mxu1 %v3036_v47 }
 0x2ee   : > { %2291 = vmatprep.subr.bf16.mxu1 %v2509_v1 }
 0x2f1   : > { %2292 = vmatpush3.bf16.msra.mxu1 %v3043_v48 }
 0x2f2   : > { %2293 = vmatprep.subr.bf16.mxu1 %v2509_v1 }
 0x2f5   : > { %2294 = vmatpush3.bf16.msra.mxu1 %v3050_v49 }
 0x2f6   : > { %2295 = vmatprep.subr.bf16.mxu1 %v2509_v1 }
 0x2f9   : > { %2296 = vmatpush3.bf16.msra.mxu1 %v3057_v50 }
 0x2fa   : > { %2297 = vmatprep.subr.bf16.mxu1 %v2509_v1 }
 0x2fd   : > { %2298 = vmatpush3.bf16.msra.mxu1 %v3064_v51 }
 0x2fe   : > { %2299 = vmatprep.subr.bf16.mxu1 %v2509_v1 }
 0x2ff   : > { %v1616_v5 = vpop.f32.mrb[16].mxu0 }
 0x300   : > { %v2243_v6 = vpop.f32.mrb[17].mxu0 }
 0x301   : > { %2300 = vmatpush3.bf16.msra.mxu1 %v3071_v52  ;;  %v1619_v7 = vpop.f32.mrb[18].mxu0 }
 0x302   : > { %v2244_v8 = vpop.f32.mrb[19].mxu0 }
 0x304   : > { %2302 = vmatmul.mubr.bf16.vlgmr.msra.gmra.mrb[20].mxu1 %v1305_v59 }
 0x31f   : > { %v1700_v9 = vpop.f32.mrb[20].mxu0 }
 0x320   : > { %v2283_v10 = vpop.f32.mrb[21].mxu0 }
 0x321   : > { %v1703_v12 = vpop.f32.mrb[22].mxu0 }
 0x322   : > { %v2284_v13 = vpop.f32.mrb[23].mxu0 }
 0x397   : > { %v1510_v14 = vpop.f32.mrb[12].mxu1 }
 0x398   : > { %v1511_v18 = vadd.f32 %v1510_v14, %v1421_v63  ;;  %v2223_v19 = vpop.f32.mrb[13].mxu1 }
 0x399   : > { %v1513_v2 = vpop.f32.mrb[14].mxu1 }
 0x39a   : > { %v1623_v1 = vadd.f32 %v1616_v5, %v1511_v18  ;;  %v1514_v22 = vadd.f32 %v1513_v2, %v1424_v3  ;;  %v2224_v23 = vpop.f32.mrb[15].mxu1 }
 0x39c   : > { %v1757_v26 = vadd.f32 %v2075_v20, %v1623_v1  ;;  %v1624_v27 = vadd.f32 %v1619_v7, %v1514_v22 }
 0x39e   : > { %v1759_v28 = vadd.f32 %v1757_v26, %v2896_v11  ;;  %v1758_v29 = vadd.f32 %v2075_v20, %v1624_v27 }
 0x3a0   : > { %v1760_v30 = vadd.f32 %v1758_v29, %v2900_v21  ;;  %v1761_v24 = vmax.f32 %v1759_v28, 0.0 }
 0x3a2   : > { %v1762_v44 = vmax.f32 %v1760_v30, 0.0 }
 0x3b7   : > { %v1659_v31 = vpop.f32.mrb[16].mxu1 }
 0x3b8   : > { %v1701_v32 = vadd.f32 %v1700_v9, %v1659_v31  ;;  %v2263_v33 = vpop.f32.mrb[17].mxu1 }
 0x3b9   : > { %v1662_v34 = vpop.f32.mrb[18].mxu1 }
 0x3ba   : > { %v1704_v16 = vadd.f32 %v1703_v12, %v1662_v34  ;;  %v2264_v15 = vpop.f32.mrb[19].mxu1 }
 0x3d7   : > { %v1741_v35 = vpop.f32.mrb[20].mxu1 }
 0x3d8   : > { %v1748_v36 = vadd.f32 %v1741_v35, %v1701_v32  ;;  %v2303_v37 = vpop.f32.mrb[21].mxu1 }
 0x3d9   : > { %v1744_v38 = vpop.f32.mrb[22].mxu1 }
 0x3da   : > { %v1763_v39 = vadd.f32 %v2075_v20, %v1748_v36  ;;  %v1749_v40 = vadd.f32 %v1744_v38, %v1704_v16  ;;  %v2304_v41 = vpop.f32.mrb[23].mxu1 }
 0x3dc   : > { %v1765_v11 = vadd.f32 %v1763_v39, %v2898_v17  ;;  %v1764_v42 = vadd.f32 %v2075_v20, %v1749_v40 }
 0x3de   : > { %v1767_v43 = vmax.f32 %v1765_v11, 0.0  ;;  %v1766_v21 = vadd.f32 %v1764_v42, %v2902_v25 }
 0x3e0   : > { %v2091_v45 = vpack.c.bf16 %v1767_v43, %v1761_v24  ;;  %v1768_v46 = vmax.f32 %v1766_v21, 0.0 }
 0x3e2   : > { %2092 = vst [vmem:[%s224_s16] sm:$0xff] %v2091_v45   ;;  %v2096_v47 = vpack.c.bf16 %v1768_v46, %v1762_v44 }
 0x3e4   : > { %2098 = vst [vmem:[%s224_s16 + $0x8] sm:$0xff] %v2096_v47  }
 0x3e5 PF: > { %s15_s18 = sadd.s32 1, %s2507_s18  }
 0x3e6   : > { %p12_p4 = scmp.ge.s32.totalorder %s15_s18, 4  }
 0x3e8   :  { %14 = sbr.rel (!%p12_p4) target bundleno = 1 (0x1), region = 74 }

// kernel: _lambda_.7
= control target key start
LH: loop header
LB: loop body
LE: loop exit
PB: predicated region body
PF: predicated region fallthrough
CT: control target
= control target key end

     0   :  { %s3345_s18 = smov 0   ;;  %s4079_s0 = inlined_call_operand.vmem [shape: bf16[2,64,128], index: 0, kind: input, shape index: {}]   ;;  %s4080_s1 = inlined_call_operand.vmem [shape: bf16[3,128,512], index: 1, kind: input, shape index: {}]   ;;  %s4081_s2 = inlined_call_operand.vmem [shape: f32[1,512], index: 2, kind: input, shape index: {}]   ;;  %s4082_s3 = inlined_call_operand.vmem [shape: bf16[3,128,128], index: 3, kind: input, shape index: {}]   ;;  %s4083_s4 = inlined_call_operand.vmem [shape: f32[1,128], index: 4, kind: input, shape index: {}]   ;;  %s4084_s5 = inlined_call_operand.vmem [shape: f32[2,64,256], index: 5, kind: output, shape index: {}]  }
   0x1 LB: > { %s2464_s19 = sadd.s32 4294967295, %s3311_s18   ;;  %p2468_p0 = scmp.ge.s32.totalorder %s3311_s18, 1  ;;  %s3311_s18 = sphi %s3345_s18, %s15_s18  }
   0x2   : > { %p187_p1 = scmp.lt.s32.totalorder %s3311_s18, 3 }
   0x4   : > { %p188_p2 = pnand %p2468_p0, %p187_p1 }
   0x5   : > { %p215_p3 = scmp.lt.s32.totalorder (!%p188_p2), %s2464_s19, 1  ;;  %v226_v0 = vlaneseq (!%p188_p2)  ;;  %vm311_vm0 = vcmask (!%p188_p2), 523264   ;;  %v3313_v8 = vmov (!%p188_p2), 0.0   ;;  %v3139_v23 = vld [vmem:[%s4080_s1 + $0x104] ss:$16 sps:$4 sm:$0xff] (!%p188_p2)   ;;  %v3314_v56 = vmov (!%p188_p2), 0  }
   0x6   : > { %191 = sbr.rel (%p188_p2) target bundleno = 1011 (0x3f3), region = 40  ;;  %v3142_v24 = vld [vmem:[%s4080_s1 + $0x10c] ss:$16 sps:$4 sm:$0xff] (!%p188_p2)   ;;  %v3137_v37 = vld [vmem:[%s4080_s1 + $0x100] ss:$16 sps:$4 sm:$0xff] (!%p188_p2)  }
   0x7   : > { %v3355_v1 = vshrl.u32 (!%p188_p2), %v226_v0, 7  ;;  %v236_v2 = vand.u32 (!%p188_p2), 127, %v226_v0  ;;  %v3140_v38 = vld [vmem:[%s4080_s1 + $0x108] ss:$16 sps:$4 sm:$0xff] (!%p188_p2)   ;;  %v3145_v39 = vld [vmem:[%s4080_s1 + $0x124] ss:$16 sps:$4 sm:$0xff] (!%p188_p2)  }
   0x8   : > { %v3148_v40 = vld [vmem:[%s4080_s1 + $0x12c] ss:$16 sps:$4 sm:$0xff] (!%p188_p2)   ;;  %v3143_v41 = vld [vmem:[%s4080_s1 + $0x120] ss:$16 sps:$4 sm:$0xff] (!%p188_p2)   ;;  %v3146_v46 = vld [vmem:[%s4080_s1 + $0x128] ss:$16 sps:$4 sm:$0xff] (!%p188_p2)  }
   0x9   : > { %v228_v3 = vadd.s32 (!%p188_p2), 8, %v3355_v1  ;;  %v3359_v4 = vadd.s32 (!%p188_p2), 1, %v236_v2  ;;  %v229_v6 = vadd.s32 (!%p188_p2), 16, %v3355_v1  ;;  %v230_v11 = vadd.s32 (!%p188_p2), 24, %v3355_v1  ;;  %v3151_v47 = vld [vmem:[%s4080_s1 + $0x144] ss:$16 sps:$4 sm:$0xff] (!%p188_p2)  }
   0xa   : > { %v231_v13 = vadd.s32 (!%p188_p2), 32, %v3355_v1  ;;  %v232_v15 = vadd.s32 (!%p188_p2), 40, %v3355_v1  ;;  %v2473_v16 = vadd.s32 (!%p188_p2), 4294967295, %v236_v2  ;;  %v233_v21 = vadd.s32 (!%p188_p2), 48, %v3355_v1  ;;  %v3154_v48 = vld [vmem:[%s4080_s1 + $0x14c] ss:$16 sps:$4 sm:$0xff] (!%p188_p2)  }
   0xb   : > { %vm238_vm1 = vcmp.eq.s32.totalorder (!%p188_p2), %v3355_v1, %v3359_v4  ;;  %vm239_vm2 = vcmp.eq.s32.totalorder (!%p188_p2), %v228_v3, %v3359_v4  ;;  %vm240_vm3 = vcmp.eq.s32.totalorder (!%p188_p2), %v229_v6, %v3359_v4  ;;  %vm241_vm4 = vcmp.eq.s32.totalorder (!%p188_p2), %v230_v11, %v3359_v4  ;;  %v3149_v51 = vld [vmem:[%s4080_s1 + $0x140] ss:$16 sps:$4 sm:$0xff] (!%p188_p2)   ;;  %v3152_v52 = vld [vmem:[%s4080_s1 + $0x148] ss:$16 sps:$4 sm:$0xff] (!%p188_p2)   ;;  %v3157_v53 = vld [vmem:[%s4080_s1 + $0x164] ss:$16 sps:$4 sm:$0xff] (!%p188_p2)  }
   0xc   : > { %v246_v9 = vsel (!%p188_p2), %vm238_vm1, 1.0, %v3313_v8  ;;  %v247_v10 = vsel (!%p188_p2), %vm239_vm2, 1.0, %v3313_v8  ;;  %vm242_vm5 = vcmp.eq.s32.totalorder (!%p188_p2), %v231_v13, %v3359_v4  ;;  %vm259_vm6 = vcmp.eq.s32.totalorder (!%p188_p2), %v3355_v1, %v2473_v16  ;;  %v3160_v54 = vld [vmem:[%s4080_s1 + $0x16c] ss:$16 sps:$4 sm:$0xff] (!%p188_p2)   ;;  %v3155_v55 = vld [vmem:[%s4080_s1 + $0x160] ss:$16 sps:$4 sm:$0xff] (!%p188_p2)  }
   0xd   : > { %s4086_s19 = smov (!%p215_p3, %s2464_s19), 1  ;;  %v3382_v12 = vpack.c.bf16 %v247_v10, %v246_v9  ;;  %vm260_vm7 = vcmp.eq.s32.totalorder %v228_v3, %v2473_v16  ;;  %v267_v18 = vsel %vm259_vm6, 1.0, %v3313_v8  ;;  %vm261_vm8 = vcmp.eq.s32.totalorder %v229_v6, %v2473_v16  ;;  %v3158_v57 = vld [vmem:[%s4080_s1 + $0x168] ss:$16 sps:$4 sm:$0xff]   ;;  %v3163_v58 = vld [vmem:[%s4080_s1 + $0x184] ss:$16 sps:$4 sm:$0xff]  }
   0xe   : > { %s2713_s20 = sshll.u32 %s4086_s19, 5  ;;  %v268_v19 = vsel %vm260_vm7, 1.0, %v3313_v8  ;;  %vm262_vm9 = vcmp.eq.s32.totalorder %v230_v11, %v2473_v16  ;;  %vm243_vm10 = vcmp.eq.s32.totalorder %v232_v15, %v3359_v4  ;;  %vm263_vm11 = vcmp.eq.s32.totalorder %v231_v13, %v2473_v16  ;;  %v3166_v59 = vld [vmem:[%s4080_s1 + $0x18c] ss:$16 sps:$4 sm:$0xff]   ;;  %v3161_v60 = vld [vmem:[%s4080_s1 + $0x180] ss:$16 sps:$4 sm:$0xff]  }
   0xf   : > { %s3364_s23 = scalar_lea.vmem %s4079_s0, %s2713_s20  ;;  %2827 = vmatprep.mubr.msk.bf16.mxu0 %vm311_vm0, %v3382_v12  ;;  %v3408_v20 = vpack.c.bf16 %v268_v19, %v267_v18  ;;  %vm264_vm12 = vcmp.eq.s32.totalorder %v232_v15, %v2473_v16  ;;  %v234_v22 = vadd.s32 56, %v3355_v1  ;;  %v248_v25 = vsel %vm240_vm3, 1.0, %v3313_v8  ;;  %v3164_v61 = vld [vmem:[%s4080_s1 + $0x188] ss:$16 sps:$4 sm:$0xff]   ;;  %v3169_v62 = vld [vmem:[%s4080_s1 + $0x1a4] ss:$16 sps:$4 sm:$0xff]  }
  0x10   : > { %v3367_v5 = vld [vmem:[%s3364_s23] sm:$0xff]   ;;  %v3374_v7 = vld [vmem:[%s3364_s23 + $0x8] sm:$0xff]   ;;  %v3388_v14 = vld [vmem:[%s3364_s23 + $0x10] sm:$0xff]   ;;  %v249_v26 = vsel %vm241_vm4, 1.0, %v3313_v8  ;;  %v269_v27 = vsel %vm261_vm8, 1.0, %v3313_v8  ;;  %v270_v28 = vsel %vm262_vm9, 1.0, %v3313_v8  ;;  %vm244_vm13 = vcmp.eq.s32.totalorder %v233_v21, %v3359_v4 }
  0x11   : > { %2819 = vmatprep.subr.bf16.mxu0 %v3367_v5  ;;  %2835 = vmatprep.subr.bf16.mxu1 %v3367_v5  ;;  %v3402_v17 = vld [vmem:[%s3364_s23 + $0x18] sm:$0xff]   ;;  %v250_v29 = vsel %vm242_vm5, 1.0, %v3313_v8  ;;  %v251_v30 = vsel %vm243_vm10, 1.0, %v3313_v8  ;;  %v271_v31 = vsel %vm263_vm11, 1.0, %v3313_v8  ;;  %v272_v32 = vsel %vm264_vm12, 1.0, %v3313_v8  ;;  %s2714_s13 = sshll.u32 %s4086_s19, 7 }
  0x12   : > { %2820 = vmatpush3.bf16.msra.mxu0 %v3367_v5  ;;  %2836 = vmatpush3.bf16.msra.mxu1 %v3367_v5  ;;  %v3442_v33 = vpack.c.bf16 %v249_v26, %v248_v25  ;;  %v3444_v34 = vpack.c.bf16 %v270_v28, %v269_v27  ;;  %v3447_v35 = vpack.c.bf16 %v251_v30, %v250_v29  ;;  %v252_v42 = vsel %vm244_vm13, 1.0, %v3313_v8  ;;  %v3172_v63 = vld [vmem:[%s4080_s1 + $0x1ac] ss:$16 sps:$4 sm:$0xff]   ;;  %v3167_v0 = vld [vmem:[%s4080_s1 + $0x1a0] ss:$16 sps:$4 sm:$0xff]   ;;  %s4030_s16 = scalar_lea.vmem %s4084_s5, %s2714_s13 }
  0x13   : > { %2821 = vmatprep.subr.bf16.mxu0 %v3374_v7  ;;  %2837 = vmatprep.subr.bf16.mxu1 %v3374_v7  ;;  %v3451_v36 = vpack.c.bf16 %v272_v32, %v271_v31  ;;  %vm245_vm14 = vcmp.eq.s32.totalorder %v234_v22, %v3359_v4  ;;  %vm265_vm15 = vcmp.eq.s32.totalorder %v233_v21, %v2473_v16  ;;  %v3170_v2 = vld [vmem:[%s4080_s1 + $0x1a8] ss:$16 sps:$4 sm:$0xff]   ;;  %v3175_v3 = vld [vmem:[%s4080_s1 + $0x1c4] ss:$16 sps:$4 sm:$0xff]   ;;  %v3178_v4 = vld [vmem:[%s4080_s1 + $0x1cc] ss:$16 sps:$4 sm:$0xff]  }
  0x14   : > { %2843 = vmatprep.mubr.msk.bf16.mxu1 %vm311_vm0, %v3408_v20  ;;  %vm266_vm1 = vcmp.eq.s32.totalorder %v234_v22, %v2473_v16  ;;  %v253_v43 = vsel %vm245_vm14, 1.0, %v3313_v8  ;;  %v273_v44 = vsel %vm265_vm15, 1.0, %v3313_v8  ;;  %v3173_v6 = vld [vmem:[%s4080_s1 + $0x1c0] ss:$16 sps:$4 sm:$0xff]   ;;  %v3181_v9 = vld [vmem:[%s4080_s1 + $0x1e4] ss:$16 sps:$4 sm:$0xff]  }
  0x15   : > { %v274_v45 = vsel %vm266_vm1, 1.0, %v3313_v8  ;;  %v3492_v49 = vpack.c.bf16 %v253_v43, %v252_v42  ;;  %v3176_v8 = vld [vmem:[%s4080_s1 + $0x1c8] ss:$16 sps:$4 sm:$0xff]   ;;  %v3184_v10 = vld [vmem:[%s4080_s1 + $0x1ec] ss:$16 sps:$4 sm:$0xff]  }
  0x16   : > { %2822 = vmatpush3.bf16.msra.mxu0 %v3374_v7  ;;  %2838 = vmatpush3.bf16.msra.mxu1 %v3374_v7  ;;  %v3494_v50 = vpack.c.bf16 %v274_v45, %v273_v44  ;;  %v3179_v11 = vld [vmem:[%s4080_s1 + $0x1e0] ss:$16 sps:$4 sm:$0xff]   ;;  %v3182_v13 = vld [vmem:[%s4080_s1 + $0x1e8] ss:$16 sps:$4 sm:$0xff]   ;;  %v3187_v15 = vld [vmem:[%s4080_s1 + $0x4] ss:$16 sps:$4 sm:$0xff]  }
  0x17   : > { %2823 = vmatprep.subr.bf16.mxu0 %v3388_v14  ;;  %2839 = vmatprep.subr.bf16.mxu1 %v3388_v14  ;;  %v3190_v16 = vld [vmem:[%s4080_s1 + $0xc] ss:$16 sps:$4 sm:$0xff]   ;;  %v3185_v18 = vld [vmem:[%s4080_s1] ss:$16 sps:$4 sm:$0xff]   ;;  %v3188_v19 = vld [vmem:[%s4080_s1 + $0x8] ss:$16 sps:$4 sm:$0xff]  }
  0x18   : > { %v3193_v21 = vld [vmem:[%s4080_s1 + $0x24] ss:$16 sps:$4 sm:$0xff]   ;;  %v3196_v22 = vld [vmem:[%s4080_s1 + $0x2c] ss:$16 sps:$4 sm:$0xff]   ;;  %v3200_v27 = vld [vmem:[%s4080_s1 + $0x48] ss:$16 sps:$4 sm:$0xff]  }
  0x19   : > { %v3199_v25 = vld [vmem:[%s4080_s1 + $0x44] ss:$16 sps:$4 sm:$0xff]   ;;  %v3202_v26 = vld [vmem:[%s4080_s1 + $0x4c] ss:$16 sps:$4 sm:$0xff]   ;;  %v3203_v30 = vld [vmem:[%s4080_s1 + $0x60] ss:$16 sps:$4 sm:$0xff]  }
  0x1a   : > { %2824 = vmatpush3.bf16.msra.mxu0 %v3388_v14  ;;  %2840 = vmatpush3.bf16.msra.mxu1 %v3388_v14  ;;  %v3205_v28 = vld [vmem:[%s4080_s1 + $0x64] ss:$16 sps:$4 sm:$0xff]   ;;  %v3208_v29 = vld [vmem:[%s4080_s1 + $0x6c] ss:$16 sps:$4 sm:$0xff]   ;;  %v3206_v31 = vld [vmem:[%s4080_s1 + $0x68] ss:$16 sps:$4 sm:$0xff]  }
  0x1b   : > { %2825 = vmatprep.subr.bf16.mxu0 %v3402_v17  ;;  %2841 = vmatprep.subr.bf16.mxu1 %v3402_v17  ;;  %v3211_v32 = vld [vmem:[%s4080_s1 + $0x84] ss:$16 sps:$4 sm:$0xff]   ;;  %v3218_v42 = vld [vmem:[%s4080_s1 + $0xa8] ss:$16 sps:$4 sm:$0xff]   ;;  %v3226_v44 = vld [vmem:[%s4080_s1 + $0xcc] ss:$16 sps:$4 sm:$0xff]  }
  0x1c   : > { %v3223_v43 = vld [vmem:[%s4080_s1 + $0xc4] ss:$16 sps:$4 sm:$0xff]   ;;  %v3224_v45 = vld [vmem:[%s4080_s1 + $0xc8] ss:$16 sps:$4 sm:$0xff]  }
  0x1e   : > { %2826 = vmatpush3.bf16.msra.mxu0 %v3402_v17  ;;  %2842 = vmatpush3.bf16.msra.mxu1 %v3402_v17 }
  0x1f   : > { %699 = vmatprep.subr.bf16.mxu0 %v3139_v23  ;;  %772 = vmatprep.subr.bf16.mxu1 %v3142_v24  ;;  %v3191_v23 = vld [vmem:[%s4080_s1 + $0x20] ss:$16 sps:$4 sm:$0xff]   ;;  %v3194_v24 = vld [vmem:[%s4080_s1 + $0x28] ss:$16 sps:$4 sm:$0xff]  }
  0x21   : > { %2828 = vmatmul.mubr.msk.bf16.vlgmr.msra.gmra.mrb[0].mxu0 %vm311_vm0, %v3442_v33  ;;  %2844 = vmatmul.mubr.msk.bf16.vlgmr.msra.gmra.mrb[0].mxu1 %vm311_vm0, %v3444_v34 }
  0x22   : > { %2831 = vmatprep.mubr.msk.bf16.mxu0 %vm311_vm0, %v3447_v35  ;;  %2847 = vmatprep.mubr.msk.bf16.mxu1 %vm311_vm0, %v3451_v36 }
  0x23   : > { %700 = vmatpush1.bf16.msra.mxu0 %v3137_v37  ;;  %773 = vmatpush1.bf16.msra.mxu1 %v3140_v38  ;;  %v3214_v37 = vld [vmem:[%s4080_s1 + $0x8c] ss:$16 sps:$4 sm:$0xff]   ;;  %v3212_v38 = vld [vmem:[%s4080_s1 + $0x88] ss:$16 sps:$4 sm:$0xff]  }
  0x24   : > { %701 = vmatprep.subr.bf16.mxu0 %v3145_v39  ;;  %774 = vmatprep.subr.bf16.mxu1 %v3148_v40  ;;  %v3217_v39 = vld [vmem:[%s4080_s1 + $0xa4] ss:$16 sps:$4 sm:$0xff]   ;;  %v3220_v40 = vld [vmem:[%s4080_s1 + $0xac] ss:$16 sps:$4 sm:$0xff]  }
  0x27   : > { %702 = vmatpush1.bf16.msra.mxu0 %v3143_v41  ;;  %775 = vmatpush1.bf16.msra.mxu1 %v3146_v46  ;;  %v3215_v41 = vld [vmem:[%s4080_s1 + $0xa0] ss:$16 sps:$4 sm:$0xff]   ;;  %v3229_v46 = vld [vmem:[%s4080_s1 + $0xe4] ss:$16 sps:$4 sm:$0xff]  }
  0x28   : > { %703 = vmatprep.subr.bf16.mxu0 %v3151_v47  ;;  %776 = vmatprep.subr.bf16.mxu1 %v3154_v48  ;;  %v3232_v47 = vld [vmem:[%s4080_s1 + $0xec] ss:$16 sps:$4 sm:$0xff]   ;;  %v3227_v48 = vld [vmem:[%s4080_s1 + $0xe0] ss:$16 sps:$4 sm:$0xff]  }
  0x29   : > { %2832 = vmatmul.mubr.msk.bf16.gmra.mrb[4].mxu0 %vm311_vm0, %v3492_v49  ;;  %2848 = vmatmul.mubr.msk.bf16.gmra.mrb[4].mxu1 %vm311_vm0, %v3494_v50 }
  0x2a   : > { %731 = vmatprep.mubr.bf16.mxu0 %v3314_v56  ;;  %804 = vmatprep.mubr.bf16.mxu1 %v3314_v56 }
  0x2b   : > { %704 = vmatpush1.bf16.msra.mxu0 %v3149_v51  ;;  %777 = vmatpush1.bf16.msra.mxu1 %v3152_v52  ;;  %v3235_v51 = vld [vmem:[%s4080_s1 + $0x204] ss:$16 sps:$4 sm:$0xff]   ;;  %v3238_v52 = vld [vmem:[%s4080_s1 + $0x20c] ss:$16 sps:$4 sm:$0xff]  }
  0x2c   : > { %705 = vmatprep.subr.bf16.mxu0 %v3157_v53  ;;  %778 = vmatprep.subr.bf16.mxu1 %v3160_v54 }
  0x2f   : > { %706 = vmatpush1.bf16.msra.mxu0 %v3155_v55  ;;  %779 = vmatpush1.bf16.msra.mxu1 %v3158_v57 }
  0x30   : > { %707 = vmatprep.subr.bf16.mxu0 %v3163_v58  ;;  %780 = vmatprep.subr.bf16.mxu1 %v3166_v59 }
  0x33   : > { %708 = vmatpush1.bf16.msra.mxu0 %v3161_v60  ;;  %781 = vmatpush1.bf16.msra.mxu1 %v3164_v61 }
  0x34   : > { %709 = vmatprep.subr.bf16.mxu0 %v3169_v62  ;;  %782 = vmatprep.subr.bf16.mxu1 %v3172_v63  ;;  %v3233_v62 = vld [vmem:[%s4080_s1 + $0x200] ss:$16 sps:$4 sm:$0xff]   ;;  %v3236_v63 = vld [vmem:[%s4080_s1 + $0x208] ss:$16 sps:$4 sm:$0xff]  }
  0x37   : > { %710 = vmatpush1.bf16.msra.mxu0 %v3167_v0  ;;  %783 = vmatpush1.bf16.msra.mxu1 %v3170_v2 }
  0x38   : > { %711 = vmatprep.subr.bf16.mxu0 %v3175_v3  ;;  %784 = vmatprep.subr.bf16.mxu1 %v3178_v4  ;;  %v3241_v4 = vld [vmem:[%s4080_s1 + $0x224] ss:$16 sps:$4 sm:$0xff]  }
  0x3b   : > { %712 = vmatpush1.bf16.msra.mxu0 %v3173_v6  ;;  %785 = vmatpush1.bf16.msra.mxu1 %v3176_v8  ;;  %v3244_v6 = vld [vmem:[%s4080_s1 + $0x22c] ss:$16 sps:$4 sm:$0xff]  }
  0x3c   : > { %713 = vmatprep.subr.bf16.mxu0 %v3181_v9  ;;  %786 = vmatprep.subr.bf16.mxu1 %v3184_v10  ;;  %v3239_v9 = vld [vmem:[%s4080_s1 + $0x220] ss:$16 sps:$4 sm:$0xff]   ;;  %v3242_v10 = vld [vmem:[%s4080_s1 + $0x228] ss:$16 sps:$4 sm:$0xff]  }
  0x3f   : > { %714 = vmatpush1.bf16.msra.mxu0 %v3179_v11  ;;  %787 = vmatpush1.bf16.msra.mxu1 %v3182_v13  ;;  %v3247_v13 = vld [vmem:[%s4080_s1 + $0x244] ss:$16 sps:$4 sm:$0xff]  }
  0x40   : > { %1005 = vmatprep.subr.bf16.mxu0 %v3187_v15  ;;  %1078 = vmatprep.subr.bf16.mxu1 %v3190_v16  ;;  %v3250_v15 = vld [vmem:[%s4080_s1 + $0x24c] ss:$16 sps:$4 sm:$0xff]  }
  0x42   : > { %732 = vmatmul.mubr.bf16.vlgmr.msra.gmra.mrb[8].mxu0 %v3367_v5  ;;  %805 = vmatmul.mubr.bf16.vlgmr.msra.gmra.mrb[8].mxu1 %v3367_v5  ;;  %v3197_v5 = vld [vmem:[%s4080_s1 + $0x40] ss:$16 sps:$4 sm:$0xff]  }
  0x43   : > { %1006 = vmatpush1.bf16.msra.mxu0 %v3185_v18  ;;  %1079 = vmatpush1.bf16.msra.mxu1 %v3188_v19 }
  0x44   : > { %1007 = vmatprep.subr.bf16.mxu0 %v3193_v21  ;;  %1080 = vmatprep.subr.bf16.mxu1 %v3196_v22 }
  0x45   : > { %741 = vmatprep.mubr.bf16.mxu0 %v3314_v56  ;;  %814 = vmatprep.mubr.bf16.mxu1 %v3314_v56 }
  0x47   : > { %1008 = vmatpush1.bf16.msra.mxu0 %v3191_v23  ;;  %1081 = vmatpush1.bf16.msra.mxu1 %v3194_v24  ;;  %v3245_v23 = vld [vmem:[%s4080_s1 + $0x240] ss:$16 sps:$4 sm:$0xff]   ;;  %v3248_v24 = vld [vmem:[%s4080_s1 + $0x248] ss:$16 sps:$4 sm:$0xff]  }
  0x48   : > { %1009 = vmatprep.subr.bf16.mxu0 %v3199_v25  ;;  %1082 = vmatprep.subr.bf16.mxu1 %v3202_v26 }
  0x4a   : > { %742 = vmatmul.mubr.bf16.gmra.mrb[12].mxu0 %v3374_v7  ;;  %815 = vmatmul.mubr.bf16.gmra.mrb[12].mxu1 %v3374_v7  ;;  %v3209_v7 = vld [vmem:[%s4080_s1 + $0x80] ss:$16 sps:$4 sm:$0xff]  }
  0x4b   : > { %1010 = vmatpush1.bf16.msra.mxu0 %v3197_v5  ;;  %1083 = vmatpush1.bf16.msra.mxu1 %v3200_v27 }
  0x4c   : > { %1011 = vmatprep.subr.bf16.mxu0 %v3205_v28  ;;  %1084 = vmatprep.subr.bf16.mxu1 %v3208_v29  ;;  %v3253_v29 = vld [vmem:[%s4080_s1 + $0x264] ss:$16 sps:$4 sm:$0xff]  }
  0x4d   : > { %751 = vmatprep.mubr.bf16.mxu0 %v3314_v56  ;;  %824 = vmatprep.mubr.bf16.mxu1 %v3314_v56 }
  0x4f   : > { %1012 = vmatpush1.bf16.msra.mxu0 %v3203_v30  ;;  %1085 = vmatpush1.bf16.msra.mxu1 %v3206_v31  ;;  %v3256_v30 = vld [vmem:[%s4080_s1 + $0x26c] ss:$16 sps:$4 sm:$0xff]  }
  0x50   : > { %1013 = vmatprep.subr.bf16.mxu0 %v3211_v32  ;;  %1086 = vmatprep.subr.bf16.mxu1 %v3214_v37  ;;  %v3251_v32 = vld [vmem:[%s4080_s1 + $0x260] ss:$16 sps:$4 sm:$0xff]   ;;  %v3254_v37 = vld [vmem:[%s4080_s1 + $0x268] ss:$16 sps:$4 sm:$0xff]  }
  0x52   : > { %752 = vmatmul.mubr.bf16.gmra.mrb[16].mxu0 %v3388_v14  ;;  %825 = vmatmul.mubr.bf16.gmra.mrb[16].mxu1 %v3388_v14  ;;  %v3221_v14 = vld [vmem:[%s4080_s1 + $0xc0] ss:$16 sps:$4 sm:$0xff]  }
  0x53   : > { %1014 = vmatpush1.bf16.msra.mxu0 %v3209_v7  ;;  %1087 = vmatpush1.bf16.msra.mxu1 %v3212_v38  ;;  %v3259_v7 = vld [vmem:[%s4080_s1 + $0x284] ss:$16 sps:$4 sm:$0xff]   ;;  %v3262_v38 = vld [vmem:[%s4080_s1 + $0x28c] ss:$16 sps:$4 sm:$0xff]  }
  0x54   : > { %1015 = vmatprep.subr.bf16.mxu0 %v3217_v39  ;;  %1088 = vmatprep.subr.bf16.mxu1 %v3220_v40  ;;  %v3257_v39 = vld [vmem:[%s4080_s1 + $0x280] ss:$16 sps:$4 sm:$0xff]   ;;  %v3260_v40 = vld [vmem:[%s4080_s1 + $0x288] ss:$16 sps:$4 sm:$0xff]  }
  0x55   : > { %761 = vmatprep.mubr.bf16.mxu0 %v3314_v56  ;;  %834 = vmatprep.mubr.bf16.mxu1 %v3314_v56 }
  0x57   : > { %1016 = vmatpush1.bf16.msra.mxu0 %v3215_v41  ;;  %1089 = vmatpush1.bf16.msra.mxu1 %v3218_v42  ;;  %v3265_v41 = vld [vmem:[%s4080_s1 + $0x2a4] ss:$16 sps:$4 sm:$0xff]   ;;  %v3268_v42 = vld [vmem:[%s4080_s1 + $0x2ac] ss:$16 sps:$4 sm:$0xff]  }
  0x58   : > { %1017 = vmatprep.subr.bf16.mxu0 %v3223_v43  ;;  %1090 = vmatprep.subr.bf16.mxu1 %v3226_v44  ;;  %v3263_v43 = vld [vmem:[%s4080_s1 + $0x2a0] ss:$16 sps:$4 sm:$0xff]   ;;  %v3266_v44 = vld [vmem:[%s4080_s1 + $0x2a8] ss:$16 sps:$4 sm:$0xff]  }
  0x5a   : > { %762 = vmatmul.mubr.bf16.gmra.mrb[20].mxu0 %v3402_v17  ;;  %835 = vmatmul.mubr.bf16.gmra.mrb[20].mxu1 %v3402_v17  ;;  %v3230_v17 = vld [vmem:[%s4080_s1 + $0xe8] ss:$16 sps:$4 sm:$0xff]  }
  0x5b   : > { %1018 = vmatpush1.bf16.msra.mxu0 %v3221_v14  ;;  %1091 = vmatpush1.bf16.msra.mxu1 %v3224_v45  ;;  %v3271_v14 = vld [vmem:[%s4080_s1 + $0x2c4] ss:$16 sps:$4 sm:$0xff]   ;;  %v3274_v45 = vld [vmem:[%s4080_s1 + $0x2cc] ss:$16 sps:$4 sm:$0xff]  }
  0x5c   : > { %1037 = vmatprep.mubr.bf16.mxu0 %v3314_v56  ;;  %1110 = vmatprep.mubr.bf16.mxu1 %v3314_v56 }
  0x5d   : > { %1019 = vmatprep.subr.bf16.mxu0 %v3229_v46  ;;  %1092 = vmatprep.subr.bf16.mxu1 %v3232_v47  ;;  %v3269_v46 = vld [vmem:[%s4080_s1 + $0x2c0] ss:$16 sps:$4 sm:$0xff]   ;;  %v3272_v47 = vld [vmem:[%s4080_s1 + $0x2c8] ss:$16 sps:$4 sm:$0xff]  }
  0x5f   : > { %1020 = vmatpush1.bf16.msra.mxu0 %v3227_v48  ;;  %1093 = vmatpush1.bf16.msra.mxu1 %v3230_v17  ;;  %v3277_v48 = vld [vmem:[%s4080_s1 + $0x2e4] ss:$16 sps:$4 sm:$0xff]   ;;  %v3280_v17 = vld [vmem:[%s4080_s1 + $0x2ec] ss:$16 sps:$4 sm:$0xff]  }
  0x60   : > { %1344 = vmatprep.subr.bf16.mxu0 %v3235_v51  ;;  %1417 = vmatprep.subr.bf16.mxu1 %v3238_v52  ;;  %v3275_v51 = vld [vmem:[%s4080_s1 + $0x2e0] ss:$16 sps:$4 sm:$0xff]   ;;  %v3278_v52 = vld [vmem:[%s4080_s1 + $0x2e8] ss:$16 sps:$4 sm:$0xff]  }
  0xf4   : > { %v2829_v53 = vpop.f32.mrb[0].mxu0  ;;  %v2845_v54 = vpop.f32.mrb[0].mxu1 }
  0xf5   : > { %v358_v55 = vpop.f32.mrb[1].mxu0  ;;  %v439_v57 = vpop.f32.mrb[1].mxu1 }
  0xf6   : > { %v2830_v58 = vpop.f32.mrb[2].mxu0  ;;  %v2846_v59 = vpop.f32.mrb[2].mxu1 }
  0xf7   : > { %v390_v60 = vpack.c.bf16 %v2830_v58, %v2829_v53  ;;  %v361_v61 = vpop.f32.mrb[3].mxu0  ;;  %v3692_v0 = vpack.c.bf16 %v2846_v59, %v2845_v54  ;;  %v442_v2 = vpop.f32.mrb[3].mxu1  ;;  %v1526_v53 = vsub.s32 0, %v3355_v1  ;;  %v1534_v54 = vsub.s32 2, %v3355_v1 }
  0xf8   : > { %v389_v3 = vpack.c.bf16 %v361_v61, %v358_v55  ;;  %v3700_v8 = vpack.c.bf16 %v442_v2, %v439_v57  ;;  %v1522_v55 = vld [vmem:[%s4081_s2] sm:$0xf]  ;;  %v1538_v57 = vsub.s32 3, %v3355_v1 }
  0xf9   : > { %v3813_v58 = vrot.slane %v1522_v55, %v1526_v53  ;;  %v3815_v59 = vrot.slane %v1522_v55, %v1534_v54 }
  0xfa   : > { %1038 = vmatmul.mubr.bf16.vlgmr.msra.gmra.mrb[8].mxu0 %v389_v3  ;;  %1111 = vmatmul.mubr.bf16.vlgmr.msra.gmra.mrb[8].mxu1 %v389_v3 }
  0xfb   : > { %1345 = vmatpush1.bf16.msra.mxu0 %v3233_v62  ;;  %1418 = vmatpush1.bf16.msra.mxu1 %v3236_v63 }
  0xfc   : > { %1346 = vmatprep.subr.bf16.mxu0 %v3241_v4  ;;  %1419 = vmatprep.subr.bf16.mxu1 %v3244_v6  ;;  %v2833_v11 = vpop.f32.mrb[4].mxu0  ;;  %v2849_v16 = vpop.f32.mrb[4].mxu1 }
  0xfd   : > { %1047 = vmatprep.mubr.bf16.mxu0 %v3314_v56  ;;  %1120 = vmatprep.mubr.bf16.mxu1 %v3314_v56  ;;  %v374_v18 = vpop.f32.mrb[5].mxu0  ;;  %v455_v19 = vpop.f32.mrb[5].mxu1 }
  0xfe   : > { %v2834_v21 = vpop.f32.mrb[6].mxu0  ;;  %v2850_v22 = vpop.f32.mrb[6].mxu1 }
  0xff   : > { %1347 = vmatpush1.bf16.msra.mxu0 %v3239_v9  ;;  %1420 = vmatpush1.bf16.msra.mxu1 %v3242_v10  ;;  %v392_v25 = vpack.c.bf16 %v2834_v21, %v2833_v11  ;;  %v377_v26 = vpop.f32.mrb[7].mxu0  ;;  %v3722_v5 = vpack.c.bf16 %v2850_v22, %v2849_v16  ;;  %v458_v27 = vpop.f32.mrb[7].mxu1 }
 0x100   : > { %1348 = vmatprep.subr.bf16.mxu0 %v3247_v13  ;;  %1421 = vmatprep.subr.bf16.mxu1 %v3250_v15  ;;  %v391_v28 = vpack.c.bf16 %v377_v26, %v374_v18  ;;  %v472_v31 = vpack.c.bf16 %v458_v27, %v455_v19 }
 0x102   : > { %1048 = vmatmul.mubr.bf16.gmra.mrb[12].mxu0 %v390_v60  ;;  %1121 = vmatmul.mubr.bf16.gmra.mrb[12].mxu1 %v390_v60  ;;  %v3819_v60 = vrot.slane %v1522_v55, %v1538_v57 }
 0x103   : > { %1349 = vmatpush1.bf16.msra.mxu0 %v3245_v23  ;;  %1422 = vmatpush1.bf16.msra.mxu1 %v3248_v24 }
 0x104   : > { %1350 = vmatprep.subr.bf16.mxu0 %v3253_v29  ;;  %1423 = vmatprep.subr.bf16.mxu1 %v3256_v30 }
 0x105   : > { %1057 = vmatprep.mubr.bf16.mxu0 %v3314_v56  ;;  %1130 = vmatprep.mubr.bf16.mxu1 %v3314_v56 }
 0x107   : > { %1351 = vmatpush1.bf16.msra.mxu0 %v3251_v32  ;;  %1424 = vmatpush1.bf16.msra.mxu1 %v3254_v37 }
 0x108   : > { %1352 = vmatprep.subr.bf16.mxu0 %v3259_v7  ;;  %1425 = vmatprep.subr.bf16.mxu1 %v3262_v38 }
 0x10a   : > { %1058 = vmatmul.mubr.bf16.gmra.mrb[16].mxu0 %v391_v28  ;;  %1131 = vmatmul.mubr.bf16.gmra.mrb[16].mxu1 %v391_v28 }
 0x10b   : > { %1353 = vmatpush1.bf16.msra.mxu0 %v3257_v39  ;;  %1426 = vmatpush1.bf16.msra.mxu1 %v3260_v40 }
 0x10c   : > { %1354 = vmatprep.subr.bf16.mxu0 %v3265_v41  ;;  %1427 = vmatprep.subr.bf16.mxu1 %v3268_v42 }
 0x10d   : > { %1067 = vmatprep.mubr.bf16.mxu0 %v3314_v56  ;;  %1140 = vmatprep.mubr.bf16.mxu1 %v3314_v56 }
 0x10f   : > { %1355 = vmatpush1.bf16.msra.mxu0 %v3263_v43  ;;  %1428 = vmatpush1.bf16.msra.mxu1 %v3266_v44 }
 0x110   : > { %1356 = vmatprep.subr.bf16.mxu0 %v3271_v14  ;;  %1429 = vmatprep.subr.bf16.mxu1 %v3274_v45 }
 0x112   : > { %1068 = vmatmul.mubr.bf16.gmra.mrb[20].mxu0 %v392_v25  ;;  %1141 = vmatmul.mubr.bf16.gmra.mrb[20].mxu1 %v392_v25 }
 0x113   : > { %1357 = vmatpush1.bf16.msra.mxu0 %v3269_v46  ;;  %1430 = vmatpush1.bf16.msra.mxu1 %v3272_v47 }
 0x114   : > { %1358 = vmatprep.subr.bf16.mxu0 %v3277_v48  ;;  %1431 = vmatprep.subr.bf16.mxu1 %v3280_v17 }
 0x115   : > { %1376 = vmatprep.mubr.bf16.mxu0 %v3314_v56  ;;  %1449 = vmatprep.mubr.bf16.mxu1 %v3314_v56 }
 0x117   : > { %1359 = vmatpush1.bf16.msra.mxu0 %v3275_v51  ;;  %1432 = vmatpush1.bf16.msra.mxu1 %v3278_v52 }
 0x11a   : > { %1377 = vmatmul.mubr.bf16.vlgmr.msra.gmra.mrb[8].mxu0 %v3700_v8  ;;  %1450 = vmatmul.mubr.bf16.vlgmr.msra.gmra.mrb[8].mxu1 %v3700_v8 }
 0x11b   : > { %1386 = vmatprep.mubr.bf16.mxu0 %v3314_v56  ;;  %1459 = vmatprep.mubr.bf16.mxu1 %v3314_v56 }
 0x122   : > { %1387 = vmatmul.mubr.bf16.gmra.mrb[12].mxu0 %v3692_v0  ;;  %1460 = vmatmul.mubr.bf16.gmra.mrb[12].mxu1 %v3692_v0 }
 0x123   : > { %1396 = vmatprep.mubr.bf16.mxu0 %v3314_v56  ;;  %1469 = vmatprep.mubr.bf16.mxu1 %v3314_v56 }
 0x12a   : > { %1397 = vmatmul.mubr.bf16.gmra.mrb[16].mxu0 %v472_v31  ;;  %1470 = vmatmul.mubr.bf16.gmra.mrb[16].mxu1 %v472_v31 }
 0x12b   : > { %1406 = vmatprep.mubr.bf16.mxu0 %v3314_v56  ;;  %1479 = vmatprep.mubr.bf16.mxu1 %v3314_v56  ;;  %v1530_v56 = vsub.s32 1, %v3355_v1 }
 0x132   : > { %1407 = vmatmul.mubr.bf16.gmra.mrb[20].mxu0 %v3722_v5  ;;  %1480 = vmatmul.mubr.bf16.gmra.mrb[20].mxu1 %v3722_v5 }
 0x133   : > { %2875 = vmatprep.mubr.msk.bf16.mxu1 %vm311_vm0, %v3408_v20  ;;  %2859 = vmatprep.mubr.msk.bf16.mxu0 %vm311_vm0, %v3382_v12  ;;  %v3817_v20 = vrot.slane %v1522_v55, %v1530_v56 }
 0x1ed   : > { %v1378_v12 = vpop.f32.mrb[8].mxu0  ;;  %v1451_v61 = vpop.f32.mrb[8].mxu1 }
 0x1ee   : > { %v1544_v62 = vadd.f32 %v3813_v58, %v1378_v12  ;;  %v3823_v63 = vadd.f32 %v3815_v59, %v1451_v61  ;;  %v1380_v0 = vpop.f32.mrb[9].mxu0  ;;  %v1453_v2 = vpop.f32.mrb[9].mxu1 }
 0x1ef   : > { %v1545_v3 = vadd.f32 %v3817_v20, %v1380_v0  ;;  %v3827_v1 = vadd.f32 %v3819_v60, %v1453_v2  ;;  %v1382_v4 = vpop.f32.mrb[10].mxu0  ;;  %v1455_v6 = vpop.f32.mrb[10].mxu1 }
 0x1f0   : > { %v1548_v8 = vadd.f32 %v3813_v58, %v1382_v4  ;;  %v3831_v9 = vadd.f32 %v3815_v59, %v1455_v6  ;;  %v1384_v10 = vpop.f32.mrb[11].mxu0  ;;  %v1457_v11 = vpop.f32.mrb[11].mxu1  ;;  %v1576_v16 = vmax.f32 %v1544_v62, 0.0 }
 0x1f1   : > { %v1549_v13 = vadd.f32 %v3817_v20, %v1384_v10  ;;  %v3835_v15 = vadd.f32 %v3819_v60, %v1457_v11  ;;  %v1577_v19 = vmax.f32 %v1545_v3, 0.0 }
 0x1f2   : > { %v1578_v18 = vmax.f32 %v1548_v8, 0.0 }
 0x1f3   : > { %v1579_v21 = vmax.f32 %v1549_v13, 0.0 }
 0x1f4   : > { %v3837_v22 = vpack.c.bf16 %v1578_v18, %v1576_v16 }
 0x1f5   : > { %v3839_v23 = vpack.c.bf16 %v1579_v21, %v1577_v19  ;;  %v1388_v24 = vpop.f32.mrb[12].mxu0  ;;  %v1461_v25 = vpop.f32.mrb[12].mxu1 }
 0x1f6   : > { %v1552_v26 = vadd.f32 %v3813_v58, %v1388_v24  ;;  %v3843_v5 = vadd.f32 %v3815_v59, %v1461_v25  ;;  %v1390_v27 = vpop.f32.mrb[13].mxu0  ;;  %v1463_v28 = vpop.f32.mrb[13].mxu1  ;;  %2867 = vmatprep.subr.bf16.mxu1 %v3837_v22 }
 0x1f7   : > { %v1553_v29 = vadd.f32 %v3817_v20, %v1390_v27  ;;  %v3848_v30 = vadd.f32 %v3819_v60, %v1463_v28  ;;  %v1392_v31 = vpop.f32.mrb[14].mxu0  ;;  %v1465_v32 = vpop.f32.mrb[14].mxu1  ;;  %2851 = vmatprep.subr.bf16.mxu0 %v3839_v23  ;;  %2868 = vmatpush3.bf16.msra.mxu1 %v3837_v22 }
 0x1f8   : > { %v1556_v37 = vadd.f32 %v3813_v58, %v1392_v31  ;;  %v3854_v7 = vadd.f32 %v3815_v59, %v1465_v32  ;;  %v1394_v38 = vpop.f32.mrb[15].mxu0  ;;  %v1467_v39 = vpop.f32.mrb[15].mxu1  ;;  %2852 = vmatpush3.bf16.msra.mxu0 %v3839_v23  ;;  %v1580_v42 = vmax.f32 %v1552_v26, 0.0 }
 0x1f9   : > { %v1557_v40 = vadd.f32 %v3817_v20, %v1394_v38  ;;  %v3859_v41 = vadd.f32 %v3819_v60, %v1467_v39  ;;  %v1581_v44 = vmax.f32 %v1553_v29, 0.0 }
 0x1fa   : > { %v1582_v43 = vmax.f32 %v1556_v37, 0.0 }
 0x1fb   : > { %v1583_v14 = vmax.f32 %v1557_v40, 0.0 }
 0x1fc   : > { %v3861_v45 = vpack.c.bf16 %v1582_v43, %v1580_v42 }
 0x1fd   : > { %v3863_v46 = vpack.c.bf16 %v1583_v14, %v1581_v44  ;;  %v1398_v47 = vpop.f32.mrb[16].mxu0  ;;  %v1471_v48 = vpop.f32.mrb[16].mxu1 }
 0x1fe   : > { %v1560_v17 = vadd.f32 %v3813_v58, %v1398_v47  ;;  %v3867_v51 = vadd.f32 %v3815_v59, %v1471_v48  ;;  %v1400_v52 = vpop.f32.mrb[17].mxu0  ;;  %v1473_v53 = vpop.f32.mrb[17].mxu1  ;;  %2869 = vmatprep.subr.bf16.mxu1 %v3861_v45  ;;  %v3290_v48 = vld [vmem:[%s4082_s3 + $0x8] sm:$0xff]  }
 0x1ff   : > { %v1561_v54 = vadd.f32 %v3817_v20, %v1400_v52  ;;  %v3872_v55 = vadd.f32 %v3819_v60, %v1473_v53  ;;  %v1402_v56 = vpop.f32.mrb[18].mxu0  ;;  %v1475_v57 = vpop.f32.mrb[18].mxu1  ;;  %2853 = vmatprep.subr.bf16.mxu0 %v3863_v46  ;;  %2870 = vmatpush3.bf16.msra.mxu1 %v3861_v45  ;;  %v3292_v52 = vld [vmem:[%s4082_s3 + $0x18] sm:$0xff]   ;;  %v3293_v53 = vld [vmem:[%s4082_s3 + $0x20] sm:$0xff]  }
 0x200   : > { %v1564_v12 = vadd.f32 %v3813_v58, %v1402_v56  ;;  %v3878_v61 = vadd.f32 %v3815_v59, %v1475_v57  ;;  %v1404_v62 = vpop.f32.mrb[19].mxu0  ;;  %v1477_v0 = vpop.f32.mrb[19].mxu1  ;;  %2854 = vmatpush3.bf16.msra.mxu0 %v3863_v46  ;;  %v1584_v4 = vmax.f32 %v1560_v17, 0.0  ;;  %v3291_v17 = vld [vmem:[%s4082_s3 + $0x10] sm:$0xff]   ;;  %v3296_v56 = vld [vmem:[%s4082_s3 + $0x38] sm:$0xff]   ;;  %v3297_v57 = vld [vmem:[%s4082_s3 + $0x80] sm:$0xff]  }
 0x201   : > { %v1565_v2 = vadd.f32 %v3817_v20, %v1404_v62  ;;  %v3883_v3 = vadd.f32 %v3819_v60, %v1477_v0  ;;  %v1585_v8 = vmax.f32 %v1561_v54, 0.0  ;;  %v3294_v54 = vld [vmem:[%s4082_s3 + $0x28] sm:$0xff]   ;;  %v3299_v62 = vld [vmem:[%s4082_s3 + $0x90] sm:$0xff]   ;;  %v3300_v0 = vld [vmem:[%s4082_s3 + $0x98] sm:$0xff]  }
 0x202   : > { %v1586_v6 = vmax.f32 %v1564_v12, 0.0  ;;  %v3298_v12 = vld [vmem:[%s4082_s3 + $0x88] sm:$0xff]  }
 0x203   : > { %v1587_v10 = vmax.f32 %v1565_v2, 0.0  ;;  %v3302_v2 = vld [vmem:[%s4082_s3 + $0xa8] sm:$0xff]  }
 0x204   : > { %v3885_v11 = vpack.c.bf16 %v1586_v6, %v1584_v4  ;;  %v3303_v4 = vld [vmem:[%s4082_s3 + $0xb0] sm:$0xff]   ;;  %v3304_v6 = vld [vmem:[%s4082_s3 + $0xb8] sm:$0xff]  }
 0x205   : > { %v3887_v13 = vpack.c.bf16 %v1587_v10, %v1585_v8  ;;  %v1408_v16 = vpop.f32.mrb[20].mxu0  ;;  %v1481_v18 = vpop.f32.mrb[20].mxu1 }
 0x206   : > { %v1568_v19 = vadd.f32 %v3813_v58, %v1408_v16  ;;  %v3891_v21 = vadd.f32 %v3815_v59, %v1481_v18  ;;  %v1410_v24 = vpop.f32.mrb[21].mxu0  ;;  %v1483_v25 = vpop.f32.mrb[21].mxu1  ;;  %2871 = vmatprep.subr.bf16.mxu1 %v3885_v11 }
 0x207   : > { %v1569_v26 = vadd.f32 %v3817_v20, %v1410_v24  ;;  %v3896_v27 = vadd.f32 %v3819_v60, %v1483_v25  ;;  %v1412_v28 = vpop.f32.mrb[22].mxu0  ;;  %v1485_v29 = vpop.f32.mrb[22].mxu1  ;;  %2855 = vmatprep.subr.bf16.mxu0 %v3887_v13  ;;  %2872 = vmatpush3.bf16.msra.mxu1 %v3885_v11 }
 0x208   : > { %v1572_v31 = vadd.f32 %v3813_v58, %v1412_v28  ;;  %v3902_v32 = vadd.f32 %v3815_v59, %v1485_v29  ;;  %v1414_v37 = vpop.f32.mrb[23].mxu0  ;;  %v1487_v38 = vpop.f32.mrb[23].mxu1  ;;  %2856 = vmatpush3.bf16.msra.mxu0 %v3887_v13  ;;  %v1588_v42 = vmax.f32 %v1568_v19, 0.0  ;;  %v3281_v58 = vld [vmem:[%s4082_s3 + $0x40] sm:$0xff]  }
 0x209   : > { %v1573_v39 = vadd.f32 %v3817_v20, %v1414_v37  ;;  %v3907_v40 = vadd.f32 %v3819_v60, %v1487_v38  ;;  %v1589_v44 = vmax.f32 %v1569_v26, 0.0  ;;  %v3282_v20 = vld [vmem:[%s4082_s3 + $0x48] sm:$0xff]   ;;  %v3283_v60 = vld [vmem:[%s4082_s3 + $0x50] sm:$0xff]  }
 0x20a   : > { %v1590_v43 = vmax.f32 %v1572_v31, 0.0 }
 0x20b   : > { %v1591_v14 = vmax.f32 %v1573_v39, 0.0 }
 0x20c   : > { %v3909_v47 = vpack.c.bf16 %v1590_v43, %v1588_v42 }
 0x20d   : > { %v3914_v59 = vpack.c.bf16 %v1591_v14, %v1589_v44 }
 0x20e   : > { %2873 = vmatprep.subr.bf16.mxu1 %v3909_v47 }
 0x20f   : > { %2857 = vmatprep.subr.bf16.mxu0 %v3914_v59  ;;  %2874 = vmatpush3.bf16.msra.mxu1 %v3909_v47 }
 0x210   : > { %2858 = vmatpush3.bf16.msra.mxu0 %v3914_v59  ;;  %2955 = vmatprep.subr.bf16.mxu1 %v3281_v58 }
 0x211   : > { %2883 = vmatprep.subr.bf16.mxu0 %v3281_v58 }
 0x212   : > { %2876 = vmatmul.mubr.msk.bf16.vlgmr.msra.gmra.mrb[24].mxu1 %vm311_vm0, %v3444_v34  ;;  %v3285_v34 = vld [vmem:[%s4082_s3 + $0x60] sm:$0xff]  }
 0x213   : > { %2860 = vmatmul.mubr.msk.bf16.vlgmr.msra.gmra.mrb[24].mxu0 %vm311_vm0, %v3442_v33  ;;  %2956 = vmatpush3.bf16.msra.mxu1 %v3281_v58  ;;  %v3284_v33 = vld [vmem:[%s4082_s3 + $0x58] sm:$0xff]  }
 0x214   : > { %2884 = vmatpush3.bf16.msra.mxu0 %v3281_v58  ;;  %2957 = vmatprep.subr.bf16.mxu1 %v3282_v20 }
 0x215   : > { %2885 = vmatprep.subr.bf16.mxu0 %v3282_v20  ;;  %2879 = vmatprep.mubr.msk.bf16.mxu1 %vm311_vm0, %v3451_v36  ;;  %v3287_v36 = vld [vmem:[%s4082_s3 + $0x70] sm:$0xff]  }
 0x216   : > { %2863 = vmatprep.mubr.msk.bf16.mxu0 %vm311_vm0, %v3447_v35  ;;  %v3286_v35 = vld [vmem:[%s4082_s3 + $0x68] sm:$0xff]  }
 0x217   : > { %2958 = vmatpush3.bf16.msra.mxu1 %v3282_v20 }
 0x218   : > { %2886 = vmatpush3.bf16.msra.mxu0 %v3282_v20  ;;  %2959 = vmatprep.subr.bf16.mxu1 %v3283_v60 }
 0x219   : > { %2887 = vmatprep.subr.bf16.mxu0 %v3283_v60 }
 0x21a   : > { %2880 = vmatmul.mubr.msk.bf16.gmra.mrb[28].mxu1 %vm311_vm0, %v3494_v50  ;;  %v3289_v50 = vld [vmem:[%s4082_s3] sm:$0xff]  }
 0x21b   : > { %2864 = vmatmul.mubr.msk.bf16.gmra.mrb[28].mxu0 %vm311_vm0, %v3492_v49  ;;  %2960 = vmatpush3.bf16.msra.mxu1 %v3283_v60  ;;  %v3288_v49 = vld [vmem:[%s4082_s3 + $0x78] sm:$0xff]  }
 0x21c   : > { %2971 = vmatprep.mubr.bf16.mxu1 %v3839_v23  ;;  %2888 = vmatpush3.bf16.msra.mxu0 %v3283_v60 }
 0x21d   : > { %2899 = vmatprep.mubr.bf16.mxu0 %v3837_v22  ;;  %2961 = vmatprep.subr.bf16.mxu1 %v3284_v33 }
 0x21e   : > { %2889 = vmatprep.subr.bf16.mxu0 %v3284_v33 }
 0x21f   : > { %2962 = vmatpush3.bf16.msra.mxu1 %v3284_v33 }
 0x220   : > { %2890 = vmatpush3.bf16.msra.mxu0 %v3284_v33  ;;  %2963 = vmatprep.subr.bf16.mxu1 %v3285_v34 }
 0x221   : > { %2891 = vmatprep.subr.bf16.mxu0 %v3285_v34 }
 0x223   : > { %2964 = vmatpush3.bf16.msra.mxu1 %v3285_v34 }
 0x224   : > { %2892 = vmatpush3.bf16.msra.mxu0 %v3285_v34  ;;  %2965 = vmatprep.subr.bf16.mxu1 %v3286_v35 }
 0x225   : > { %2893 = vmatprep.subr.bf16.mxu0 %v3286_v35 }
 0x227   : > { %2966 = vmatpush3.bf16.msra.mxu1 %v3286_v35 }
 0x228   : > { %2894 = vmatpush3.bf16.msra.mxu0 %v3286_v35  ;;  %2967 = vmatprep.subr.bf16.mxu1 %v3287_v36 }
 0x229   : > { %2895 = vmatprep.subr.bf16.mxu0 %v3287_v36 }
 0x22b   : > { %2968 = vmatpush3.bf16.msra.mxu1 %v3287_v36 }
 0x22c   : > { %2896 = vmatpush3.bf16.msra.mxu0 %v3287_v36  ;;  %2969 = vmatprep.subr.bf16.mxu1 %v3288_v49 }
 0x22d   : > { %2897 = vmatprep.subr.bf16.mxu0 %v3288_v49 }
 0x22f   : > { %2970 = vmatpush3.bf16.msra.mxu1 %v3288_v49 }
 0x230   : > { %2898 = vmatpush3.bf16.msra.mxu0 %v3288_v49  ;;  %2979 = vmatprep.subr.bf16.mxu1 %v3289_v50 }
 0x231   : > { %2907 = vmatprep.subr.bf16.mxu0 %v3289_v50 }
 0x232   : > { %2972 = vmatmul.mubr.bf16.vlgmr.msra.gmra.mrb[32].mxu1 %v3863_v46 }
 0x233   : > { %2900 = vmatmul.mubr.bf16.vlgmr.msra.gmra.mrb[32].mxu0 %v3861_v45  ;;  %2975 = vmatprep.mubr.bf16.mxu1 %v3887_v13 }
 0x234   : > { %2980 = vmatpush3.bf16.msra.mxu1 %v3289_v50  ;;  %2903 = vmatprep.mubr.bf16.mxu0 %v3885_v11 }
 0x235   : > { %2981 = vmatprep.subr.bf16.mxu1 %v3290_v48  ;;  %2908 = vmatpush3.bf16.msra.mxu0 %v3289_v50 }
 0x236   : > { %2909 = vmatprep.subr.bf16.mxu0 %v3290_v48 }
 0x238   : > { %2982 = vmatpush3.bf16.msra.mxu1 %v3290_v48 }
 0x239   : > { %2983 = vmatprep.subr.bf16.mxu1 %v3291_v17  ;;  %2910 = vmatpush3.bf16.msra.mxu0 %v3290_v48 }
 0x23a   : > { %2976 = vmatmul.mubr.bf16.gmra.mrb[36].mxu1 %v3914_v59  ;;  %2911 = vmatprep.subr.bf16.mxu0 %v3291_v17 }
 0x23b   : > { %2904 = vmatmul.mubr.bf16.gmra.mrb[36].mxu0 %v3909_v47  ;;  %2995 = vmatprep.mubr.bf16.mxu1 %v3837_v22  ;;  %v3295_v22 = vld [vmem:[%s4082_s3 + $0x30] sm:$0xff]  }
 0x23c   : > { %2984 = vmatpush3.bf16.msra.mxu1 %v3291_v17 }
 0x23d   : > { %2985 = vmatprep.subr.bf16.mxu1 %v3292_v52  ;;  %2912 = vmatpush3.bf16.msra.mxu0 %v3291_v17 }
 0x23e   : > { %2913 = vmatprep.subr.bf16.mxu0 %v3292_v52 }
 0x240   : > { %2986 = vmatpush3.bf16.msra.mxu1 %v3292_v52 }
 0x241   : > { %2987 = vmatprep.subr.bf16.mxu1 %v3293_v53  ;;  %2914 = vmatpush3.bf16.msra.mxu0 %v3292_v52 }
 0x242   : > { %2915 = vmatprep.subr.bf16.mxu0 %v3293_v53 }
 0x244   : > { %2988 = vmatpush3.bf16.msra.mxu1 %v3293_v53 }
 0x245   : > { %2989 = vmatprep.subr.bf16.mxu1 %v3294_v54  ;;  %2916 = vmatpush3.bf16.msra.mxu0 %v3293_v53 }
 0x246   : > { %2917 = vmatprep.subr.bf16.mxu0 %v3294_v54 }
 0x248   : > { %2990 = vmatpush3.bf16.msra.mxu1 %v3294_v54 }
 0x249   : > { %2991 = vmatprep.subr.bf16.mxu1 %v3295_v22  ;;  %2918 = vmatpush3.bf16.msra.mxu0 %v3294_v54 }
 0x24a   : > { %2919 = vmatprep.subr.bf16.mxu0 %v3295_v22 }
 0x24c   : > { %2992 = vmatpush3.bf16.msra.mxu1 %v3295_v22 }
 0x24d   : > { %2993 = vmatprep.subr.bf16.mxu1 %v3296_v56  ;;  %2920 = vmatpush3.bf16.msra.mxu0 %v3295_v22 }
 0x24e   : > { %2921 = vmatprep.subr.bf16.mxu0 %v3296_v56 }
 0x250   : > { %2994 = vmatpush3.bf16.msra.mxu1 %v3296_v56 }
 0x251   : > { %3003 = vmatprep.subr.bf16.mxu1 %v3297_v57  ;;  %2922 = vmatpush3.bf16.msra.mxu0 %v3296_v56 }
 0x252   : > { %2931 = vmatprep.subr.bf16.mxu0 %v3297_v57 }
 0x253   : > { %2996 = vmatmul.mubr.bf16.vlgmr.msra.gmra.mrb[32].mxu1 %v3861_v45  ;;  %v3301_v45 = vld [vmem:[%s4082_s3 + $0xa0] sm:$0xff]  }
 0x254   : > { %2999 = vmatprep.mubr.bf16.mxu1 %v3885_v11  ;;  %3004 = vmatpush3.bf16.msra.mxu1 %v3297_v57 }
 0x255   : > { %3005 = vmatprep.subr.bf16.mxu1 %v3298_v12 }
 0x258   : > { %3006 = vmatpush3.bf16.msra.mxu1 %v3298_v12 }
 0x259   : > { %3007 = vmatprep.subr.bf16.mxu1 %v3299_v62 }
 0x25b   : > { %3000 = vmatmul.mubr.bf16.gmra.mrb[36].mxu1 %v3909_v47 }
 0x25c   : > { %3008 = vmatpush3.bf16.msra.mxu1 %v3299_v62 }
 0x25d   : > { %3009 = vmatprep.subr.bf16.mxu1 %v3300_v0 }
 0x260   : > { %3010 = vmatpush3.bf16.msra.mxu1 %v3300_v0 }
 0x261   : > { %3011 = vmatprep.subr.bf16.mxu1 %v3301_v45 }
 0x264   : > { %3012 = vmatpush3.bf16.msra.mxu1 %v3301_v45 }
 0x265   : > { %3013 = vmatprep.subr.bf16.mxu1 %v3302_v2 }
 0x268   : > { %3014 = vmatpush3.bf16.msra.mxu1 %v3302_v2 }
 0x269   : > { %3015 = vmatprep.subr.bf16.mxu1 %v3303_v4 }
 0x26c   : > { %3016 = vmatpush3.bf16.msra.mxu1 %v3303_v4 }
 0x26d   : > { %3017 = vmatprep.subr.bf16.mxu1 %v3304_v6 }
 0x270   : > { %3018 = vmatpush3.bf16.msra.mxu1 %v3304_v6 }
 0x2e5   : > { %v2877_v8 = vpop.f32.mrb[24].mxu1 }
 0x2e6   : > { %v2861_v10 = vpop.f32.mrb[24].mxu0  ;;  %v1703_v11 = vpop.f32.mrb[25].mxu1 }
 0x2e7   : > { %v1634_v16 = vpop.f32.mrb[25].mxu0  ;;  %v2878_v18 = vpop.f32.mrb[26].mxu1 }
 0x2e8   : > { %v1735_v19 = vpack.c.bf16 %v2878_v18, %v2877_v8  ;;  %v2862_v24 = vpop.f32.mrb[26].mxu0  ;;  %v1706_v25 = vpop.f32.mrb[27].mxu1 }
 0x2e9   : > { %v1666_v26 = vpack.c.bf16 %v2862_v24, %v2861_v10  ;;  %v1734_v28 = vpack.c.bf16 %v1706_v25, %v1703_v11  ;;  %v1637_v29 = vpop.f32.mrb[27].mxu0 }
 0x2ea   : > { %v1665_v31 = vpack.c.bf16 %v1637_v29, %v1634_v16 }
 0x2eb   : > { %3019 = vmatprep.mubr.bf16.mxu1 %v1734_v28 }
 0x2ec   : > { %2923 = vmatprep.mubr.bf16.mxu0 %v1665_v31  ;;  %3020 = vmatmul.mubr.bf16.vlgmr.msra.gmra.mrb[32].mxu1 %v1735_v19 }
 0x2ed   : > { %v2881_v37 = vpop.f32.mrb[28].mxu1  ;;  %2924 = vmatmul.mubr.bf16.vlgmr.msra.gmra.mrb[32].mxu0 %v1666_v26 }
 0x2ee   : > { %2932 = vmatpush3.bf16.msra.mxu0 %v3297_v57  ;;  %v2865_v38 = vpop.f32.mrb[28].mxu0  ;;  %v1719_v39 = vpop.f32.mrb[29].mxu1 }
 0x2ef   : > { %v1650_v42 = vpop.f32.mrb[29].mxu0  ;;  %v2882_v43 = vpop.f32.mrb[30].mxu1  ;;  %2933 = vmatprep.subr.bf16.mxu0 %v3298_v12 }
 0x2f0   : > { %v1737_v44 = vpack.c.bf16 %v2882_v43, %v2881_v37  ;;  %v2866_v14 = vpop.f32.mrb[30].mxu0  ;;  %v1722_v47 = vpop.f32.mrb[31].mxu1 }
 0x2f1   : > { %v1668_v58 = vpack.c.bf16 %v2866_v14, %v2865_v38  ;;  %v1736_v20 = vpack.c.bf16 %v1722_v47, %v1719_v39  ;;  %v1653_v60 = vpop.f32.mrb[31].mxu0 }
 0x2f2   : > { %v1667_v33 = vpack.c.bf16 %v1653_v60, %v1650_v42  ;;  %2934 = vmatpush3.bf16.msra.mxu0 %v3298_v12 }
 0x2f3   : > { %3023 = vmatprep.mubr.bf16.mxu1 %v1736_v20  ;;  %2935 = vmatprep.subr.bf16.mxu0 %v3299_v62 }
 0x2f4   : > { %2927 = vmatprep.mubr.bf16.mxu0 %v1667_v33  ;;  %3024 = vmatmul.mubr.bf16.gmra.mrb[36].mxu1 %v1737_v44 }
 0x2f5   : > { %2928 = vmatmul.mubr.bf16.gmra.mrb[36].mxu0 %v1668_v58 }
 0x2f6   : > { %2936 = vmatpush3.bf16.msra.mxu0 %v3299_v62  ;;  %2947 = vmatprep.mubr.bf16.mxu0 %v3839_v23  ;;  %v4020_v23 = vld [vmem:[%s4083_s4] ss:$0 sm:$0xff] }
 0x2f7   : > { %2937 = vmatprep.subr.bf16.mxu0 %v3300_v0 }
 0x2fa   : > { %2938 = vmatpush3.bf16.msra.mxu0 %v3300_v0 }
 0x2fb   : > { %2939 = vmatprep.subr.bf16.mxu0 %v3301_v45 }
 0x2fe   : > { %2940 = vmatpush3.bf16.msra.mxu0 %v3301_v45 }
 0x2ff   : > { %2941 = vmatprep.subr.bf16.mxu0 %v3302_v2 }
 0x302   : > { %2942 = vmatpush3.bf16.msra.mxu0 %v3302_v2 }
 0x303   : > { %2943 = vmatprep.subr.bf16.mxu0 %v3303_v4 }
 0x306   : > { %2944 = vmatpush3.bf16.msra.mxu0 %v3303_v4 }
 0x307   : > { %2945 = vmatprep.subr.bf16.mxu0 %v3304_v6 }
 0x30a   : > { %2946 = vmatpush3.bf16.msra.mxu0 %v3304_v6 }
 0x30d   : > { %2948 = vmatmul.mubr.bf16.vlgmr.msra.gmra.mrb[32].mxu0 %v3863_v46 }
 0x30e   : > { %2951 = vmatprep.mubr.bf16.mxu0 %v3887_v13 }
 0x315   : > { %2952 = vmatmul.mubr.bf16.gmra.mrb[36].mxu0 %v3914_v59 }
 0x3bf   : > { %v3021_v34 = vpop.f32.mrb[32].mxu1 }
 0x3c0   : > { %v2371_v35 = vadd.f32 %v3021_v34, %v4020_v23  ;;  %v2299_v36 = vpop.f32.mrb[33].mxu1 }
 0x3c1   : > { %v2369_v49 = vadd.f32 %v4020_v23, %v2299_v36  ;;  %v3022_v50 = vpop.f32.mrb[34].mxu1 }
 0x3c2   : > { %v2379_v48 = vadd.f32 %v2371_v35, %v3848_v30  ;;  %v2372_v46 = vadd.f32 %v3022_v50, %v4020_v23  ;;  %v2302_v13 = vpop.f32.mrb[35].mxu1 }
 0x3c3   : > { %v2377_v59 = vadd.f32 %v2369_v49, %v3827_v1  ;;  %v2370_v17 = vadd.f32 %v4020_v23, %v2302_v13 }
 0x3c4   : > { %v2387_v52 = vmax.f32 %v2379_v48, 0.0  ;;  %v2380_v53 = vadd.f32 %v2372_v46, %v3859_v41 }
 0x3c5   : > { %v2385_v30 = vmax.f32 %v2377_v59, 0.0  ;;  %v2378_v54 = vadd.f32 %v2370_v17, %v3835_v15 }
 0x3c6   : > { %2403 = vst [vmem:[%s4030_s16 + $0x28] sm:$0xff] %v2387_v52  ;;  %v2388_v22 = vmax.f32 %v2380_v53, 0.0 }
 0x3c7   : > { %2401 = vst [vmem:[%s4030_s16 + $0x8] sm:$0xff] %v2385_v30  ;;  %v2386_v56 = vmax.f32 %v2378_v54, 0.0  ;;  %v3025_v57 = vpop.f32.mrb[36].mxu1 }
 0x3c8   : > { %2404 = vst [vmem:[%s4030_s16 + $0x38] sm:$0xff] %v2388_v22  ;;  %v2375_v12 = vadd.f32 %v3025_v57, %v4020_v23  ;;  %v2315_v62 = vpop.f32.mrb[37].mxu1 }
 0x3c9   : > { %2402 = vst [vmem:[%s4030_s16 + $0x18] sm:$0xff] %v2386_v56  ;;  %v2373_v1 = vadd.f32 %v4020_v23, %v2315_v62  ;;  %v3026_v41 = vpop.f32.mrb[38].mxu1 }
 0x3ca   : > { %v2383_v0 = vadd.f32 %v2375_v12, %v3896_v27  ;;  %v2376_v15 = vadd.f32 %v3026_v41, %v4020_v23  ;;  %v2318_v45 = vpop.f32.mrb[39].mxu1 }
 0x3cb   : > { %v2381_v2 = vadd.f32 %v2373_v1, %v3872_v55  ;;  %v2374_v4 = vadd.f32 %v4020_v23, %v2318_v45 }
 0x3cc   : > { %v2391_v6 = vmax.f32 %v2383_v0, 0.0  ;;  %v2384_v8 = vadd.f32 %v2376_v15, %v3907_v40 }
 0x3cd   : > { %v2389_v10 = vmax.f32 %v2381_v2, 0.0  ;;  %v2382_v11 = vadd.f32 %v2374_v4, %v3883_v3 }
 0x3ce   : > { %2407 = vst [vmem:[%s4030_s16 + $0x68] sm:$0xff] %v2391_v6  ;;  %v2392_v16 = vmax.f32 %v2384_v8, 0.0 }
 0x3cf   : > { %2405 = vst [vmem:[%s4030_s16 + $0x48] sm:$0xff] %v2389_v10  ;;  %v2390_v18 = vmax.f32 %v2382_v11, 0.0 }
 0x3d0   : > { %2408 = vst [vmem:[%s4030_s16 + $0x78] sm:$0xff] %v2392_v16 }
 0x3d1   : > { %2406 = vst [vmem:[%s4030_s16 + $0x58] sm:$0xff] %v2390_v18 }
 0x3e0   : > { %v2949_v27 = vpop.f32.mrb[32].mxu0 }
 0x3e1   : > { %v2347_v19 = vadd.f32 %v2949_v27, %v4020_v23  ;;  %v2096_v55 = vpop.f32.mrb[33].mxu0 }
 0x3e2   : > { %v2345_v24 = vadd.f32 %v4020_v23, %v2096_v55  ;;  %v2950_v25 = vpop.f32.mrb[34].mxu0 }
 0x3e3   : > { %v2355_v40 = vadd.f32 %v2347_v19, %v3843_v5  ;;  %v2348_v3 = vadd.f32 %v2950_v25, %v4020_v23  ;;  %v2099_v26 = vpop.f32.mrb[35].mxu0 }
 0x3e4   : > { %v2353_v28 = vadd.f32 %v2345_v24, %v3823_v63  ;;  %v2346_v29 = vadd.f32 %v4020_v23, %v2099_v26 }
 0x3e5   : > { %v2363_v31 = vmax.f32 %v2355_v40, 0.0  ;;  %v2356_v37 = vadd.f32 %v2348_v3, %v3854_v7 }
 0x3e6   : > { %v2361_v38 = vmax.f32 %v2353_v28, 0.0  ;;  %v2354_v39 = vadd.f32 %v2346_v29, %v3831_v9 }
 0x3e7   : > { %2395 = vst [vmem:[%s4030_s16 + $0x20] sm:$0xff] %v2363_v31  ;;  %v2364_v42 = vmax.f32 %v2356_v37, 0.0 }
 0x3e8   : > { %2393 = vst [vmem:[%s4030_s16] sm:$0xff] %v2361_v38  ;;  %v2362_v43 = vmax.f32 %v2354_v39, 0.0  ;;  %v2953_v44 = vpop.f32.mrb[36].mxu0 }
 0x3e9   : > { %2396 = vst [vmem:[%s4030_s16 + $0x30] sm:$0xff] %v2364_v42  ;;  %v2351_v5 = vadd.f32 %v2953_v44, %v4020_v23  ;;  %v2112_v14 = vpop.f32.mrb[37].mxu0 }
 0x3ea   : > { %2394 = vst [vmem:[%s4030_s16 + $0x10] sm:$0xff] %v2362_v43  ;;  %v2349_v63 = vadd.f32 %v4020_v23, %v2112_v14  ;;  %v2954_v7 = vpop.f32.mrb[38].mxu0 }
 0x3eb   : > { %v2359_v47 = vadd.f32 %v2351_v5, %v3891_v21  ;;  %v2352_v9 = vadd.f32 %v2954_v7, %v4020_v23  ;;  %v2115_v58 = vpop.f32.mrb[39].mxu0 }
 0x3ec   : > { %v2357_v20 = vadd.f32 %v2349_v63, %v3867_v51  ;;  %v2350_v60 = vadd.f32 %v4020_v23, %v2115_v58 }
 0x3ed   : > { %v2367_v33 = vmax.f32 %v2359_v47, 0.0  ;;  %v2360_v34 = vadd.f32 %v2352_v9, %v3902_v32 }
 0x3ee   : > { %v2365_v35 = vmax.f32 %v2357_v20, 0.0  ;;  %v2358_v36 = vadd.f32 %v2350_v60, %v3878_v61 }
 0x3ef   : > { %2399 = vst [vmem:[%s4030_s16 + $0x60] sm:$0xff] %v2367_v33  ;;  %v2368_v49 = vmax.f32 %v2360_v34, 0.0 }
 0x3f0   : > { %2397 = vst [vmem:[%s4030_s16 + $0x40] sm:$0xff] %v2365_v35  ;;  %v2366_v50 = vmax.f32 %v2358_v36, 0.0 }
 0x3f1   : > { %2400 = vst [vmem:[%s4030_s16 + $0x70] sm:$0xff] %v2368_v49 }
 0x3f2   : > { %2398 = vst [vmem:[%s4030_s16 + $0x50] sm:$0xff] %v2366_v50 }
 0x3f3 PF: > { %s15_s18 = sadd.s32 1, %s3311_s18  }
 0x3f4   : > { %p12_p4 = scmp.ge.s32.totalorder %s15_s18, 4  }
 0x3f6   :  { %14 = sbr.rel (!%p12_p4) target bundleno = 1 (0x1), region = 74 }

// kernel: _lambda_.6
= control target key start
LH: loop header
LB: loop body
LE: loop exit
PB: predicated region body
PF: predicated region fallthrough
CT: control target
= control target key end

     0   :  { %s2825_s18 = smov 0   ;;  %s3342_s0 = inlined_call_operand.vmem [shape: bf16[2,32,128], index: 0, kind: input, shape index: {}]   ;;  %s3343_s1 = inlined_call_operand.vmem [shape: bf16[3,128,512], index: 1, kind: input, shape index: {}]   ;;  %s3344_s2 = inlined_call_operand.vmem [shape: f32[1,512], index: 2, kind: input, shape index: {}]   ;;  %s3345_s3 = inlined_call_operand.vmem [shape: bf16[3,128,128], index: 3, kind: input, shape index: {}]   ;;  %s3346_s4 = inlined_call_operand.vmem [shape: f32[1,128], index: 4, kind: input, shape index: {}]   ;;  %s3347_s5 = inlined_call_operand.vmem [shape: bf16[2,32,256], index: 5, kind: output, shape index: {}]  }
   0x1 LB: > { %s2072_s19 = sadd.s32 4294967295, %s2791_s18   ;;  %p2076_p0 = scmp.ge.s32.totalorder %s2791_s18, 1  ;;  %s2791_s18 = sphi %s2825_s18, %s15_s18  }
   0x2   : > { %p187_p1 = scmp.lt.s32.totalorder %s2791_s18, 3 }
   0x4   : > { %p188_p2 = pnand %p2076_p0, %p187_p1 }
   0x5   : > { %p215_p3 = scmp.lt.s32.totalorder (!%p188_p2), %s2072_s19, 1  ;;  %v226_v0 = vlaneseq (!%p188_p2)  ;;  %v2793_v10 = vmov (!%p188_p2), 0.0   ;;  %vm271_vm7 = vcmask (!%p188_p2), 261120   ;;  %v2619_v18 = vld [vmem:[%s3343_s1 + $0x104] ss:$16 sps:$4 sm:$0xff] (!%p188_p2)   ;;  %v2794_v33 = vmov (!%p188_p2), 0  }
   0x6   : > { %191 = sbr.rel (%p188_p2) target bundleno = 981 (0x3d5), region = 40  ;;  %v2622_v22 = vld [vmem:[%s3343_s1 + $0x10c] ss:$16 sps:$4 sm:$0xff] (!%p188_p2)   ;;  %v2617_v25 = vld [vmem:[%s3343_s1 + $0x100] ss:$16 sps:$4 sm:$0xff] (!%p188_p2)  }
   0x7   : > { %v2835_v1 = vshrl.u32 (!%p188_p2), %v226_v0, 7  ;;  %v232_v2 = vand.u32 (!%p188_p2), 127, %v226_v0  ;;  %v2620_v26 = vld [vmem:[%s3343_s1 + $0x108] ss:$16 sps:$4 sm:$0xff] (!%p188_p2)   ;;  %v2625_v27 = vld [vmem:[%s3343_s1 + $0x124] ss:$16 sps:$4 sm:$0xff] (!%p188_p2)  }
   0x8   : > { %v2628_v28 = vld [vmem:[%s3343_s1 + $0x12c] ss:$16 sps:$4 sm:$0xff] (!%p188_p2)   ;;  %v2623_v29 = vld [vmem:[%s3343_s1 + $0x120] ss:$16 sps:$4 sm:$0xff] (!%p188_p2)   ;;  %v2626_v30 = vld [vmem:[%s3343_s1 + $0x128] ss:$16 sps:$4 sm:$0xff] (!%p188_p2)  }
   0x9   : > { %v228_v3 = vadd.s32 (!%p188_p2), 8, %v2835_v1  ;;  %v233_v4 = vadd.s32 (!%p188_p2), 1, %v232_v2  ;;  %v229_v5 = vadd.s32 (!%p188_p2), 16, %v2835_v1  ;;  %v230_v6 = vadd.s32 (!%p188_p2), 24, %v2835_v1  ;;  %v2631_v31 = vld [vmem:[%s3343_s1 + $0x144] ss:$16 sps:$4 sm:$0xff] (!%p188_p2)  }
   0xa   : > { %v2081_v7 = vadd.s32 (!%p188_p2), 4294967295, %v232_v2  ;;  %v2634_v32 = vld [vmem:[%s3343_s1 + $0x14c] ss:$16 sps:$4 sm:$0xff] (!%p188_p2)   ;;  %v2629_v34 = vld [vmem:[%s3343_s1 + $0x140] ss:$16 sps:$4 sm:$0xff] (!%p188_p2)  }
   0xb   : > { %vm234_vm0 = vcmp.eq.s32.totalorder (!%p188_p2), %v2835_v1, %v233_v4  ;;  %vm235_vm1 = vcmp.eq.s32.totalorder (!%p188_p2), %v228_v3, %v233_v4  ;;  %vm236_vm2 = vcmp.eq.s32.totalorder (!%p188_p2), %v229_v5, %v233_v4  ;;  %vm237_vm3 = vcmp.eq.s32.totalorder (!%p188_p2), %v230_v6, %v233_v4  ;;  %v2632_v35 = vld [vmem:[%s3343_s1 + $0x148] ss:$16 sps:$4 sm:$0xff] (!%p188_p2)   ;;  %v2637_v36 = vld [vmem:[%s3343_s1 + $0x164] ss:$16 sps:$4 sm:$0xff] (!%p188_p2)   ;;  %v2640_v37 = vld [vmem:[%s3343_s1 + $0x16c] ss:$16 sps:$4 sm:$0xff] (!%p188_p2)  }
   0xc   : > { %v238_v11 = vsel (!%p188_p2), %vm234_vm0, 1.0, %v2793_v10  ;;  %vm245_vm4 = vcmp.eq.s32.totalorder (!%p188_p2), %v2835_v1, %v2081_v7  ;;  %vm246_vm5 = vcmp.eq.s32.totalorder (!%p188_p2), %v228_v3, %v2081_v7  ;;  %vm247_vm6 = vcmp.eq.s32.totalorder (!%p188_p2), %v229_v5, %v2081_v7  ;;  %v2635_v38 = vld [vmem:[%s3343_s1 + $0x160] ss:$16 sps:$4 sm:$0xff] (!%p188_p2)   ;;  %v2638_v39 = vld [vmem:[%s3343_s1 + $0x168] ss:$16 sps:$4 sm:$0xff] (!%p188_p2)  }
   0xd   : > { %s3349_s19 = smov (!%p215_p3, %s2072_s19), 1  ;;  %v239_v12 = vsel %vm235_vm1, 1.0, %v2793_v10  ;;  %v240_v13 = vsel %vm236_vm2, 1.0, %v2793_v10  ;;  %v249_v14 = vsel %vm245_vm4, 1.0, %v2793_v10  ;;  %v241_v16 = vsel %vm237_vm3, 1.0, %v2793_v10 }
   0xe   : > { %s2319_s20 = sshll.u32 %s3349_s19, 4  ;;  %v2853_v15 = vpack.c.bf16 %v239_v12, %v238_v11  ;;  %v250_v17 = vsel %vm246_vm5, 1.0, %v2793_v10  ;;  %vm248_vm8 = vcmp.eq.s32.totalorder %v230_v6, %v2081_v7  ;;  %v251_v20 = vsel %vm247_vm6, 1.0, %v2793_v10  ;;  %v2643_v40 = vld [vmem:[%s3343_s1 + $0x184] ss:$16 sps:$4 sm:$0xff]   ;;  %s2320_s13 = sshll.u32 %s3349_s19, 5 }
   0xf   : > { %s219_s23 = scalar_lea.vmem %s3342_s0, %s2319_s20  ;;  %v2861_v19 = vpack.c.bf16 %v250_v17, %v249_v14  ;;  %v252_v21 = vsel %vm248_vm8, 1.0, %v2793_v10  ;;  %v2869_v23 = vpack.c.bf16 %v241_v16, %v240_v13  ;;  %v2646_v41 = vld [vmem:[%s3343_s1 + $0x18c] ss:$16 sps:$4 sm:$0xff]   ;;  %v2641_v42 = vld [vmem:[%s3343_s1 + $0x180] ss:$16 sps:$4 sm:$0xff]   ;;  %s3324_s16 = scalar_lea.vmem %s3347_s5, %s2320_s13 }
  0x10   : > { %v2844_v8 = vld [vmem:[%s219_s23] sm:$0xff]   ;;  %v2847_v9 = vld [vmem:[%s219_s23 + $0x8] sm:$0xff]   ;;  %2409 = vmatprep.mubr.msk.bf16.mxu0 %vm271_vm7, %v2853_v15  ;;  %v2873_v24 = vpack.c.bf16 %v252_v21, %v251_v20 }
  0x11   : > { %2405 = vmatprep.subr.bf16.mxu0 %v2844_v8  ;;  %2413 = vmatprep.subr.bf16.mxu1 %v2844_v8  ;;  %v2644_v43 = vld [vmem:[%s3343_s1 + $0x188] ss:$16 sps:$4 sm:$0xff]   ;;  %v2649_v44 = vld [vmem:[%s3343_s1 + $0x1a4] ss:$16 sps:$4 sm:$0xff]   ;;  %v2652_v45 = vld [vmem:[%s3343_s1 + $0x1ac] ss:$16 sps:$4 sm:$0xff]  }
  0x12   : > { %2406 = vmatpush3.bf16.msra.mxu0 %v2844_v8  ;;  %2414 = vmatpush3.bf16.msra.mxu1 %v2844_v8  ;;  %v2647_v46 = vld [vmem:[%s3343_s1 + $0x1a0] ss:$16 sps:$4 sm:$0xff]   ;;  %v2650_v47 = vld [vmem:[%s3343_s1 + $0x1a8] ss:$16 sps:$4 sm:$0xff]   ;;  %v2655_v48 = vld [vmem:[%s3343_s1 + $0x1c4] ss:$16 sps:$4 sm:$0xff]  }
  0x13   : > { %2407 = vmatprep.subr.bf16.mxu0 %v2847_v9  ;;  %2415 = vmatprep.subr.bf16.mxu1 %v2847_v9  ;;  %v2658_v49 = vld [vmem:[%s3343_s1 + $0x1cc] ss:$16 sps:$4 sm:$0xff]   ;;  %v2653_v50 = vld [vmem:[%s3343_s1 + $0x1c0] ss:$16 sps:$4 sm:$0xff]   ;;  %v2656_v51 = vld [vmem:[%s3343_s1 + $0x1c8] ss:$16 sps:$4 sm:$0xff]  }
  0x14   : > { %2417 = vmatprep.mubr.msk.bf16.mxu1 %vm271_vm7, %v2861_v19  ;;  %v2661_v52 = vld [vmem:[%s3343_s1 + $0x1e4] ss:$16 sps:$4 sm:$0xff]   ;;  %v2664_v53 = vld [vmem:[%s3343_s1 + $0x1ec] ss:$16 sps:$4 sm:$0xff]   ;;  %v2659_v54 = vld [vmem:[%s3343_s1 + $0x1e0] ss:$16 sps:$4 sm:$0xff]  }
  0x15   : > { %v2662_v55 = vld [vmem:[%s3343_s1 + $0x1e8] ss:$16 sps:$4 sm:$0xff]   ;;  %v2667_v56 = vld [vmem:[%s3343_s1 + $0x4] ss:$16 sps:$4 sm:$0xff]   ;;  %v2670_v57 = vld [vmem:[%s3343_s1 + $0xc] ss:$16 sps:$4 sm:$0xff]  }
  0x16   : > { %2408 = vmatpush3.bf16.msra.mxu0 %v2847_v9  ;;  %2416 = vmatpush3.bf16.msra.mxu1 %v2847_v9  ;;  %v2665_v58 = vld [vmem:[%s3343_s1] ss:$16 sps:$4 sm:$0xff]   ;;  %v2668_v59 = vld [vmem:[%s3343_s1 + $0x8] ss:$16 sps:$4 sm:$0xff]   ;;  %v2673_v60 = vld [vmem:[%s3343_s1 + $0x24] ss:$16 sps:$4 sm:$0xff]  }
  0x17   : > { %611 = vmatprep.subr.bf16.mxu0 %v2619_v18  ;;  %664 = vmatprep.subr.bf16.mxu1 %v2622_v22  ;;  %v2676_v61 = vld [vmem:[%s3343_s1 + $0x2c] ss:$16 sps:$4 sm:$0xff]   ;;  %v2671_v62 = vld [vmem:[%s3343_s1 + $0x20] ss:$16 sps:$4 sm:$0xff]   ;;  %v2674_v63 = vld [vmem:[%s3343_s1 + $0x28] ss:$16 sps:$4 sm:$0xff]  }
  0x18   : > { %v2679_v0 = vld [vmem:[%s3343_s1 + $0x44] ss:$16 sps:$4 sm:$0xff]   ;;  %v2682_v2 = vld [vmem:[%s3343_s1 + $0x4c] ss:$16 sps:$4 sm:$0xff]   ;;  %v2677_v3 = vld [vmem:[%s3343_s1 + $0x40] ss:$16 sps:$4 sm:$0xff]  }
  0x19   : > { %2410 = vmatmul.mubr.msk.bf16.vlgmr.msra.gmra.mrb[0].mxu0 %vm271_vm7, %v2869_v23  ;;  %2418 = vmatmul.mubr.msk.bf16.vlgmr.msra.gmra.mrb[0].mxu1 %vm271_vm7, %v2873_v24  ;;  %v2680_v4 = vld [vmem:[%s3343_s1 + $0x48] ss:$16 sps:$4 sm:$0xff]   ;;  %v2685_v5 = vld [vmem:[%s3343_s1 + $0x64] ss:$16 sps:$4 sm:$0xff]   ;;  %v2688_v6 = vld [vmem:[%s3343_s1 + $0x6c] ss:$16 sps:$4 sm:$0xff]  }
  0x1a   : > { %612 = vmatpush1.bf16.msra.mxu0 %v2617_v25  ;;  %665 = vmatpush1.bf16.msra.mxu1 %v2620_v26  ;;  %v2683_v7 = vld [vmem:[%s3343_s1 + $0x60] ss:$16 sps:$4 sm:$0xff]   ;;  %v2691_v10 = vld [vmem:[%s3343_s1 + $0x84] ss:$16 sps:$4 sm:$0xff]   ;;  %v2694_v11 = vld [vmem:[%s3343_s1 + $0x8c] ss:$16 sps:$4 sm:$0xff]  }
  0x1b   : > { %613 = vmatprep.subr.bf16.mxu0 %v2625_v27  ;;  %666 = vmatprep.subr.bf16.mxu1 %v2628_v28  ;;  %v2689_v12 = vld [vmem:[%s3343_s1 + $0x80] ss:$16 sps:$4 sm:$0xff]   ;;  %v2692_v13 = vld [vmem:[%s3343_s1 + $0x88] ss:$16 sps:$4 sm:$0xff]   ;;  %v2700_v14 = vld [vmem:[%s3343_s1 + $0xac] ss:$16 sps:$4 sm:$0xff]  }
  0x1c   : > { %643 = vmatprep.mubr.bf16.mxu0 %v2794_v33  ;;  %696 = vmatprep.mubr.bf16.mxu1 %v2794_v33  ;;  %v2695_v16 = vld [vmem:[%s3343_s1 + $0xa0] ss:$16 sps:$4 sm:$0xff]   ;;  %v2698_v17 = vld [vmem:[%s3343_s1 + $0xa8] ss:$16 sps:$4 sm:$0xff]   ;;  %v2703_v18 = vld [vmem:[%s3343_s1 + $0xc4] ss:$16 sps:$4 sm:$0xff]  }
  0x1d   : > { %v2706_v20 = vld [vmem:[%s3343_s1 + $0xcc] ss:$16 sps:$4 sm:$0xff]   ;;  %v2701_v21 = vld [vmem:[%s3343_s1 + $0xc0] ss:$16 sps:$4 sm:$0xff]   ;;  %v2704_v22 = vld [vmem:[%s3343_s1 + $0xc8] ss:$16 sps:$4 sm:$0xff]  }
  0x1e   : > { %614 = vmatpush1.bf16.msra.mxu0 %v2623_v29  ;;  %667 = vmatpush1.bf16.msra.mxu1 %v2626_v30  ;;  %v2709_v25 = vld [vmem:[%s3343_s1 + $0xe4] ss:$16 sps:$4 sm:$0xff]   ;;  %v2712_v26 = vld [vmem:[%s3343_s1 + $0xec] ss:$16 sps:$4 sm:$0xff]   ;;  %v2707_v27 = vld [vmem:[%s3343_s1 + $0xe0] ss:$16 sps:$4 sm:$0xff]  }
  0x1f   : > { %615 = vmatprep.subr.bf16.mxu0 %v2631_v31  ;;  %668 = vmatprep.subr.bf16.mxu1 %v2634_v32  ;;  %v2710_v28 = vld [vmem:[%s3343_s1 + $0xe8] ss:$16 sps:$4 sm:$0xff]   ;;  %v2715_v29 = vld [vmem:[%s3343_s1 + $0x204] ss:$16 sps:$4 sm:$0xff]   ;;  %v2718_v30 = vld [vmem:[%s3343_s1 + $0x20c] ss:$16 sps:$4 sm:$0xff]  }
  0x22   : > { %616 = vmatpush1.bf16.msra.mxu0 %v2629_v34  ;;  %669 = vmatpush1.bf16.msra.mxu1 %v2632_v35 }
  0x23   : > { %617 = vmatprep.subr.bf16.mxu0 %v2637_v36  ;;  %670 = vmatprep.subr.bf16.mxu1 %v2640_v37 }
  0x26   : > { %618 = vmatpush1.bf16.msra.mxu0 %v2635_v38  ;;  %671 = vmatpush1.bf16.msra.mxu1 %v2638_v39 }
  0x27   : > { %619 = vmatprep.subr.bf16.mxu0 %v2643_v40  ;;  %672 = vmatprep.subr.bf16.mxu1 %v2646_v41  ;;  %v2713_v40 = vld [vmem:[%s3343_s1 + $0x200] ss:$16 sps:$4 sm:$0xff]   ;;  %v2716_v41 = vld [vmem:[%s3343_s1 + $0x208] ss:$16 sps:$4 sm:$0xff]  }
  0x2a   : > { %620 = vmatpush1.bf16.msra.mxu0 %v2641_v42  ;;  %673 = vmatpush1.bf16.msra.mxu1 %v2644_v43 }
  0x2b   : > { %621 = vmatprep.subr.bf16.mxu0 %v2649_v44  ;;  %674 = vmatprep.subr.bf16.mxu1 %v2652_v45  ;;  %v2721_v45 = vld [vmem:[%s3343_s1 + $0x224] ss:$16 sps:$4 sm:$0xff]  }
  0x2e   : > { %622 = vmatpush1.bf16.msra.mxu0 %v2647_v46  ;;  %675 = vmatpush1.bf16.msra.mxu1 %v2650_v47  ;;  %v2724_v46 = vld [vmem:[%s3343_s1 + $0x22c] ss:$16 sps:$4 sm:$0xff]  }
  0x2f   : > { %623 = vmatprep.subr.bf16.mxu0 %v2655_v48  ;;  %676 = vmatprep.subr.bf16.mxu1 %v2658_v49  ;;  %v2719_v48 = vld [vmem:[%s3343_s1 + $0x220] ss:$16 sps:$4 sm:$0xff]   ;;  %v2722_v49 = vld [vmem:[%s3343_s1 + $0x228] ss:$16 sps:$4 sm:$0xff]  }
  0x32   : > { %624 = vmatpush1.bf16.msra.mxu0 %v2653_v50  ;;  %677 = vmatpush1.bf16.msra.mxu1 %v2656_v51  ;;  %v2727_v50 = vld [vmem:[%s3343_s1 + $0x244] ss:$16 sps:$4 sm:$0xff]   ;;  %v2730_v51 = vld [vmem:[%s3343_s1 + $0x24c] ss:$16 sps:$4 sm:$0xff]  }
  0x33   : > { %625 = vmatprep.subr.bf16.mxu0 %v2661_v52  ;;  %678 = vmatprep.subr.bf16.mxu1 %v2664_v53  ;;  %v2725_v52 = vld [vmem:[%s3343_s1 + $0x240] ss:$16 sps:$4 sm:$0xff]   ;;  %v2728_v53 = vld [vmem:[%s3343_s1 + $0x248] ss:$16 sps:$4 sm:$0xff]  }
  0x36   : > { %626 = vmatpush1.bf16.msra.mxu0 %v2659_v54  ;;  %679 = vmatpush1.bf16.msra.mxu1 %v2662_v55  ;;  %v2733_v54 = vld [vmem:[%s3343_s1 + $0x264] ss:$16 sps:$4 sm:$0xff]   ;;  %v2736_v55 = vld [vmem:[%s3343_s1 + $0x26c] ss:$16 sps:$4 sm:$0xff]  }
  0x37   : > { %877 = vmatprep.subr.bf16.mxu0 %v2667_v56  ;;  %930 = vmatprep.subr.bf16.mxu1 %v2670_v57  ;;  %v2731_v56 = vld [vmem:[%s3343_s1 + $0x260] ss:$16 sps:$4 sm:$0xff]   ;;  %v2734_v57 = vld [vmem:[%s3343_s1 + $0x268] ss:$16 sps:$4 sm:$0xff]  }
  0x39   : > { %644 = vmatmul.mubr.bf16.vlgmr.msra.gmra.mrb[4].mxu0 %v2844_v8  ;;  %697 = vmatmul.mubr.bf16.vlgmr.msra.gmra.mrb[4].mxu1 %v2844_v8  ;;  %v2686_v8 = vld [vmem:[%s3343_s1 + $0x68] ss:$16 sps:$4 sm:$0xff]  }
  0x3a   : > { %878 = vmatpush1.bf16.msra.mxu0 %v2665_v58  ;;  %931 = vmatpush1.bf16.msra.mxu1 %v2668_v59  ;;  %v2739_v58 = vld [vmem:[%s3343_s1 + $0x284] ss:$16 sps:$4 sm:$0xff]   ;;  %v2742_v59 = vld [vmem:[%s3343_s1 + $0x28c] ss:$16 sps:$4 sm:$0xff]  }
  0x3b   : > { %879 = vmatprep.subr.bf16.mxu0 %v2673_v60  ;;  %932 = vmatprep.subr.bf16.mxu1 %v2676_v61  ;;  %v2737_v60 = vld [vmem:[%s3343_s1 + $0x280] ss:$16 sps:$4 sm:$0xff]   ;;  %v2740_v61 = vld [vmem:[%s3343_s1 + $0x288] ss:$16 sps:$4 sm:$0xff]  }
  0x3c   : > { %653 = vmatprep.mubr.bf16.mxu0 %v2794_v33  ;;  %706 = vmatprep.mubr.bf16.mxu1 %v2794_v33 }
  0x3e   : > { %880 = vmatpush1.bf16.msra.mxu0 %v2671_v62  ;;  %933 = vmatpush1.bf16.msra.mxu1 %v2674_v63  ;;  %v2745_v62 = vld [vmem:[%s3343_s1 + $0x2a4] ss:$16 sps:$4 sm:$0xff]   ;;  %v2748_v63 = vld [vmem:[%s3343_s1 + $0x2ac] ss:$16 sps:$4 sm:$0xff]  }
  0x3f   : > { %881 = vmatprep.subr.bf16.mxu0 %v2679_v0  ;;  %934 = vmatprep.subr.bf16.mxu1 %v2682_v2  ;;  %v2743_v0 = vld [vmem:[%s3343_s1 + $0x2a0] ss:$16 sps:$4 sm:$0xff]   ;;  %v2746_v2 = vld [vmem:[%s3343_s1 + $0x2a8] ss:$16 sps:$4 sm:$0xff]  }
  0x41   : > { %654 = vmatmul.mubr.bf16.gmra.mrb[8].mxu0 %v2847_v9  ;;  %707 = vmatmul.mubr.bf16.gmra.mrb[8].mxu1 %v2847_v9  ;;  %v2697_v9 = vld [vmem:[%s3343_s1 + $0xa4] ss:$16 sps:$4 sm:$0xff]  }
  0x42   : > { %882 = vmatpush1.bf16.msra.mxu0 %v2677_v3  ;;  %935 = vmatpush1.bf16.msra.mxu1 %v2680_v4  ;;  %v2751_v3 = vld [vmem:[%s3343_s1 + $0x2c4] ss:$16 sps:$4 sm:$0xff]   ;;  %v2754_v4 = vld [vmem:[%s3343_s1 + $0x2cc] ss:$16 sps:$4 sm:$0xff]  }
  0x43   : > { %883 = vmatprep.subr.bf16.mxu0 %v2685_v5  ;;  %936 = vmatprep.subr.bf16.mxu1 %v2688_v6  ;;  %v2749_v5 = vld [vmem:[%s3343_s1 + $0x2c0] ss:$16 sps:$4 sm:$0xff]   ;;  %v2752_v6 = vld [vmem:[%s3343_s1 + $0x2c8] ss:$16 sps:$4 sm:$0xff]  }
  0x44   : > { %909 = vmatprep.mubr.bf16.mxu0 %v2794_v33  ;;  %962 = vmatprep.mubr.bf16.mxu1 %v2794_v33 }
  0x46   : > { %884 = vmatpush1.bf16.msra.mxu0 %v2683_v7  ;;  %937 = vmatpush1.bf16.msra.mxu1 %v2686_v8  ;;  %v2757_v7 = vld [vmem:[%s3343_s1 + $0x2e4] ss:$16 sps:$4 sm:$0xff]   ;;  %v2760_v8 = vld [vmem:[%s3343_s1 + $0x2ec] ss:$16 sps:$4 sm:$0xff]  }
  0x47   : > { %885 = vmatprep.subr.bf16.mxu0 %v2691_v10  ;;  %938 = vmatprep.subr.bf16.mxu1 %v2694_v11  ;;  %v2755_v10 = vld [vmem:[%s3343_s1 + $0x2e0] ss:$16 sps:$4 sm:$0xff]   ;;  %v2758_v11 = vld [vmem:[%s3343_s1 + $0x2e8] ss:$16 sps:$4 sm:$0xff]  }
  0x4a   : > { %886 = vmatpush1.bf16.msra.mxu0 %v2689_v12  ;;  %939 = vmatpush1.bf16.msra.mxu1 %v2692_v13  ;;  %v1302_v12 = vsub.s32 0, %v2835_v1  ;;  %v1310_v13 = vsub.s32 2, %v2835_v1 }
  0x4b   : > { %887 = vmatprep.subr.bf16.mxu0 %v2697_v9  ;;  %940 = vmatprep.subr.bf16.mxu1 %v2700_v14  ;;  %v1298_v9 = vld [vmem:[%s3344_s2] sm:$0xf]  ;;  %v1314_v14 = vsub.s32 3, %v2835_v1 }
  0x4e   : > { %888 = vmatpush1.bf16.msra.mxu0 %v2695_v16  ;;  %941 = vmatpush1.bf16.msra.mxu1 %v2698_v17  ;;  %v1303_v16 = vrot.slane %v1298_v9, %v1302_v12  ;;  %v1311_v17 = vrot.slane %v1298_v9, %v1310_v13  ;;  %v2772_v12 = vld [vmem:[%s3345_s3 + $0x18] sm:$0xff]   ;;  %v2773_v13 = vld [vmem:[%s3345_s3 + $0x20] sm:$0xff]  }
  0x4f   : > { %889 = vmatprep.subr.bf16.mxu0 %v2703_v18  ;;  %942 = vmatprep.subr.bf16.mxu1 %v2706_v20  ;;  %v1315_v20 = vrot.slane %v1298_v9, %v1314_v14  ;;  %v2776_v14 = vld [vmem:[%s3345_s3 + $0x38] sm:$0xff]  }
  0x52   : > { %890 = vmatpush1.bf16.msra.mxu0 %v2701_v21  ;;  %943 = vmatpush1.bf16.msra.mxu1 %v2704_v22 }
  0x53   : > { %891 = vmatprep.subr.bf16.mxu0 %v2709_v25  ;;  %944 = vmatprep.subr.bf16.mxu1 %v2712_v26 }
  0x56   : > { %892 = vmatpush1.bf16.msra.mxu0 %v2707_v27  ;;  %945 = vmatpush1.bf16.msra.mxu1 %v2710_v28 }
  0x57   : > { %1176 = vmatprep.subr.bf16.mxu0 %v2715_v29  ;;  %1229 = vmatprep.subr.bf16.mxu1 %v2718_v30 }
  0xec   : > { %v2411_v31 = vpop.f32.mrb[0].mxu0  ;;  %v2419_v32 = vpop.f32.mrb[0].mxu1 }
  0xed   : > { %v312_v34 = vpop.f32.mrb[1].mxu0  ;;  %v369_v35 = vpop.f32.mrb[1].mxu1 }
  0xee   : > { %v2412_v36 = vpop.f32.mrb[2].mxu0  ;;  %v2420_v37 = vpop.f32.mrb[2].mxu1 }
  0xef   : > { %v328_v38 = vpack.c.bf16 %v2412_v36, %v2411_v31  ;;  %v315_v39 = vpop.f32.mrb[3].mxu0  ;;  %v3089_v42 = vpack.c.bf16 %v2420_v37, %v2419_v32  ;;  %v372_v43 = vpop.f32.mrb[3].mxu1 }
  0xf0   : > { %v327_v44 = vpack.c.bf16 %v315_v39, %v312_v34  ;;  %v3097_v47 = vpack.c.bf16 %v372_v43, %v369_v35 }
  0xf2   : > { %910 = vmatmul.mubr.bf16.vlgmr.msra.gmra.mrb[4].mxu0 %v327_v44  ;;  %963 = vmatmul.mubr.bf16.vlgmr.msra.gmra.mrb[4].mxu1 %v327_v44 }
  0xf3   : > { %1177 = vmatpush1.bf16.msra.mxu0 %v2713_v40  ;;  %1230 = vmatpush1.bf16.msra.mxu1 %v2716_v41 }
  0xf4   : > { %1178 = vmatprep.subr.bf16.mxu0 %v2721_v45  ;;  %1231 = vmatprep.subr.bf16.mxu1 %v2724_v46 }
  0xf5   : > { %919 = vmatprep.mubr.bf16.mxu0 %v2794_v33  ;;  %972 = vmatprep.mubr.bf16.mxu1 %v2794_v33 }
  0xf7   : > { %1179 = vmatpush1.bf16.msra.mxu0 %v2719_v48  ;;  %1232 = vmatpush1.bf16.msra.mxu1 %v2722_v49 }
  0xf8   : > { %1180 = vmatprep.subr.bf16.mxu0 %v2727_v50  ;;  %1233 = vmatprep.subr.bf16.mxu1 %v2730_v51 }
  0xfa   : > { %920 = vmatmul.mubr.bf16.gmra.mrb[8].mxu0 %v328_v38  ;;  %973 = vmatmul.mubr.bf16.gmra.mrb[8].mxu1 %v328_v38 }
  0xfb   : > { %1181 = vmatpush1.bf16.msra.mxu0 %v2725_v52  ;;  %1234 = vmatpush1.bf16.msra.mxu1 %v2728_v53 }
  0xfc   : > { %1182 = vmatprep.subr.bf16.mxu0 %v2733_v54  ;;  %1235 = vmatprep.subr.bf16.mxu1 %v2736_v55 }
  0xfd   : > { %1208 = vmatprep.mubr.bf16.mxu0 %v2794_v33  ;;  %1261 = vmatprep.mubr.bf16.mxu1 %v2794_v33 }
  0xff   : > { %1183 = vmatpush1.bf16.msra.mxu0 %v2731_v56  ;;  %1236 = vmatpush1.bf16.msra.mxu1 %v2734_v57 }
 0x100   : > { %1184 = vmatprep.subr.bf16.mxu0 %v2739_v58  ;;  %1237 = vmatprep.subr.bf16.mxu1 %v2742_v59 }
 0x103   : > { %1185 = vmatpush1.bf16.msra.mxu0 %v2737_v60  ;;  %1238 = vmatpush1.bf16.msra.mxu1 %v2740_v61 }
 0x104   : > { %1186 = vmatprep.subr.bf16.mxu0 %v2745_v62  ;;  %1239 = vmatprep.subr.bf16.mxu1 %v2748_v63 }
 0x107   : > { %1187 = vmatpush1.bf16.msra.mxu0 %v2743_v0  ;;  %1240 = vmatpush1.bf16.msra.mxu1 %v2746_v2  ;;  %v2761_v0 = vld [vmem:[%s3345_s3 + $0x40] sm:$0xff]  }
 0x108   : > { %1188 = vmatprep.subr.bf16.mxu0 %v2751_v3  ;;  %1241 = vmatprep.subr.bf16.mxu1 %v2754_v4  ;;  %v2762_v3 = vld [vmem:[%s3345_s3 + $0x48] sm:$0xff]   ;;  %v2763_v4 = vld [vmem:[%s3345_s3 + $0x50] sm:$0xff]  }
 0x10b   : > { %1189 = vmatpush1.bf16.msra.mxu0 %v2749_v5  ;;  %1242 = vmatpush1.bf16.msra.mxu1 %v2752_v6  ;;  %v2766_v5 = vld [vmem:[%s3345_s3 + $0x68] sm:$0xff]   ;;  %v2767_v6 = vld [vmem:[%s3345_s3 + $0x70] sm:$0xff]  }
 0x10c   : > { %1190 = vmatprep.subr.bf16.mxu0 %v2757_v7  ;;  %1243 = vmatprep.subr.bf16.mxu1 %v2760_v8  ;;  %v2768_v7 = vld [vmem:[%s3345_s3 + $0x78] sm:$0xff]   ;;  %v2769_v8 = vld [vmem:[%s3345_s3] sm:$0xff]  }
 0x10f   : > { %1191 = vmatpush1.bf16.msra.mxu0 %v2755_v10  ;;  %1244 = vmatpush1.bf16.msra.mxu1 %v2758_v11  ;;  %v2770_v10 = vld [vmem:[%s3345_s3 + $0x8] sm:$0xff]   ;;  %v2771_v11 = vld [vmem:[%s3345_s3 + $0x10] sm:$0xff]  }
 0x112   : > { %1209 = vmatmul.mubr.bf16.vlgmr.msra.gmra.mrb[4].mxu0 %v3097_v47  ;;  %1262 = vmatmul.mubr.bf16.vlgmr.msra.gmra.mrb[4].mxu1 %v3097_v47 }
 0x113   : > { %1218 = vmatprep.mubr.bf16.mxu0 %v2794_v33  ;;  %1271 = vmatprep.mubr.bf16.mxu1 %v2794_v33  ;;  %v1306_v33 = vsub.s32 1, %v2835_v1 }
 0x115   : > { %v1307_v18 = vrot.slane %v1298_v9, %v1306_v33  ;;  %v2774_v9 = vld [vmem:[%s3345_s3 + $0x28] sm:$0xff]   ;;  %v2775_v33 = vld [vmem:[%s3345_s3 + $0x30] sm:$0xff]  }
 0x11a   : > { %1219 = vmatmul.mubr.bf16.gmra.mrb[8].mxu0 %v3089_v42  ;;  %1272 = vmatmul.mubr.bf16.gmra.mrb[8].mxu1 %v3089_v42 }
 0x11b   : > { %2433 = vmatprep.mubr.msk.bf16.mxu1 %vm271_vm7, %v2861_v19  ;;  %2425 = vmatprep.mubr.msk.bf16.mxu0 %vm271_vm7, %v2853_v15 }
 0x1e5   : > { %v1210_v19 = vpop.f32.mrb[4].mxu0  ;;  %v1263_v21 = vpop.f32.mrb[4].mxu1 }
 0x1e6   : > { %v1320_v22 = vadd.f32 %v1303_v16, %v1210_v19  ;;  %v3198_v15 = vadd.f32 %v1311_v17, %v1263_v21  ;;  %v1212_v25 = vpop.f32.mrb[5].mxu0  ;;  %v1265_v26 = vpop.f32.mrb[5].mxu1  ;;  %v2781_v19 = vld [vmem:[%s3345_s3 + $0xa0] sm:$0xff]   ;;  %v2782_v21 = vld [vmem:[%s3345_s3 + $0xa8] sm:$0xff]  }
 0x1e7   : > { %v1321_v27 = vadd.f32 %v1307_v18, %v1212_v25  ;;  %v3200_v28 = vadd.f32 %v1315_v20, %v1265_v26  ;;  %v1214_v29 = vpop.f32.mrb[6].mxu0  ;;  %v1267_v30 = vpop.f32.mrb[6].mxu1  ;;  %v2784_v25 = vld [vmem:[%s3345_s3 + $0xb8] sm:$0xff]  }
 0x1e8   : > { %v1324_v31 = vadd.f32 %v1303_v16, %v1214_v29  ;;  %v3202_v32 = vadd.f32 %v1311_v17, %v1267_v30  ;;  %v1216_v1 = vpop.f32.mrb[7].mxu0  ;;  %v1269_v34 = vpop.f32.mrb[7].mxu1  ;;  %v1336_v37 = vmax.f32 %v1320_v22, 0.0  ;;  %v2783_v22 = vld [vmem:[%s3345_s3 + $0xb0] sm:$0xff]  }
 0x1e9   : > { %v1325_v35 = vadd.f32 %v1307_v18, %v1216_v1  ;;  %v3204_v36 = vadd.f32 %v1315_v20, %v1269_v34  ;;  %v1337_v39 = vmax.f32 %v1321_v27, 0.0 }
 0x1ea   : > { %v1338_v38 = vmax.f32 %v1324_v31, 0.0 }
 0x1eb   : > { %v1339_v40 = vmax.f32 %v1325_v35, 0.0 }
 0x1ec   : > { %v3206_v41 = vpack.c.bf16 %v1338_v38, %v1336_v37 }
 0x1ed   : > { %v3208_v42 = vpack.c.bf16 %v1339_v40, %v1337_v39  ;;  %v1220_v43 = vpop.f32.mrb[8].mxu0  ;;  %v1273_v44 = vpop.f32.mrb[8].mxu1 }
 0x1ee   : > { %v1328_v45 = vadd.f32 %v1303_v16, %v1220_v43  ;;  %v3210_v46 = vadd.f32 %v1311_v17, %v1273_v44  ;;  %v1222_v47 = vpop.f32.mrb[9].mxu0  ;;  %v1275_v48 = vpop.f32.mrb[9].mxu1  ;;  %2429 = vmatprep.subr.bf16.mxu1 %v3206_v41 }
 0x1ef   : > { %v1329_v49 = vadd.f32 %v1307_v18, %v1222_v47  ;;  %v3213_v50 = vadd.f32 %v1315_v20, %v1275_v48  ;;  %v1224_v51 = vpop.f32.mrb[10].mxu0  ;;  %v1277_v52 = vpop.f32.mrb[10].mxu1  ;;  %2421 = vmatprep.subr.bf16.mxu0 %v3208_v42  ;;  %2430 = vmatpush3.bf16.msra.mxu1 %v3206_v41 }
 0x1f0   : > { %v1332_v53 = vadd.f32 %v1303_v16, %v1224_v51  ;;  %v3217_v54 = vadd.f32 %v1311_v17, %v1277_v52  ;;  %v1226_v55 = vpop.f32.mrb[11].mxu0  ;;  %v1279_v56 = vpop.f32.mrb[11].mxu1  ;;  %2422 = vmatpush3.bf16.msra.mxu0 %v3208_v42  ;;  %v1340_v59 = vmax.f32 %v1328_v45, 0.0  ;;  %v2777_v16 = vld [vmem:[%s3345_s3 + $0x80] sm:$0xff]   ;;  %v2778_v17 = vld [vmem:[%s3345_s3 + $0x88] sm:$0xff]  }
 0x1f1   : > { %v1333_v57 = vadd.f32 %v1307_v18, %v1226_v55  ;;  %v3220_v58 = vadd.f32 %v1315_v20, %v1279_v56  ;;  %v1341_v61 = vmax.f32 %v1329_v49, 0.0  ;;  %v2779_v18 = vld [vmem:[%s3345_s3 + $0x90] sm:$0xff]   ;;  %v2780_v20 = vld [vmem:[%s3345_s3 + $0x98] sm:$0xff]  }
 0x1f2   : > { %v1342_v60 = vmax.f32 %v1332_v53, 0.0 }
 0x1f3   : > { %v1343_v62 = vmax.f32 %v1333_v57, 0.0 }
 0x1f4   : > { %v3222_v63 = vpack.c.bf16 %v1342_v60, %v1340_v59 }
 0x1f5   : > { %v3227_v2 = vpack.c.bf16 %v1343_v62, %v1341_v61 }
 0x1f6   : > { %2431 = vmatprep.subr.bf16.mxu1 %v3222_v63 }
 0x1f7   : > { %2423 = vmatprep.subr.bf16.mxu0 %v3227_v2  ;;  %2432 = vmatpush3.bf16.msra.mxu1 %v3222_v63 }
 0x1f8   : > { %2424 = vmatpush3.bf16.msra.mxu0 %v3227_v2  ;;  %2497 = vmatprep.subr.bf16.mxu1 %v2761_v0 }
 0x1f9   : > { %2437 = vmatprep.subr.bf16.mxu0 %v2761_v0 }
 0x1fa   : > { %2434 = vmatmul.mubr.msk.bf16.vlgmr.msra.gmra.mrb[12].mxu1 %vm271_vm7, %v2873_v24  ;;  %v2764_v24 = vld [vmem:[%s3345_s3 + $0x58] sm:$0xff]  }
 0x1fb   : > { %2426 = vmatmul.mubr.msk.bf16.vlgmr.msra.gmra.mrb[12].mxu0 %vm271_vm7, %v2869_v23  ;;  %2498 = vmatpush3.bf16.msra.mxu1 %v2761_v0  ;;  %v2765_v23 = vld [vmem:[%s3345_s3 + $0x60] sm:$0xff]  }
 0x1fc   : > { %2513 = vmatprep.mubr.bf16.mxu1 %v3208_v42  ;;  %2438 = vmatpush3.bf16.msra.mxu0 %v2761_v0 }
 0x1fd   : > { %2453 = vmatprep.mubr.bf16.mxu0 %v3206_v41  ;;  %2499 = vmatprep.subr.bf16.mxu1 %v2762_v3 }
 0x1fe   : > { %2439 = vmatprep.subr.bf16.mxu0 %v2762_v3 }
 0x1ff   : > { %2500 = vmatpush3.bf16.msra.mxu1 %v2762_v3 }
 0x200   : > { %2440 = vmatpush3.bf16.msra.mxu0 %v2762_v3  ;;  %2501 = vmatprep.subr.bf16.mxu1 %v2763_v4 }
 0x201   : > { %2441 = vmatprep.subr.bf16.mxu0 %v2763_v4 }
 0x203   : > { %2502 = vmatpush3.bf16.msra.mxu1 %v2763_v4 }
 0x204   : > { %2442 = vmatpush3.bf16.msra.mxu0 %v2763_v4  ;;  %2503 = vmatprep.subr.bf16.mxu1 %v2764_v24 }
 0x205   : > { %2443 = vmatprep.subr.bf16.mxu0 %v2764_v24 }
 0x207   : > { %2504 = vmatpush3.bf16.msra.mxu1 %v2764_v24 }
 0x208   : > { %2444 = vmatpush3.bf16.msra.mxu0 %v2764_v24  ;;  %2505 = vmatprep.subr.bf16.mxu1 %v2765_v23 }
 0x209   : > { %2445 = vmatprep.subr.bf16.mxu0 %v2765_v23 }
 0x20b   : > { %2506 = vmatpush3.bf16.msra.mxu1 %v2765_v23 }
 0x20c   : > { %2446 = vmatpush3.bf16.msra.mxu0 %v2765_v23  ;;  %2507 = vmatprep.subr.bf16.mxu1 %v2766_v5 }
 0x20d   : > { %2447 = vmatprep.subr.bf16.mxu0 %v2766_v5 }
 0x20f   : > { %2508 = vmatpush3.bf16.msra.mxu1 %v2766_v5 }
 0x210   : > { %2448 = vmatpush3.bf16.msra.mxu0 %v2766_v5  ;;  %2509 = vmatprep.subr.bf16.mxu1 %v2767_v6 }
 0x211   : > { %2449 = vmatprep.subr.bf16.mxu0 %v2767_v6 }
 0x213   : > { %2510 = vmatpush3.bf16.msra.mxu1 %v2767_v6 }
 0x214   : > { %2450 = vmatpush3.bf16.msra.mxu0 %v2767_v6  ;;  %2511 = vmatprep.subr.bf16.mxu1 %v2768_v7 }
 0x215   : > { %2451 = vmatprep.subr.bf16.mxu0 %v2768_v7 }
 0x217   : > { %2512 = vmatpush3.bf16.msra.mxu1 %v2768_v7 }
 0x218   : > { %2452 = vmatpush3.bf16.msra.mxu0 %v2768_v7  ;;  %2517 = vmatprep.subr.bf16.mxu1 %v2769_v8 }
 0x219   : > { %2457 = vmatprep.subr.bf16.mxu0 %v2769_v8 }
 0x21a   : > { %2514 = vmatmul.mubr.bf16.vlgmr.msra.gmra.mrb[16].mxu1 %v3227_v2 }
 0x21b   : > { %2454 = vmatmul.mubr.bf16.vlgmr.msra.gmra.mrb[16].mxu0 %v3222_v63  ;;  %2518 = vmatpush3.bf16.msra.mxu1 %v2769_v8 }
 0x21c   : > { %2533 = vmatprep.mubr.bf16.mxu1 %v3206_v41  ;;  %2519 = vmatprep.subr.bf16.mxu1 %v2770_v10  ;;  %v2308_v41 = vld [vmem:[%s3346_s4] ss:$0 sm:$0xff] }
 0x21d   : > { %2458 = vmatpush3.bf16.msra.mxu0 %v2769_v8 }
 0x21e   : > { %2459 = vmatprep.subr.bf16.mxu0 %v2770_v10 }
 0x21f   : > { %2520 = vmatpush3.bf16.msra.mxu1 %v2770_v10 }
 0x220   : > { %2521 = vmatprep.subr.bf16.mxu1 %v2771_v11 }
 0x221   : > { %2460 = vmatpush3.bf16.msra.mxu0 %v2770_v10 }
 0x222   : > { %2461 = vmatprep.subr.bf16.mxu0 %v2771_v11 }
 0x223   : > { %2522 = vmatpush3.bf16.msra.mxu1 %v2771_v11 }
 0x224   : > { %2523 = vmatprep.subr.bf16.mxu1 %v2772_v12 }
 0x225   : > { %2462 = vmatpush3.bf16.msra.mxu0 %v2771_v11 }
 0x226   : > { %2463 = vmatprep.subr.bf16.mxu0 %v2772_v12 }
 0x227   : > { %2524 = vmatpush3.bf16.msra.mxu1 %v2772_v12 }
 0x228   : > { %2525 = vmatprep.subr.bf16.mxu1 %v2773_v13 }
 0x229   : > { %2464 = vmatpush3.bf16.msra.mxu0 %v2772_v12 }
 0x22a   : > { %2465 = vmatprep.subr.bf16.mxu0 %v2773_v13 }
 0x22b   : > { %2526 = vmatpush3.bf16.msra.mxu1 %v2773_v13 }
 0x22c   : > { %2527 = vmatprep.subr.bf16.mxu1 %v2774_v9 }
 0x22d   : > { %2466 = vmatpush3.bf16.msra.mxu0 %v2773_v13 }
 0x22e   : > { %2467 = vmatprep.subr.bf16.mxu0 %v2774_v9 }
 0x22f   : > { %2528 = vmatpush3.bf16.msra.mxu1 %v2774_v9 }
 0x230   : > { %2529 = vmatprep.subr.bf16.mxu1 %v2775_v33 }
 0x231   : > { %2468 = vmatpush3.bf16.msra.mxu0 %v2774_v9 }
 0x232   : > { %2469 = vmatprep.subr.bf16.mxu0 %v2775_v33 }
 0x233   : > { %2530 = vmatpush3.bf16.msra.mxu1 %v2775_v33 }
 0x234   : > { %2531 = vmatprep.subr.bf16.mxu1 %v2776_v14 }
 0x235   : > { %2470 = vmatpush3.bf16.msra.mxu0 %v2775_v33 }
 0x236   : > { %2471 = vmatprep.subr.bf16.mxu0 %v2776_v14 }
 0x237   : > { %2532 = vmatpush3.bf16.msra.mxu1 %v2776_v14 }
 0x238   : > { %2537 = vmatprep.subr.bf16.mxu1 %v2777_v16 }
 0x239   : > { %2472 = vmatpush3.bf16.msra.mxu0 %v2776_v14 }
 0x23a   : > { %2534 = vmatmul.mubr.bf16.vlgmr.msra.gmra.mrb[16].mxu1 %v3222_v63  ;;  %2477 = vmatprep.subr.bf16.mxu0 %v2777_v16 }
 0x23b   : > { %2538 = vmatpush3.bf16.msra.mxu1 %v2777_v16 }
 0x23c   : > { %2539 = vmatprep.subr.bf16.mxu1 %v2778_v17 }
 0x23f   : > { %2540 = vmatpush3.bf16.msra.mxu1 %v2778_v17 }
 0x240   : > { %2541 = vmatprep.subr.bf16.mxu1 %v2779_v18 }
 0x243   : > { %2542 = vmatpush3.bf16.msra.mxu1 %v2779_v18 }
 0x244   : > { %2543 = vmatprep.subr.bf16.mxu1 %v2780_v20 }
 0x247   : > { %2544 = vmatpush3.bf16.msra.mxu1 %v2780_v20 }
 0x248   : > { %2545 = vmatprep.subr.bf16.mxu1 %v2781_v19 }
 0x24b   : > { %2546 = vmatpush3.bf16.msra.mxu1 %v2781_v19 }
 0x24c   : > { %2547 = vmatprep.subr.bf16.mxu1 %v2782_v21 }
 0x24f   : > { %2548 = vmatpush3.bf16.msra.mxu1 %v2782_v21 }
 0x250   : > { %2549 = vmatprep.subr.bf16.mxu1 %v2783_v22 }
 0x253   : > { %2550 = vmatpush3.bf16.msra.mxu1 %v2783_v22 }
 0x254   : > { %2551 = vmatprep.subr.bf16.mxu1 %v2784_v25 }
 0x257   : > { %2552 = vmatpush3.bf16.msra.mxu1 %v2784_v25 }
 0x2cd   : > { %v2435_v26 = vpop.f32.mrb[12].mxu1 }
 0x2ce   : > { %v2427_v27 = vpop.f32.mrb[12].mxu0  ;;  %v1433_v29 = vpop.f32.mrb[13].mxu1 }
 0x2cf   : > { %v1382_v30 = vpop.f32.mrb[13].mxu0  ;;  %v2436_v31 = vpop.f32.mrb[14].mxu1 }
 0x2d0   : > { %v1449_v1 = vpack.c.bf16 %v2436_v31, %v2435_v26  ;;  %v2428_v34 = vpop.f32.mrb[14].mxu0  ;;  %v1436_v35 = vpop.f32.mrb[15].mxu1 }
 0x2d1   : > { %v1398_v37 = vpack.c.bf16 %v2428_v34, %v2427_v27  ;;  %v1448_v38 = vpack.c.bf16 %v1436_v35, %v1433_v29  ;;  %v1385_v39 = vpop.f32.mrb[15].mxu0 }
 0x2d2   : > { %v1397_v40 = vpack.c.bf16 %v1385_v39, %v1382_v30 }
 0x2d3   : > { %2553 = vmatprep.mubr.bf16.mxu1 %v1448_v38 }
 0x2d4   : > { %2473 = vmatprep.mubr.bf16.mxu0 %v1397_v40  ;;  %2554 = vmatmul.mubr.bf16.vlgmr.msra.gmra.mrb[16].mxu1 %v1449_v1 }
 0x2d5   : > { %2474 = vmatmul.mubr.bf16.vlgmr.msra.gmra.mrb[16].mxu0 %v1398_v37 }
 0x2d6   : > { %2478 = vmatpush3.bf16.msra.mxu0 %v2777_v16  ;;  %2493 = vmatprep.mubr.bf16.mxu0 %v3208_v42 }
 0x2d7   : > { %2479 = vmatprep.subr.bf16.mxu0 %v2778_v17 }
 0x2da   : > { %2480 = vmatpush3.bf16.msra.mxu0 %v2778_v17 }
 0x2db   : > { %2481 = vmatprep.subr.bf16.mxu0 %v2779_v18 }
 0x2de   : > { %2482 = vmatpush3.bf16.msra.mxu0 %v2779_v18 }
 0x2df   : > { %2483 = vmatprep.subr.bf16.mxu0 %v2780_v20 }
 0x2e2   : > { %2484 = vmatpush3.bf16.msra.mxu0 %v2780_v20 }
 0x2e3   : > { %2485 = vmatprep.subr.bf16.mxu0 %v2781_v19 }
 0x2e6   : > { %2486 = vmatpush3.bf16.msra.mxu0 %v2781_v19 }
 0x2e7   : > { %2487 = vmatprep.subr.bf16.mxu0 %v2782_v21 }
 0x2ea   : > { %2488 = vmatpush3.bf16.msra.mxu0 %v2782_v21 }
 0x2eb   : > { %2489 = vmatprep.subr.bf16.mxu0 %v2783_v22 }
 0x2ee   : > { %2490 = vmatpush3.bf16.msra.mxu0 %v2783_v22 }
 0x2ef   : > { %2491 = vmatprep.subr.bf16.mxu0 %v2784_v25 }
 0x2f2   : > { %2492 = vmatpush3.bf16.msra.mxu0 %v2784_v25 }
 0x2f5   : > { %2494 = vmatmul.mubr.bf16.vlgmr.msra.gmra.mrb[16].mxu0 %v3227_v2 }
 0x3a7   : > { %v2555_v42 = vpop.f32.mrb[16].mxu1 }
 0x3a8   : > { %v1967_v43 = vadd.f32 %v2555_v42, %v2308_v41  ;;  %v1927_v44 = vpop.f32.mrb[17].mxu1 }
 0x3a9   : > { %v1965_v45 = vadd.f32 %v2308_v41, %v1927_v44  ;;  %v2556_v47 = vpop.f32.mrb[18].mxu1 }
 0x3aa   : > { %v1971_v48 = vadd.f32 %v1967_v43, %v3213_v50  ;;  %v1968_v49 = vadd.f32 %v2556_v47, %v2308_v41  ;;  %v1930_v51 = vpop.f32.mrb[19].mxu1 }
 0x3ab   : > { %v1969_v52 = vadd.f32 %v1965_v45, %v3200_v28  ;;  %v1966_v53 = vadd.f32 %v2308_v41, %v1930_v51 }
 0x3ac   : > { %v1975_v55 = vmax.f32 %v1971_v48, 0.0  ;;  %v1972_v56 = vadd.f32 %v1968_v49, %v3220_v58 }
 0x3ad   : > { %v1973_v57 = vmax.f32 %v1969_v52, 0.0  ;;  %v1970_v50 = vadd.f32 %v1966_v53, %v3204_v36 }
 0x3ae   : > { %v2327_v59 = vpack.c.bf16 %v1975_v55, %v1975_v55  ;;  %v1976_v60 = vmax.f32 %v1972_v56, 0.0 }
 0x3af   : > { %v2325_v61 = vpack.c.bf16 %v1973_v57, %v1973_v57  ;;  %v1974_v28 = vmax.f32 %v1970_v50, 0.0 }
 0x3b0   : > { %2015 = vst [vmem:[%s3324_s16 + $0x14] sm:$0xf] %v2327_v59  ;;  %v2328_v62 = vpack.c.bf16 %v1976_v60, %v1976_v60 }
 0x3b1   : > { %2013 = vst [vmem:[%s3324_s16 + $0x4] sm:$0xf] %v2325_v61  ;;  %v2326_v58 = vpack.c.bf16 %v1974_v28, %v1974_v28 }
 0x3b2   : > { %2016 = vst [vmem:[%s3324_s16 + $0x1c] sm:$0xf] %v2328_v62 }
 0x3b3   : > { %2014 = vst [vmem:[%s3324_s16 + $0xc] sm:$0xf] %v2326_v58 }
 0x3c8   : > { %v2495_v63 = vpop.f32.mrb[16].mxu0 }
 0x3c9   : > { %v1955_v0 = vadd.f32 %v2495_v63, %v2308_v41  ;;  %v1776_v2 = vpop.f32.mrb[17].mxu0 }
 0x3ca   : > { %v1953_v3 = vadd.f32 %v2308_v41, %v1776_v2  ;;  %v2496_v4 = vpop.f32.mrb[18].mxu0 }
 0x3cb   : > { %v1959_v24 = vadd.f32 %v1955_v0, %v3210_v46  ;;  %v1956_v36 = vadd.f32 %v2496_v4, %v2308_v41  ;;  %v1779_v23 = vpop.f32.mrb[19].mxu0 }
 0x3cc   : > { %v1957_v5 = vadd.f32 %v1953_v3, %v3198_v15  ;;  %v1954_v6 = vadd.f32 %v2308_v41, %v1779_v23 }
 0x3cd   : > { %v1963_v7 = vmax.f32 %v1959_v24, 0.0  ;;  %v1960_v8 = vadd.f32 %v1956_v36, %v3217_v54 }
 0x3ce   : > { %v1961_v10 = vmax.f32 %v1957_v5, 0.0  ;;  %v1958_v11 = vadd.f32 %v1954_v6, %v3202_v32 }
 0x3cf   : > { %v2323_v12 = vpack.c.bf16 %v1963_v7, %v1963_v7  ;;  %v1964_v13 = vmax.f32 %v1960_v8, 0.0 }
 0x3d0   : > { %v2321_v9 = vpack.c.bf16 %v1961_v10, %v1961_v10  ;;  %v1962_v33 = vmax.f32 %v1958_v11, 0.0 }
 0x3d1   : > { %1995 = vst [vmem:[%s3324_s16 + $0x10] sm:$0xf] %v2323_v12  ;;  %v2324_v14 = vpack.c.bf16 %v1964_v13, %v1964_v13 }
 0x3d2   : > { %1993 = vst [vmem:[%s3324_s16] sm:$0xf] %v2321_v9  ;;  %v2322_v46 = vpack.c.bf16 %v1962_v33, %v1962_v33 }
 0x3d3   : > { %1996 = vst [vmem:[%s3324_s16 + $0x18] sm:$0xf] %v2324_v14 }
 0x3d4   : > { %1994 = vst [vmem:[%s3324_s16 + $0x8] sm:$0xf] %v2322_v46 }
 0x3d5 PF: > { %s15_s18 = sadd.s32 1, %s2791_s18  }
 0x3d6   : > { %p12_p4 = scmp.ge.s32.totalorder %s15_s18, 4  }
 0x3d8   :  { %14 = sbr.rel (!%p12_p4) target bundleno = 1 (0x1), region = 74 }

</bundles_post_ra>
